<compile_context>
chip_gen: v5e
topology: v5e:2x2
jax: 0.10.0
libtpu: 0.0.40
codegen_flags: <defaults>
</compile_context>

<pallas_src>
import functools

import jax
import jax.numpy as jnp
from jax.experimental import pallas as pl
from jax.experimental.pallas import tpu as pltpu

LEAKY_SLOPE = 0.01  # PyTorch nn.LeakyReLU default negative_slope


def _resblock_kernel(x_ref, w1_ref, b1_ref, w2_ref, b2_ref, o_ref, *, H, W):
    # x_ref : (B, C, H*W) VMEM f32 — B images, channels on sublanes, row-major
    #                                 flattened spatial (y*W + x) on lanes.
    # w*_ref: (9*C, C, 1) VMEM f32  — index [tap*C + ci] -> (C_out, 1) column.
    # b*_ref: (C, 1)      VMEM f32
    # o_ref : (B, C, H*W) VMEM
    B, C, HW = x_ref.shape

    # ---- lane-coordinate masks: built ONCE, shared across channels, images
    # ---- and both convolutions.
    col = jax.lax.broadcasted_iota(jnp.int32, (1, HW), 1)
    if W & (W - 1) == 0:                       # power-of-two width: shift/and
        w_bits = W.bit_length() - 1
        yy = col >> w_bits
        xx = col & (W - 1)
    else:
        yy = col // W
        xx = col % W

    def edge_mask(coord, d, size):
        # Only the side that can go off-image needs a comparison.
        if d == 0:
            return None
        return (coord >= -d) if d < 0 else (coord < size - d)

    taps = []
    for ky in range(3):
        for kx in range(3):
            dy, dx = ky - 1, kx - 1
            shift = (-(dy * W + dx)) % HW      # static lane-rotation amount
            my = edge_mask(yy, dy, H)
            mx = edge_mask(xx, dx, W)
            if my is None:
                mask = mx
            elif mx is None:
                mask = my
            else:
                mask = my & mx
            taps.append((ky * 3 + kx, shift, mask))

    def conv3x3(img, w_ref, b_ref):
        """3x3 stride-1 zero-pad-1 conv + bias on one (C, HW) plane set."""
        acc = None
        for tap, shift, mask in taps:
            if mask is None:                   # center tap: no roll, no mask
                src = img
            else:
                src = jnp.where(mask, pltpu.roll(img, shift=shift, axis=1), 0.0)
            for ci in range(C):
                plane = src[ci:ci + 1, :]      # (1, HW)
                w_col = w_ref[tap * C + ci]    # (C, 1) weight column (VMEM)
                term = w_col * plane           # broadcast FMA -> (C, HW)
                acc = term if acc is None else acc + term
        return acc + b_ref[...]                # (C,1) bias broadcast

    for b in range(B):                         # static unrolled image loop
        x = x_ref[b]                           # (C, HW)
        h = conv3x3(x, w1_ref, b1_ref)
        h = jnp.maximum(h, LEAKY_SLOPE * h)    # LeakyReLU
        y = conv3x3(h, w2_ref, b2_ref)
        o_ref[b] = (x + y).astype(o_ref.dtype)  # residual add


def _is_multicore_tc_chip():
    """Best-effort: does this chip have >1 TensorCore sharing a grid?"""
    try:
        kind = jax.devices()[0].device_kind.lower()
    except Exception:
        return False
    return any(tag in kind for tag in ("v7", "7x", "v4", "v5p"))


def resblock_pallas(x_nchw, w1_oihw, b1, w2_oihw, b2):
    """x_nchw: (N, C, H, W) float32. Weights in PyTorch OIHW layout, biases (C,)."""
    N, C, H, W = x_nchw.shape
    HW = H * W

    # Reshape-only glue: NCHW with merged trailing spatial dims IS the kernel
    # layout — no transposes / pads / extra HBM round-trips for x.
    x_flat = x_nchw.reshape(N, C, HW).astype(jnp.float32)

    def prep_w(w_oihw):
        # OIHW (co, ci, ky, kx) -> (ky, kx, ci, co) -> (9*C_in, C_out, 1)
        return (jnp.asarray(w_oihw, jnp.float32)
                .transpose(2, 3, 1, 0)
                .reshape(9 * C, C)[:, :, None])

    w1_cols = prep_w(w1_oihw)
    w2_cols = prep_w(w2_oihw)
    b1_col = jnp.asarray(b1, jnp.float32).reshape(C, 1)
    b2_col = jnp.asarray(b2, jnp.float32).reshape(C, 1)

    # Batch mapping: fold the whole batch into one grid step on 1-TC chips
    # (v5e/v6e: removes per-step overhead); one image per step on multi-TC
    # chips (v7x: megacore sharding via "parallel").
    if _is_multicore_tc_chip() and N >= 2:
        imgs_per_block, grid = 1, (N,)
    else:
        imgs_per_block, grid = N, (1,)

    kernel = functools.partial(_resblock_kernel, H=H, W=W)

    const = lambda n: (0, 0, 0)   # weights/bias: same block every step (resident)
    out_flat = pl.pallas_call(
        kernel,
        out_shape=jax.ShapeDtypeStruct((N, C, HW), x_nchw.dtype),
        grid_spec=pltpu.PrefetchScalarGridSpec(
            num_scalar_prefetch=0,
            grid=grid,
            in_specs=[
                pl.BlockSpec((imgs_per_block, C, HW), lambda n: (n, 0, 0)),  # x
                pl.BlockSpec((9 * C, C, 1), const),                          # w1 cols
                pl.BlockSpec((C, 1), lambda n: (0, 0)),                      # b1
                pl.BlockSpec((9 * C, C, 1), const),                          # w2 cols
                pl.BlockSpec((C, 1), lambda n: (0, 0)),                      # b2
            ],
            out_specs=pl.BlockSpec((imgs_per_block, C, HW), lambda n: (n, 0, 0)),
        ),
        compiler_params=pltpu.CompilerParams(
            dimension_semantics=("parallel",)),
    )(x_flat, w1_cols, b1_col, w2_cols, b2_col)

    return out_flat.reshape(N, C, H, W)


def _resblock_reference(x_nchw, w1_oihw, b1, w2_oihw, b2):
    """Pure-JAX reference matching the PyTorch forward (NCHW / OIHW)."""
    def conv(x, w, b):
        y = jax.lax.conv_general_dilated(
            x, w, window_strides=(1, 1), padding="SAME",
            dimension_numbers=("NCHW", "OIHW", "NCHW"))
        return y + b[None, :, None, None]
    h = conv(x_nchw, w1_oihw, b1)
    h = jnp.where(h > 0, h, LEAKY_SLOPE * h)
    return x_nchw + conv(h, w2_oihw, b2)


if __name__ == "__main__":
    # small shapes consistent with the module: batch=2, channels=4, spatial=16
    N, C, H, W = 2, 4, 16, 16
    key = jax.random.PRNGKey(0)
    kx_, kw1, kb1, kw2, kb2 = jax.random.split(key, 5)

    x = jax.random.normal(kx_, (N, C, H, W), dtype=jnp.float32)
    # deterministic synthetic init (module uses orthogonal init + zero bias;
    # exact init values don't matter for kernel semantics — non-zero biases
    # exercise the bias path)
    w1 = 0.1 * jax.random.normal(kw1, (C, C, 3, 3), dtype=jnp.float32)   # OIHW
    b1 = 0.1 * jax.random.normal(kb1, (C,), dtype=jnp.float32)
    w2 = 0.1 * jax.random.normal(kw2, (C, C, 3, 3), dtype=jnp.float32)   # OIHW
    b2 = 0.1 * jax.random.normal(kb2, (C,), dtype=jnp.float32)

    out = jax.block_until_ready(resblock_pallas(x, w1, b1, w2, b2))
    ref = _resblock_reference(x, w1, b1, w2, b2)

    assert out.shape == (N, C, H, W)
    assert jnp.allclose(out, ref, atol=1e-4, rtol=1e-4), "mismatch vs reference"

    print("KERNEL_OK")
</pallas_src>

<mosaic_0001>
module attributes {stable_mosaic.version = 11 : i64} {
  func.func @_resblock_kernel(%arg0: i32, %arg1: memref<2x4x256xf32, #tpu.memory_space<vmem>>, %arg2: memref<36x4x1xf32, #tpu.memory_space<vmem>>, %arg3: memref<4x1xf32, #tpu.memory_space<vmem>>, %arg4: memref<36x4x1xf32, #tpu.memory_space<vmem>>, %arg5: memref<4x1xf32, #tpu.memory_space<vmem>>, %arg6: memref<2x4x256xf32, #tpu.memory_space<vmem>>) attributes {dimension_semantics = [#tpu.dimension_semantics<parallel>], iteration_bounds = array<i64: 1>, scalar_prefetch = 0 : i64, scratch_operands = 0 : i64, tpu.core_type = #tpu.core_type<tc>, window_params = [{transform_indices = @transform_0, window_bounds = array<i64: 2, 4, 256>}, {pipeline_mode = #tpu.pipeline_mode<synchronous>, transform_indices = @transform_1, window_bounds = array<i64: 36, 4, 1>}, {pipeline_mode = #tpu.pipeline_mode<synchronous>, transform_indices = @transform_2, window_bounds = array<i64: 4, 1>}, {pipeline_mode = #tpu.pipeline_mode<synchronous>, transform_indices = @transform_3, window_bounds = array<i64: 36, 4, 1>}, {pipeline_mode = #tpu.pipeline_mode<synchronous>, transform_indices = @transform_4, window_bounds = array<i64: 4, 1>}, {transform_indices = @transform_5, window_bounds = array<i64: 2, 4, 256>}]} {
    %0 = tpu.iota {dimensions = array<i32: 1>} : vector<1x256xi32>
    %c4_i32 = arith.constant 4 : i32
    %1 = vector.broadcast %c4_i32 : i32 to vector<1x256xi32>
    %2 = arith.shrsi %0, %1 : vector<1x256xi32>
    %c15_i32 = arith.constant 15 : i32
    %3 = vector.broadcast %c15_i32 : i32 to vector<1x256xi32>
    %4 = arith.andi %0, %3 : vector<1x256xi32>
    %c1_i32 = arith.constant 1 : i32
    %5 = vector.broadcast %c1_i32 : i32 to vector<1x256xi32>
    %6 = arith.cmpi sge, %2, %5 : vector<1x256xi32>
    %c1_i32_0 = arith.constant 1 : i32
    %7 = vector.broadcast %c1_i32_0 : i32 to vector<1x256xi32>
    %8 = arith.cmpi sge, %4, %7 : vector<1x256xi32>
    %9 = arith.andi %6, %8 : vector<1x256xi1>
    %c1_i32_1 = arith.constant 1 : i32
    %10 = vector.broadcast %c1_i32_1 : i32 to vector<1x256xi32>
    %11 = arith.cmpi sge, %2, %10 : vector<1x256xi32>
    %c1_i32_2 = arith.constant 1 : i32
    %12 = vector.broadcast %c1_i32_2 : i32 to vector<1x256xi32>
    %13 = arith.cmpi sge, %2, %12 : vector<1x256xi32>
    %c15_i32_3 = arith.constant 15 : i32
    %14 = vector.broadcast %c15_i32_3 : i32 to vector<1x256xi32>
    %15 = arith.cmpi slt, %4, %14 : vector<1x256xi32>
    %16 = arith.andi %13, %15 : vector<1x256xi1>
    %c1_i32_4 = arith.constant 1 : i32
    %17 = vector.broadcast %c1_i32_4 : i32 to vector<1x256xi32>
    %18 = arith.cmpi sge, %4, %17 : vector<1x256xi32>
    %c15_i32_5 = arith.constant 15 : i32
    %19 = vector.broadcast %c15_i32_5 : i32 to vector<1x256xi32>
    %20 = arith.cmpi slt, %4, %19 : vector<1x256xi32>
    %c15_i32_6 = arith.constant 15 : i32
    %21 = vector.broadcast %c15_i32_6 : i32 to vector<1x256xi32>
    %22 = arith.cmpi slt, %2, %21 : vector<1x256xi32>
    %c1_i32_7 = arith.constant 1 : i32
    %23 = vector.broadcast %c1_i32_7 : i32 to vector<1x256xi32>
    %24 = arith.cmpi sge, %4, %23 : vector<1x256xi32>
    %25 = arith.andi %22, %24 : vector<1x256xi1>
    %c15_i32_8 = arith.constant 15 : i32
    %26 = vector.broadcast %c15_i32_8 : i32 to vector<1x256xi32>
    %27 = arith.cmpi slt, %2, %26 : vector<1x256xi32>
    %c15_i32_9 = arith.constant 15 : i32
    %28 = vector.broadcast %c15_i32_9 : i32 to vector<1x256xi32>
    %29 = arith.cmpi slt, %2, %28 : vector<1x256xi32>
    %c15_i32_10 = arith.constant 15 : i32
    %30 = vector.broadcast %c15_i32_10 : i32 to vector<1x256xi32>
    %31 = arith.cmpi slt, %4, %30 : vector<1x256xi32>
    %32 = arith.andi %29, %31 : vector<1x256xi1>
    %c0 = arith.constant 0 : index
    %c0_11 = arith.constant 0 : index
    %c0_12 = arith.constant 0 : index
    %33 = vector.load %arg1[%c0, %c0_11, %c0_12] : memref<2x4x256xf32, #tpu.memory_space<vmem>>, vector<1x4x256xf32>
    %34 = vector.shape_cast %33 : vector<1x4x256xf32> to vector<4x256xf32>
    %c17_i32 = arith.constant 17 : i32
    %35 = tpu.dynamic_rotate %34 by %c17_i32 dim 1 : vector<4x256xf32>, i32 -> vector<4x256xf32>
    %cst = arith.constant 0.000000e+00 : f32
    %36 = vector.shape_cast %9 : vector<1x256xi1> to vector<1x256xi1>
    %37 = vector.broadcast %36 : vector<1x256xi1> to vector<4x256xi1>
    %38 = vector.broadcast %cst : f32 to vector<4x256xf32>
    %39 = arith.select %37, %35, %38 : vector<4x256xi1>, vector<4x256xf32>
    %40 = vector.extract_strided_slice %39 {offsets = [0, 0], sizes = [1, 256], strides = [1, 1]} : vector<4x256xf32> to vector<1x256xf32>
    %c0_13 = arith.constant 0 : index
    %c0_14 = arith.constant 0 : index
    %c0_15 = arith.constant 0 : index
    %41 = vector.load %arg2[%c0_13, %c0_14, %c0_15] : memref<36x4x1xf32, #tpu.memory_space<vmem>>, vector<1x4x1xf32>
    %42 = vector.shape_cast %41 : vector<1x4x1xf32> to vector<4x1xf32>
    %43 = vector.broadcast %42 : vector<4x1xf32> to vector<4x256xf32>
    %44 = vector.broadcast %40 : vector<1x256xf32> to vector<4x256xf32>
    %45 = arith.mulf %43, %44 : vector<4x256xf32>
    %46 = vector.extract_strided_slice %39 {offsets = [1, 0], sizes = [1, 256], strides = [1, 1]} : vector<4x256xf32> to vector<1x256xf32>
    %c1 = arith.constant 1 : index
    %c0_16 = arith.constant 0 : index
    %c0_17 = arith.constant 0 : index
    %47 = vector.load %arg2[%c1, %c0_16, %c0_17] : memref<36x4x1xf32, #tpu.memory_space<vmem>>, vector<1x4x1xf32>
    %48 = vector.shape_cast %47 : vector<1x4x1xf32> to vector<4x1xf32>
    %49 = vector.broadcast %48 : vector<4x1xf32> to vector<4x256xf32>
    %50 = vector.broadcast %46 : vector<1x256xf32> to vector<4x256xf32>
    %51 = arith.mulf %49, %50 : vector<4x256xf32>
    %52 = arith.addf %45, %51 : vector<4x256xf32>
    %53 = vector.extract_strided_slice %39 {offsets = [2, 0], sizes = [1, 256], strides = [1, 1]} : vector<4x256xf32> to vector<1x256xf32>
    %c2 = arith.constant 2 : index
    %c0_18 = arith.constant 0 : index
    %c0_19 = arith.constant 0 : index
    %54 = vector.load %arg2[%c2, %c0_18, %c0_19] : memref<36x4x1xf32, #tpu.memory_space<vmem>>, vector<1x4x1xf32>
    %55 = vector.shape_cast %54 : vector<1x4x1xf32> to vector<4x1xf32>
    %56 = vector.broadcast %55 : vector<4x1xf32> to vector<4x256xf32>
    %57 = vector.broadcast %53 : vector<1x256xf32> to vector<4x256xf32>
    %58 = arith.mulf %56, %57 : vector<4x256xf32>
    %59 = arith.addf %52, %58 : vector<4x256xf32>
    %60 = vector.extract_strided_slice %39 {offsets = [3, 0], sizes = [1, 256], strides = [1, 1]} : vector<4x256xf32> to vector<1x256xf32>
    %c3 = arith.constant 3 : index
    %c0_20 = arith.constant 0 : index
    %c0_21 = arith.constant 0 : index
    %61 = vector.load %arg2[%c3, %c0_20, %c0_21] : memref<36x4x1xf32, #tpu.memory_space<vmem>>, vector<1x4x1xf32>
    %62 = vector.shape_cast %61 : vector<1x4x1xf32> to vector<4x1xf32>
    %63 = vector.broadcast %62 : vector<4x1xf32> to vector<4x256xf32>
    %64 = vector.broadcast %60 : vector<1x256xf32> to vector<4x256xf32>
    %65 = arith.mulf %63, %64 : vector<4x256xf32>
    %66 = arith.addf %59, %65 : vector<4x256xf32>
    %c16_i32 = arith.constant 16 : i32
    %67 = tpu.dynamic_rotate %34 by %c16_i32 dim 1 : vector<4x256xf32>, i32 -> vector<4x256xf32>
    %cst_22 = arith.constant 0.000000e+00 : f32
    %68 = vector.shape_cast %11 : vector<1x256xi1> to vector<1x256xi1>
    %69 = vector.broadcast %68 : vector<1x256xi1> to vector<4x256xi1>
    %70 = vector.broadcast %cst_22 : f32 to vector<4x256xf32>
    %71 = arith.select %69, %67, %70 : vector<4x256xi1>, vector<4x256xf32>
    %72 = vector.extract_strided_slice %71 {offsets = [0, 0], sizes = [1, 256], strides = [1, 1]} : vector<4x256xf32> to vector<1x256xf32>
    %c4 = arith.constant 4 : index
    %c0_23 = arith.constant 0 : index
    %c0_24 = arith.constant 0 : index
    %73 = vector.load %arg2[%c4, %c0_23, %c0_24] : memref<36x4x1xf32, #tpu.memory_space<vmem>>, vector<1x4x1xf32>
    %74 = vector.shape_cast %73 : vector<1x4x1xf32> to vector<4x1xf32>
    %75 = vector.broadcast %74 : vector<4x1xf32> to vector<4x256xf32>
    %76 = vector.broadcast %72 : vector<1x256xf32> to vector<4x256xf32>
    %77 = arith.mulf %75, %76 : vector<4x256xf32>
    %78 = arith.addf %66, %77 : vector<4x256xf32>
    %79 = vector.extract_strided_slice %71 {offsets = [1, 0], sizes = [1, 256], strides = [1, 1]} : vector<4x256xf32> to vector<1x256xf32>
    %c5 = arith.constant 5 : index
    %c0_25 = arith.constant 0 : index
    %c0_26 = arith.constant 0 : index
    %80 = vector.load %arg2[%c5, %c0_25, %c0_26] : memref<36x4x1xf32, #tpu.memory_space<vmem>>, vector<1x4x1xf32>
    %81 = vector.shape_cast %80 : vector<1x4x1xf32> to vector<4x1xf32>
    %82 = vector.broadcast %81 : vector<4x1xf32> to vector<4x256xf32>
    %83 = vector.broadcast %79 : vector<1x256xf32> to vector<4x256xf32>
    %84 = arith.mulf %82, %83 : vector<4x256xf32>
    %85 = arith.addf %78, %84 : vector<4x256xf32>
    %86 = vector.extract_strided_slice %71 {offsets = [2, 0], sizes = [1, 256], strides = [1, 1]} : vector<4x256xf32> to vector<1x256xf32>
    %c6 = arith.constant 6 : index
    %c0_27 = arith.constant 0 : index
    %c0_28 = arith.constant 0 : index
    %87 = vector.load %arg2[%c6, %c0_27, %c0_28] : memref<36x4x1xf32, #tpu.memory_space<vmem>>, vector<1x4x1xf32>
    %88 = vector.shape_cast %87 : vector<1x4x1xf32> to vector<4x1xf32>
    %89 = vector.broadcast %88 : vector<4x1xf32> to vector<4x256xf32>
    %90 = vector.broadcast %86 : vector<1x256xf32> to vector<4x256xf32>
    %91 = arith.mulf %89, %90 : vector<4x256xf32>
    %92 = arith.addf %85, %91 : vector<4x256xf32>
    %93 = vector.extract_strided_slice %71 {offsets = [3, 0], sizes = [1, 256], strides = [1, 1]} : vector<4x256xf32> to vector<1x256xf32>
    %c7 = arith.constant 7 : index
    %c0_29 = arith.constant 0 : index
    %c0_30 = arith.constant 0 : index
    %94 = vector.load %arg2[%c7, %c0_29, %c0_30] : memref<36x4x1xf32, #tpu.memory_space<vmem>>, vector<1x4x1xf32>
    %95 = vector.shape_cast %94 : vector<1x4x1xf32> to vector<4x1xf32>
    %96 = vector.broadcast %95 : vector<4x1xf32> to vector<4x256xf32>
    %97 = vector.broadcast %93 : vector<1x256xf32> to vector<4x256xf32>
    %98 = arith.mulf %96, %97 : vector<4x256xf32>
    %99 = arith.addf %92, %98 : vector<4x256xf32>
    %c15_i32_31 = arith.constant 15 : i32
    %100 = tpu.dynamic_rotate %34 by %c15_i32_31 dim 1 : vector<4x256xf32>, i32 -> vector<4x256xf32>
    %cst_32 = arith.constant 0.000000e+00 : f32
    %101 = vector.shape_cast %16 : vector<1x256xi1> to vector<1x256xi1>
    %102 = vector.broadcast %101 : vector<1x256xi1> to vector<4x256xi1>
    %103 = vector.broadcast %cst_32 : f32 to vector<4x256xf32>
    %104 = arith.select %102, %100, %103 : vector<4x256xi1>, vector<4x256xf32>
    %105 = vector.extract_strided_slice %104 {offsets = [0, 0], sizes = [1, 256], strides = [1, 1]} : vector<4x256xf32> to vector<1x256xf32>
    %c8 = arith.constant 8 : index
    %c0_33 = arith.constant 0 : index
    %c0_34 = arith.constant 0 : index
    %106 = vector.load %arg2[%c8, %c0_33, %c0_34] : memref<36x4x1xf32, #tpu.memory_space<vmem>>, vector<1x4x1xf32>
    %107 = vector.shape_cast %106 : vector<1x4x1xf32> to vector<4x1xf32>
    %108 = vector.broadcast %107 : vector<4x1xf32> to vector<4x256xf32>
    %109 = vector.broadcast %105 : vector<1x256xf32> to vector<4x256xf32>
    %110 = arith.mulf %108, %109 : vector<4x256xf32>
    %111 = arith.addf %99, %110 : vector<4x256xf32>
    %112 = vector.extract_strided_slice %104 {offsets = [1, 0], sizes = [1, 256], strides = [1, 1]} : vector<4x256xf32> to vector<1x256xf32>
    %c9 = arith.constant 9 : index
    %c0_35 = arith.constant 0 : index
    %c0_36 = arith.constant 0 : index
    %113 = vector.load %arg2[%c9, %c0_35, %c0_36] : memref<36x4x1xf32, #tpu.memory_space<vmem>>, vector<1x4x1xf32>
    %114 = vector.shape_cast %113 : vector<1x4x1xf32> to vector<4x1xf32>
    %115 = vector.broadcast %114 : vector<4x1xf32> to vector<4x256xf32>
    %116 = vector.broadcast %112 : vector<1x256xf32> to vector<4x256xf32>
    %117 = arith.mulf %115, %116 : vector<4x256xf32>
    %118 = arith.addf %111, %117 : vector<4x256xf32>
    %119 = vector.extract_strided_slice %104 {offsets = [2, 0], sizes = [1, 256], strides = [1, 1]} : vector<4x256xf32> to vector<1x256xf32>
    %c10 = arith.constant 10 : index
    %c0_37 = arith.constant 0 : index
    %c0_38 = arith.constant 0 : index
    %120 = vector.load %arg2[%c10, %c0_37, %c0_38] : memref<36x4x1xf32, #tpu.memory_space<vmem>>, vector<1x4x1xf32>
    %121 = vector.shape_cast %120 : vector<1x4x1xf32> to vector<4x1xf32>
    %122 = vector.broadcast %121 : vector<4x1xf32> to vector<4x256xf32>
    %123 = vector.broadcast %119 : vector<1x256xf32> to vector<4x256xf32>
    %124 = arith.mulf %122, %123 : vector<4x256xf32>
    %125 = arith.addf %118, %124 : vector<4x256xf32>
    %126 = vector.extract_strided_slice %104 {offsets = [3, 0], sizes = [1, 256], strides = [1, 1]} : vector<4x256xf32> to vector<1x256xf32>
    %c11 = arith.constant 11 : index
    %c0_39 = arith.constant 0 : index
    %c0_40 = arith.constant 0 : index
    %127 = vector.load %arg2[%c11, %c0_39, %c0_40] : memref<36x4x1xf32, #tpu.memory_space<vmem>>, vector<1x4x1xf32>
    %128 = vector.shape_cast %127 : vector<1x4x1xf32> to vector<4x1xf32>
    %129 = vector.broadcast %128 : vector<4x1xf32> to vector<4x256xf32>
    %130 = vector.broadcast %126 : vector<1x256xf32> to vector<4x256xf32>
    %131 = arith.mulf %129, %130 : vector<4x256xf32>
    %132 = arith.addf %125, %131 : vector<4x256xf32>
    %c1_i32_41 = arith.constant 1 : i32
    %133 = tpu.dynamic_rotate %34 by %c1_i32_41 dim 1 : vector<4x256xf32>, i32 -> vector<4x256xf32>
    %cst_42 = arith.constant 0.000000e+00 : f32
    %134 = vector.shape_cast %18 : vector<1x256xi1> to vector<1x256xi1>
    %135 = vector.broadcast %134 : vector<1x256xi1> to vector<4x256xi1>
    %136 = vector.broadcast %cst_42 : f32 to vector<4x256xf32>
    %137 = arith.select %135, %133, %136 : vector<4x256xi1>, vector<4x256xf32>
    %138 = vector.extract_strided_slice %137 {offsets = [0, 0], sizes = [1, 256], strides = [1, 1]} : vector<4x256xf32> to vector<1x256xf32>
    %c12 = arith.constant 12 : index
    %c0_43 = arith.constant 0 : index
    %c0_44 = arith.constant 0 : index
    %139 = vector.load %arg2[%c12, %c0_43, %c0_44] : memref<36x4x1xf32, #tpu.memory_space<vmem>>, vector<1x4x1xf32>
    %140 = vector.shape_cast %139 : vector<1x4x1xf32> to vector<4x1xf32>
    %141 = vector.broadcast %140 : vector<4x1xf32> to vector<4x256xf32>
    %142 = vector.broadcast %138 : vector<1x256xf32> to vector<4x256xf32>
    %143 = arith.mulf %141, %142 : vector<4x256xf32>
    %144 = arith.addf %132, %143 : vector<4x256xf32>
    %145 = vector.extract_strided_slice %137 {offsets = [1, 0], sizes = [1, 256], strides = [1, 1]} : vector<4x256xf32> to vector<1x256xf32>
    %c13 = arith.constant 13 : index
    %c0_45 = arith.constant 0 : index
    %c0_46 = arith.constant 0 : index
    %146 = vector.load %arg2[%c13, %c0_45, %c0_46] : memref<36x4x1xf32, #tpu.memory_space<vmem>>, vector<1x4x1xf32>
    %147 = vector.shape_cast %146 : vector<1x4x1xf32> to vector<4x1xf32>
    %148 = vector.broadcast %147 : vector<4x1xf32> to vector<4x256xf32>
    %149 = vector.broadcast %145 : vector<1x256xf32> to vector<4x256xf32>
    %150 = arith.mulf %148, %149 : vector<4x256xf32>
    %151 = arith.addf %144, %150 : vector<4x256xf32>
    %152 = vector.extract_strided_slice %137 {offsets = [2, 0], sizes = [1, 256], strides = [1, 1]} : vector<4x256xf32> to vector<1x256xf32>
    %c14 = arith.constant 14 : index
    %c0_47 = arith.constant 0 : index
    %c0_48 = arith.constant 0 : index
    %153 = vector.load %arg2[%c14, %c0_47, %c0_48] : memref<36x4x1xf32, #tpu.memory_space<vmem>>, vector<1x4x1xf32>
    %154 = vector.shape_cast %153 : vector<1x4x1xf32> to vector<4x1xf32>
    %155 = vector.broadcast %154 : vector<4x1xf32> to vector<4x256xf32>
    %156 = vector.broadcast %152 : vector<1x256xf32> to vector<4x256xf32>
    %157 = arith.mulf %155, %156 : vector<4x256xf32>
    %158 = arith.addf %151, %157 : vector<4x256xf32>
    %159 = vector.extract_strided_slice %137 {offsets = [3, 0], sizes = [1, 256], strides = [1, 1]} : vector<4x256xf32> to vector<1x256xf32>
    %c15 = arith.constant 15 : index
    %c0_49 = arith.constant 0 : index
    %c0_50 = arith.constant 0 : index
    %160 = vector.load %arg2[%c15, %c0_49, %c0_50] : memref<36x4x1xf32, #tpu.memory_space<vmem>>, vector<1x4x1xf32>
    %161 = vector.shape_cast %160 : vector<1x4x1xf32> to vector<4x1xf32>
    %162 = vector.broadcast %161 : vector<4x1xf32> to vector<4x256xf32>
    %163 = vector.broadcast %159 : vector<1x256xf32> to vector<4x256xf32>
    %164 = arith.mulf %162, %163 : vector<4x256xf32>
    %165 = arith.addf %158, %164 : vector<4x256xf32>
    %166 = vector.extract_strided_slice %34 {offsets = [0, 0], sizes = [1, 256], strides = [1, 1]} : vector<4x256xf32> to vector<1x256xf32>
    %c16 = arith.constant 16 : index
    %c0_51 = arith.constant 0 : index
    %c0_52 = arith.constant 0 : index
    %167 = vector.load %arg2[%c16, %c0_51, %c0_52] : memref<36x4x1xf32, #tpu.memory_space<vmem>>, vector<1x4x1xf32>
    %168 = vector.shape_cast %167 : vector<1x4x1xf32> to vector<4x1xf32>
    %169 = vector.broadcast %168 : vector<4x1xf32> to vector<4x256xf32>
    %170 = vector.broadcast %166 : vector<1x256xf32> to vector<4x256xf32>
    %171 = arith.mulf %169, %170 : vector<4x256xf32>
    %172 = arith.addf %165, %171 : vector<4x256xf32>
    %173 = vector.extract_strided_slice %34 {offsets = [1, 0], sizes = [1, 256], strides = [1, 1]} : vector<4x256xf32> to vector<1x256xf32>
    %c17 = arith.constant 17 : index
    %c0_53 = arith.constant 0 : index
    %c0_54 = arith.constant 0 : index
    %174 = vector.load %arg2[%c17, %c0_53, %c0_54] : memref<36x4x1xf32, #tpu.memory_space<vmem>>, vector<1x4x1xf32>
    %175 = vector.shape_cast %174 : vector<1x4x1xf32> to vector<4x1xf32>
    %176 = vector.broadcast %175 : vector<4x1xf32> to vector<4x256xf32>
    %177 = vector.broadcast %173 : vector<1x256xf32> to vector<4x256xf32>
    %178 = arith.mulf %176, %177 : vector<4x256xf32>
    %179 = arith.addf %172, %178 : vector<4x256xf32>
    %180 = vector.extract_strided_slice %34 {offsets = [2, 0], sizes = [1, 256], strides = [1, 1]} : vector<4x256xf32> to vector<1x256xf32>
    %c18 = arith.constant 18 : index
    %c0_55 = arith.constant 0 : index
    %c0_56 = arith.constant 0 : index
    %181 = vector.load %arg2[%c18, %c0_55, %c0_56] : memref<36x4x1xf32, #tpu.memory_space<vmem>>, vector<1x4x1xf32>
    %182 = vector.shape_cast %181 : vector<1x4x1xf32> to vector<4x1xf32>
    %183 = vector.broadcast %182 : vector<4x1xf32> to vector<4x256xf32>
    %184 = vector.broadcast %180 : vector<1x256xf32> to vector<4x256xf32>
    %185 = arith.mulf %183, %184 : vector<4x256xf32>
    %186 = arith.addf %179, %185 : vector<4x256xf32>
    %187 = vector.extract_strided_slice %34 {offsets = [3, 0], sizes = [1, 256], strides = [1, 1]} : vector<4x256xf32> to vector<1x256xf32>
    %c19 = arith.constant 19 : index
    %c0_57 = arith.constant 0 : index
    %c0_58 = arith.constant 0 : index
    %188 = vector.load %arg2[%c19, %c0_57, %c0_58] : memref<36x4x1xf32, #tpu.memory_space<vmem>>, vector<1x4x1xf32>
    %189 = vector.shape_cast %188 : vector<1x4x1xf32> to vector<4x1xf32>
    %190 = vector.broadcast %189 : vector<4x1xf32> to vector<4x256xf32>
    %191 = vector.broadcast %187 : vector<1x256xf32> to vector<4x256xf32>
    %192 = arith.mulf %190, %191 : vector<4x256xf32>
    %193 = arith.addf %186, %192 : vector<4x256xf32>
    %c255_i32 = arith.constant 255 : i32
    %194 = tpu.dynamic_rotate %34 by %c255_i32 dim 1 : vector<4x256xf32>, i32 -> vector<4x256xf32>
    %cst_59 = arith.constant 0.000000e+00 : f32
    %195 = vector.shape_cast %20 : vector<1x256xi1> to vector<1x256xi1>
    %196 = vector.broadcast %195 : vector<1x256xi1> to vector<4x256xi1>
    %197 = vector.broadcast %cst_59 : f32 to vector<4x256xf32>
    %198 = arith.select %196, %194, %197 : vector<4x256xi1>, vector<4x256xf32>
    %199 = vector.extract_strided_slice %198 {offsets = [0, 0], sizes = [1, 256], strides = [1, 1]} : vector<4x256xf32> to vector<1x256xf32>
    %c20 = arith.constant 20 : index
    %c0_60 = arith.constant 0 : index
    %c0_61 = arith.constant 0 : index
    %200 = vector.load %arg2[%c20, %c0_60, %c0_61] : memref<36x4x1xf32, #tpu.memory_space<vmem>>, vector<1x4x1xf32>
    %201 = vector.shape_cast %200 : vector<1x4x1xf32> to vector<4x1xf32>
    %202 = vector.broadcast %201 : vector<4x1xf32> to vector<4x256xf32>
    %203 = vector.broadcast %199 : vector<1x256xf32> to vector<4x256xf32>
    %204 = arith.mulf %202, %203 : vector<4x256xf32>
    %205 = arith.addf %193, %204 : vector<4x256xf32>
    %206 = vector.extract_strided_slice %198 {offsets = [1, 0], sizes = [1, 256], strides = [1, 1]} : vector<4x256xf32> to vector<1x256xf32>
    %c21 = arith.constant 21 : index
    %c0_62 = arith.constant 0 : index
    %c0_63 = arith.constant 0 : index
    %207 = vector.load %arg2[%c21, %c0_62, %c0_63] : memref<36x4x1xf32, #tpu.memory_space<vmem>>, vector<1x4x1xf32>
    %208 = vector.shape_cast %207 : vector<1x4x1xf32> to vector<4x1xf32>
    %209 = vector.broadcast %208 : vector<4x1xf32> to vector<4x256xf32>
    %210 = vector.broadcast %206 : vector<1x256xf32> to vector<4x256xf32>
    %211 = arith.mulf %209, %210 : vector<4x256xf32>
    %212 = arith.addf %205, %211 : vector<4x256xf32>
    %213 = vector.extract_strided_slice %198 {offsets = [2, 0], sizes = [1, 256], strides = [1, 1]} : vector<4x256xf32> to vector<1x256xf32>
    %c22 = arith.constant 22 : index
    %c0_64 = arith.constant 0 : index
    %c0_65 = arith.constant 0 : index
    %214 = vector.load %arg2[%c22, %c0_64, %c0_65] : memref<36x4x1xf32, #tpu.memory_space<vmem>>, vector<1x4x1xf32>
    %215 = vector.shape_cast %214 : vector<1x4x1xf32> to vector<4x1xf32>
    %216 = vector.broadcast %215 : vector<4x1xf32> to vector<4x256xf32>
    %217 = vector.broadcast %213 : vector<1x256xf32> to vector<4x256xf32>
    %218 = arith.mulf %216, %217 : vector<4x256xf32>
    %219 = arith.addf %212, %218 : vector<4x256xf32>
    %220 = vector.extract_strided_slice %198 {offsets = [3, 0], sizes = [1, 256], strides = [1, 1]} : vector<4x256xf32> to vector<1x256xf32>
    %c23 = arith.constant 23 : index
    %c0_66 = arith.constant 0 : index
    %c0_67 = arith.constant 0 : index
    %221 = vector.load %arg2[%c23, %c0_66, %c0_67] : memref<36x4x1xf32, #tpu.memory_space<vmem>>, vector<1x4x1xf32>
    %222 = vector.shape_cast %221 : vector<1x4x1xf32> to vector<4x1xf32>
    %223 = vector.broadcast %222 : vector<4x1xf32> to vector<4x256xf32>
    %224 = vector.broadcast %220 : vector<1x256xf32> to vector<4x256xf32>
    %225 = arith.mulf %223, %224 : vector<4x256xf32>
    %226 = arith.addf %219, %225 : vector<4x256xf32>
    %c241_i32 = arith.constant 241 : i32
    %227 = tpu.dynamic_rotate %34 by %c241_i32 dim 1 : vector<4x256xf32>, i32 -> vector<4x256xf32>
    %cst_68 = arith.constant 0.000000e+00 : f32
    %228 = vector.shape_cast %25 : vector<1x256xi1> to vector<1x256xi1>
    %229 = vector.broadcast %228 : vector<1x256xi1> to vector<4x256xi1>
    %230 = vector.broadcast %cst_68 : f32 to vector<4x256xf32>
    %231 = arith.select %229, %227, %230 : vector<4x256xi1>, vector<4x256xf32>
    %232 = vector.extract_strided_slice %231 {offsets = [0, 0], sizes = [1, 256], strides = [1, 1]} : vector<4x256xf32> to vector<1x256xf32>
    %c24 = arith.constant 24 : index
    %c0_69 = arith.constant 0 : index
    %c0_70 = arith.constant 0 : index
    %233 = vector.load %arg2[%c24, %c0_69, %c0_70] : memref<36x4x1xf32, #tpu.memory_space<vmem>>, vector<1x4x1xf32>
    %234 = vector.shape_cast %233 : vector<1x4x1xf32> to vector<4x1xf32>
    %235 = vector.broadcast %234 : vector<4x1xf32> to vector<4x256xf32>
    %236 = vector.broadcast %232 : vector<1x256xf32> to vector<4x256xf32>
    %237 = arith.mulf %235, %236 : vector<4x256xf32>
    %238 = arith.addf %226, %237 : vector<4x256xf32>
    %239 = vector.extract_strided_slice %231 {offsets = [1, 0], sizes = [1, 256], strides = [1, 1]} : vector<4x256xf32> to vector<1x256xf32>
    %c25 = arith.constant 25 : index
    %c0_71 = arith.constant 0 : index
    %c0_72 = arith.constant 0 : index
    %240 = vector.load %arg2[%c25, %c0_71, %c0_72] : memref<36x4x1xf32, #tpu.memory_space<vmem>>, vector<1x4x1xf32>
    %241 = vector.shape_cast %240 : vector<1x4x1xf32> to vector<4x1xf32>
    %242 = vector.broadcast %241 : vector<4x1xf32> to vector<4x256xf32>
    %243 = vector.broadcast %239 : vector<1x256xf32> to vector<4x256xf32>
    %244 = arith.mulf %242, %243 : vector<4x256xf32>
    %245 = arith.addf %238, %244 : vector<4x256xf32>
    %246 = vector.extract_strided_slice %231 {offsets = [2, 0], sizes = [1, 256], strides = [1, 1]} : vector<4x256xf32> to vector<1x256xf32>
    %c26 = arith.constant 26 : index
    %c0_73 = arith.constant 0 : index
    %c0_74 = arith.constant 0 : index
    %247 = vector.load %arg2[%c26, %c0_73, %c0_74] : memref<36x4x1xf32, #tpu.memory_space<vmem>>, vector<1x4x1xf32>
    %248 = vector.shape_cast %247 : vector<1x4x1xf32> to vector<4x1xf32>
    %249 = vector.broadcast %248 : vector<4x1xf32> to vector<4x256xf32>
    %250 = vector.broadcast %246 : vector<1x256xf32> to vector<4x256xf32>
    %251 = arith.mulf %249, %250 : vector<4x256xf32>
    %252 = arith.addf %245, %251 : vector<4x256xf32>
    %253 = vector.extract_strided_slice %231 {offsets = [3, 0], sizes = [1, 256], strides = [1, 1]} : vector<4x256xf32> to vector<1x256xf32>
    %c27 = arith.constant 27 : index
    %c0_75 = arith.constant 0 : index
    %c0_76 = arith.constant 0 : index
    %254 = vector.load %arg2[%c27, %c0_75, %c0_76] : memref<36x4x1xf32, #tpu.memory_space<vmem>>, vector<1x4x1xf32>
    %255 = vector.shape_cast %254 : vector<1x4x1xf32> to vector<4x1xf32>
    %256 = vector.broadcast %255 : vector<4x1xf32> to vector<4x256xf32>
    %257 = vector.broadcast %253 : vector<1x256xf32> to vector<4x256xf32>
    %258 = arith.mulf %256, %257 : vector<4x256xf32>
    %259 = arith.addf %252, %258 : vector<4x256xf32>
    %c240_i32 = arith.constant 240 : i32
    %260 = tpu.dynamic_rotate %34 by %c240_i32 dim 1 : vector<4x256xf32>, i32 -> vector<4x256xf32>
    %cst_77 = arith.constant 0.000000e+00 : f32
    %261 = vector.shape_cast %27 : vector<1x256xi1> to vector<1x256xi1>
    %262 = vector.broadcast %261 : vector<1x256xi1> to vector<4x256xi1>
    %263 = vector.broadcast %cst_77 : f32 to vector<4x256xf32>
    %264 = arith.select %262, %260, %263 : vector<4x256xi1>, vector<4x256xf32>
    %265 = vector.extract_strided_slice %264 {offsets = [0, 0], sizes = [1, 256], strides = [1, 1]} : vector<4x256xf32> to vector<1x256xf32>
    %c28 = arith.constant 28 : index
    %c0_78 = arith.constant 0 : index
    %c0_79 = arith.constant 0 : index
    %266 = vector.load %arg2[%c28, %c0_78, %c0_79] : memref<36x4x1xf32, #tpu.memory_space<vmem>>, vector<1x4x1xf32>
    %267 = vector.shape_cast %266 : vector<1x4x1xf32> to vector<4x1xf32>
    %268 = vector.broadcast %267 : vector<4x1xf32> to vector<4x256xf32>
    %269 = vector.broadcast %265 : vector<1x256xf32> to vector<4x256xf32>
    %270 = arith.mulf %268, %269 : vector<4x256xf32>
    %271 = arith.addf %259, %270 : vector<4x256xf32>
    %272 = vector.extract_strided_slice %264 {offsets = [1, 0], sizes = [1, 256], strides = [1, 1]} : vector<4x256xf32> to vector<1x256xf32>
    %c29 = arith.constant 29 : index
    %c0_80 = arith.constant 0 : index
    %c0_81 = arith.constant 0 : index
    %273 = vector.load %arg2[%c29, %c0_80, %c0_81] : memref<36x4x1xf32, #tpu.memory_space<vmem>>, vector<1x4x1xf32>
    %274 = vector.shape_cast %273 : vector<1x4x1xf32> to vector<4x1xf32>
    %275 = vector.broadcast %274 : vector<4x1xf32> to vector<4x256xf32>
    %276 = vector.broadcast %272 : vector<1x256xf32> to vector<4x256xf32>
    %277 = arith.mulf %275, %276 : vector<4x256xf32>
    %278 = arith.addf %271, %277 : vector<4x256xf32>
    %279 = vector.extract_strided_slice %264 {offsets = [2, 0], sizes = [1, 256], strides = [1, 1]} : vector<4x256xf32> to vector<1x256xf32>
    %c30 = arith.constant 30 : index
    %c0_82 = arith.constant 0 : index
    %c0_83 = arith.constant 0 : index
    %280 = vector.load %arg2[%c30, %c0_82, %c0_83] : memref<36x4x1xf32, #tpu.memory_space<vmem>>, vector<1x4x1xf32>
    %281 = vector.shape_cast %280 : vector<1x4x1xf32> to vector<4x1xf32>
    %282 = vector.broadcast %281 : vector<4x1xf32> to vector<4x256xf32>
    %283 = vector.broadcast %279 : vector<1x256xf32> to vector<4x256xf32>
    %284 = arith.mulf %282, %283 : vector<4x256xf32>
    %285 = arith.addf %278, %284 : vector<4x256xf32>
    %286 = vector.extract_strided_slice %264 {offsets = [3, 0], sizes = [1, 256], strides = [1, 1]} : vector<4x256xf32> to vector<1x256xf32>
    %c31 = arith.constant 31 : index
    %c0_84 = arith.constant 0 : index
    %c0_85 = arith.constant 0 : index
    %287 = vector.load %arg2[%c31, %c0_84, %c0_85] : memref<36x4x1xf32, #tpu.memory_space<vmem>>, vector<1x4x1xf32>
    %288 = vector.shape_cast %287 : vector<1x4x1xf32> to vector<4x1xf32>
    %289 = vector.broadcast %288 : vector<4x1xf32> to vector<4x256xf32>
    %290 = vector.broadcast %286 : vector<1x256xf32> to vector<4x256xf32>
    %291 = arith.mulf %289, %290 : vector<4x256xf32>
    %292 = arith.addf %285, %291 : vector<4x256xf32>
    %c239_i32 = arith.constant 239 : i32
    %293 = tpu.dynamic_rotate %34 by %c239_i32 dim 1 : vector<4x256xf32>, i32 -> vector<4x256xf32>
    %cst_86 = arith.constant 0.000000e+00 : f32
    %294 = vector.shape_cast %32 : vector<1x256xi1> to vector<1x256xi1>
    %295 = vector.broadcast %294 : vector<1x256xi1> to vector<4x256xi1>
    %296 = vector.broadcast %cst_86 : f32 to vector<4x256xf32>
    %297 = arith.select %295, %293, %296 : vector<4x256xi1>, vector<4x256xf32>
    %298 = vector.extract_strided_slice %297 {offsets = [0, 0], sizes = [1, 256], strides = [1, 1]} : vector<4x256xf32> to vector<1x256xf32>
    %c32 = arith.constant 32 : index
    %c0_87 = arith.constant 0 : index
    %c0_88 = arith.constant 0 : index
    %299 = vector.load %arg2[%c32, %c0_87, %c0_88] : memref<36x4x1xf32, #tpu.memory_space<vmem>>, vector<1x4x1xf32>
    %300 = vector.shape_cast %299 : vector<1x4x1xf32> to vector<4x1xf32>
    %301 = vector.broadcast %300 : vector<4x1xf32> to vector<4x256xf32>
    %302 = vector.broadcast %298 : vector<1x256xf32> to vector<4x256xf32>
    %303 = arith.mulf %301, %302 : vector<4x256xf32>
    %304 = arith.addf %292, %303 : vector<4x256xf32>
    %305 = vector.extract_strided_slice %297 {offsets = [1, 0], sizes = [1, 256], strides = [1, 1]} : vector<4x256xf32> to vector<1x256xf32>
    %c33 = arith.constant 33 : index
    %c0_89 = arith.constant 0 : index
    %c0_90 = arith.constant 0 : index
    %306 = vector.load %arg2[%c33, %c0_89, %c0_90] : memref<36x4x1xf32, #tpu.memory_space<vmem>>, vector<1x4x1xf32>
    %307 = vector.shape_cast %306 : vector<1x4x1xf32> to vector<4x1xf32>
    %308 = vector.broadcast %307 : vector<4x1xf32> to vector<4x256xf32>
    %309 = vector.broadcast %305 : vector<1x256xf32> to vector<4x256xf32>
    %310 = arith.mulf %308, %309 : vector<4x256xf32>
    %311 = arith.addf %304, %310 : vector<4x256xf32>
    %312 = vector.extract_strided_slice %297 {offsets = [2, 0], sizes = [1, 256], strides = [1, 1]} : vector<4x256xf32> to vector<1x256xf32>
    %c34 = arith.constant 34 : index
    %c0_91 = arith.constant 0 : index
    %c0_92 = arith.constant 0 : index
    %313 = vector.load %arg2[%c34, %c0_91, %c0_92] : memref<36x4x1xf32, #tpu.memory_space<vmem>>, vector<1x4x1xf32>
    %314 = vector.shape_cast %313 : vector<1x4x1xf32> to vector<4x1xf32>
    %315 = vector.broadcast %314 : vector<4x1xf32> to vector<4x256xf32>
    %316 = vector.broadcast %312 : vector<1x256xf32> to vector<4x256xf32>
    %317 = arith.mulf %315, %316 : vector<4x256xf32>
    %318 = arith.addf %311, %317 : vector<4x256xf32>
    %319 = vector.extract_strided_slice %297 {offsets = [3, 0], sizes = [1, 256], strides = [1, 1]} : vector<4x256xf32> to vector<1x256xf32>
    %c35 = arith.constant 35 : index
    %c0_93 = arith.constant 0 : index
    %c0_94 = arith.constant 0 : index
    %320 = vector.load %arg2[%c35, %c0_93, %c0_94] : memref<36x4x1xf32, #tpu.memory_space<vmem>>, vector<1x4x1xf32>
    %321 = vector.shape_cast %320 : vector<1x4x1xf32> to vector<4x1xf32>
    %322 = vector.broadcast %321 : vector<4x1xf32> to vector<4x256xf32>
    %323 = vector.broadcast %319 : vector<1x256xf32> to vector<4x256xf32>
    %324 = arith.mulf %322, %323 : vector<4x256xf32>
    %325 = arith.addf %318, %324 : vector<4x256xf32>
    %c0_95 = arith.constant 0 : index
    %c0_96 = arith.constant 0 : index
    %326 = vector.load %arg3[%c0_95, %c0_96] : memref<4x1xf32, #tpu.memory_space<vmem>>, vector<4x1xf32>
    %327 = vector.broadcast %326 : vector<4x1xf32> to vector<4x256xf32>
    %328 = arith.addf %325, %327 : vector<4x256xf32>
    %cst_97 = arith.constant 0.00999999977 : f32
    %329 = vector.broadcast %cst_97 : f32 to vector<4x256xf32>
    %330 = arith.mulf %329, %328 : vector<4x256xf32>
    %331 = arith.maximumf %328, %330 : vector<4x256xf32>
    %c17_i32_98 = arith.constant 17 : i32
    %332 = tpu.dynamic_rotate %331 by %c17_i32_98 dim 1 : vector<4x256xf32>, i32 -> vector<4x256xf32>
    %cst_99 = arith.constant 0.000000e+00 : f32
    %333 = vector.shape_cast %9 : vector<1x256xi1> to vector<1x256xi1>
    %334 = vector.broadcast %333 : vector<1x256xi1> to vector<4x256xi1>
    %335 = vector.broadcast %cst_99 : f32 to vector<4x256xf32>
    %336 = arith.select %334, %332, %335 : vector<4x256xi1>, vector<4x256xf32>
    %337 = vector.extract_strided_slice %336 {offsets = [0, 0], sizes = [1, 256], strides = [1, 1]} : vector<4x256xf32> to vector<1x256xf32>
    %c0_100 = arith.constant 0 : index
    %c0_101 = arith.constant 0 : index
    %c0_102 = arith.constant 0 : index
    %338 = vector.load %arg4[%c0_100, %c0_101, %c0_102] : memref<36x4x1xf32, #tpu.memory_space<vmem>>, vector<1x4x1xf32>
    %339 = vector.shape_cast %338 : vector<1x4x1xf32> to vector<4x1xf32>
    %340 = vector.broadcast %339 : vector<4x1xf32> to vector<4x256xf32>
    %341 = vector.broadcast %337 : vector<1x256xf32> to vector<4x256xf32>
    %342 = arith.mulf %340, %341 : vector<4x256xf32>
    %343 = vector.extract_strided_slice %336 {offsets = [1, 0], sizes = [1, 256], strides = [1, 1]} : vector<4x256xf32> to vector<1x256xf32>
    %c1_103 = arith.constant 1 : index
    %c0_104 = arith.constant 0 : index
    %c0_105 = arith.constant 0 : index
    %344 = vector.load %arg4[%c1_103, %c0_104, %c0_105] : memref<36x4x1xf32, #tpu.memory_space<vmem>>, vector<1x4x1xf32>
    %345 = vector.shape_cast %344 : vector<1x4x1xf32> to vector<4x1xf32>
    %346 = vector.broadcast %345 : vector<4x1xf32> to vector<4x256xf32>
    %347 = vector.broadcast %343 : vector<1x256xf32> to vector<4x256xf32>
    %348 = arith.mulf %346, %347 : vector<4x256xf32>
    %349 = arith.addf %342, %348 : vector<4x256xf32>
    %350 = vector.extract_strided_slice %336 {offsets = [2, 0], sizes = [1, 256], strides = [1, 1]} : vector<4x256xf32> to vector<1x256xf32>
    %c2_106 = arith.constant 2 : index
    %c0_107 = arith.constant 0 : index
    %c0_108 = arith.constant 0 : index
    %351 = vector.load %arg4[%c2_106, %c0_107, %c0_108] : memref<36x4x1xf32, #tpu.memory_space<vmem>>, vector<1x4x1xf32>
    %352 = vector.shape_cast %351 : vector<1x4x1xf32> to vector<4x1xf32>
    %353 = vector.broadcast %352 : vector<4x1xf32> to vector<4x256xf32>
    %354 = vector.broadcast %350 : vector<1x256xf32> to vector<4x256xf32>
    %355 = arith.mulf %353, %354 : vector<4x256xf32>
    %356 = arith.addf %349, %355 : vector<4x256xf32>
    %357 = vector.extract_strided_slice %336 {offsets = [3, 0], sizes = [1, 256], strides = [1, 1]} : vector<4x256xf32> to vector<1x256xf32>
    %c3_109 = arith.constant 3 : index
    %c0_110 = arith.constant 0 : index
    %c0_111 = arith.constant 0 : index
    %358 = vector.load %arg4[%c3_109, %c0_110, %c0_111] : memref<36x4x1xf32, #tpu.memory_space<vmem>>, vector<1x4x1xf32>
    %359 = vector.shape_cast %358 : vector<1x4x1xf32> to vector<4x1xf32>
    %360 = vector.broadcast %359 : vector<4x1xf32> to vector<4x256xf32>
    %361 = vector.broadcast %357 : vector<1x256xf32> to vector<4x256xf32>
    %362 = arith.mulf %360, %361 : vector<4x256xf32>
    %363 = arith.addf %356, %362 : vector<4x256xf32>
    %c16_i32_112 = arith.constant 16 : i32
    %364 = tpu.dynamic_rotate %331 by %c16_i32_112 dim 1 : vector<4x256xf32>, i32 -> vector<4x256xf32>
    %cst_113 = arith.constant 0.000000e+00 : f32
    %365 = vector.shape_cast %11 : vector<1x256xi1> to vector<1x256xi1>
    %366 = vector.broadcast %365 : vector<1x256xi1> to vector<4x256xi1>
    %367 = vector.broadcast %cst_113 : f32 to vector<4x256xf32>
    %368 = arith.select %366, %364, %367 : vector<4x256xi1>, vector<4x256xf32>
    %369 = vector.extract_strided_slice %368 {offsets = [0, 0], sizes = [1, 256], strides = [1, 1]} : vector<4x256xf32> to vector<1x256xf32>
    %c4_114 = arith.constant 4 : index
    %c0_115 = arith.constant 0 : index
    %c0_116 = arith.constant 0 : index
    %370 = vector.load %arg4[%c4_114, %c0_115, %c0_116] : memref<36x4x1xf32, #tpu.memory_space<vmem>>, vector<1x4x1xf32>
    %371 = vector.shape_cast %370 : vector<1x4x1xf32> to vector<4x1xf32>
    %372 = vector.broadcast %371 : vector<4x1xf32> to vector<4x256xf32>
    %373 = vector.broadcast %369 : vector<1x256xf32> to vector<4x256xf32>
    %374 = arith.mulf %372, %373 : vector<4x256xf32>
    %375 = arith.addf %363, %374 : vector<4x256xf32>
    %376 = vector.extract_strided_slice %368 {offsets = [1, 0], sizes = [1, 256], strides = [1, 1]} : vector<4x256xf32> to vector<1x256xf32>
    %c5_117 = arith.constant 5 : index
    %c0_118 = arith.constant 0 : index
    %c0_119 = arith.constant 0 : index
    %377 = vector.load %arg4[%c5_117, %c0_118, %c0_119] : memref<36x4x1xf32, #tpu.memory_space<vmem>>, vector<1x4x1xf32>
    %378 = vector.shape_cast %377 : vector<1x4x1xf32> to vector<4x1xf32>
    %379 = vector.broadcast %378 : vector<4x1xf32> to vector<4x256xf32>
    %380 = vector.broadcast %376 : vector<1x256xf32> to vector<4x256xf32>
    %381 = arith.mulf %379, %380 : vector<4x256xf32>
    %382 = arith.addf %375, %381 : vector<4x256xf32>
    %383 = vector.extract_strided_slice %368 {offsets = [2, 0], sizes = [1, 256], strides = [1, 1]} : vector<4x256xf32> to vector<1x256xf32>
    %c6_120 = arith.constant 6 : index
    %c0_121 = arith.constant 0 : index
    %c0_122 = arith.constant 0 : index
    %384 = vector.load %arg4[%c6_120, %c0_121, %c0_122] : memref<36x4x1xf32, #tpu.memory_space<vmem>>, vector<1x4x1xf32>
    %385 = vector.shape_cast %384 : vector<1x4x1xf32> to vector<4x1xf32>
    %386 = vector.broadcast %385 : vector<4x1xf32> to vector<4x256xf32>
    %387 = vector.broadcast %383 : vector<1x256xf32> to vector<4x256xf32>
    %388 = arith.mulf %386, %387 : vector<4x256xf32>
    %389 = arith.addf %382, %388 : vector<4x256xf32>
    %390 = vector.extract_strided_slice %368 {offsets = [3, 0], sizes = [1, 256], strides = [1, 1]} : vector<4x256xf32> to vector<1x256xf32>
    %c7_123 = arith.constant 7 : index
    %c0_124 = arith.constant 0 : index
    %c0_125 = arith.constant 0 : index
    %391 = vector.load %arg4[%c7_123, %c0_124, %c0_125] : memref<36x4x1xf32, #tpu.memory_space<vmem>>, vector<1x4x1xf32>
    %392 = vector.shape_cast %391 : vector<1x4x1xf32> to vector<4x1xf32>
    %393 = vector.broadcast %392 : vector<4x1xf32> to vector<4x256xf32>
    %394 = vector.broadcast %390 : vector<1x256xf32> to vector<4x256xf32>
    %395 = arith.mulf %393, %394 : vector<4x256xf32>
    %396 = arith.addf %389, %395 : vector<4x256xf32>
    %c15_i32_126 = arith.constant 15 : i32
    %397 = tpu.dynamic_rotate %331 by %c15_i32_126 dim 1 : vector<4x256xf32>, i32 -> vector<4x256xf32>
    %cst_127 = arith.constant 0.000000e+00 : f32
    %398 = vector.shape_cast %16 : vector<1x256xi1> to vector<1x256xi1>
    %399 = vector.broadcast %398 : vector<1x256xi1> to vector<4x256xi1>
    %400 = vector.broadcast %cst_127 : f32 to vector<4x256xf32>
    %401 = arith.select %399, %397, %400 : vector<4x256xi1>, vector<4x256xf32>
    %402 = vector.extract_strided_slice %401 {offsets = [0, 0], sizes = [1, 256], strides = [1, 1]} : vector<4x256xf32> to vector<1x256xf32>
    %c8_128 = arith.constant 8 : index
    %c0_129 = arith.constant 0 : index
    %c0_130 = arith.constant 0 : index
    %403 = vector.load %arg4[%c8_128, %c0_129, %c0_130] : memref<36x4x1xf32, #tpu.memory_space<vmem>>, vector<1x4x1xf32>
    %404 = vector.shape_cast %403 : vector<1x4x1xf32> to vector<4x1xf32>
    %405 = vector.broadcast %404 : vector<4x1xf32> to vector<4x256xf32>
    %406 = vector.broadcast %402 : vector<1x256xf32> to vector<4x256xf32>
    %407 = arith.mulf %405, %406 : vector<4x256xf32>
    %408 = arith.addf %396, %407 : vector<4x256xf32>
    %409 = vector.extract_strided_slice %401 {offsets = [1, 0], sizes = [1, 256], strides = [1, 1]} : vector<4x256xf32> to vector<1x256xf32>
    %c9_131 = arith.constant 9 : index
    %c0_132 = arith.constant 0 : index
    %c0_133 = arith.constant 0 : index
    %410 = vector.load %arg4[%c9_131, %c0_132, %c0_133] : memref<36x4x1xf32, #tpu.memory_space<vmem>>, vector<1x4x1xf32>
    %411 = vector.shape_cast %410 : vector<1x4x1xf32> to vector<4x1xf32>
    %412 = vector.broadcast %411 : vector<4x1xf32> to vector<4x256xf32>
    %413 = vector.broadcast %409 : vector<1x256xf32> to vector<4x256xf32>
    %414 = arith.mulf %412, %413 : vector<4x256xf32>
    %415 = arith.addf %408, %414 : vector<4x256xf32>
    %416 = vector.extract_strided_slice %401 {offsets = [2, 0], sizes = [1, 256], strides = [1, 1]} : vector<4x256xf32> to vector<1x256xf32>
    %c10_134 = arith.constant 10 : index
    %c0_135 = arith.constant 0 : index
    %c0_136 = arith.constant 0 : index
    %417 = vector.load %arg4[%c10_134, %c0_135, %c0_136] : memref<36x4x1xf32, #tpu.memory_space<vmem>>, vector<1x4x1xf32>
    %418 = vector.shape_cast %417 : vector<1x4x1xf32> to vector<4x1xf32>
    %419 = vector.broadcast %418 : vector<4x1xf32> to vector<4x256xf32>
    %420 = vector.broadcast %416 : vector<1x256xf32> to vector<4x256xf32>
    %421 = arith.mulf %419, %420 : vector<4x256xf32>
    %422 = arith.addf %415, %421 : vector<4x256xf32>
    %423 = vector.extract_strided_slice %401 {offsets = [3, 0], sizes = [1, 256], strides = [1, 1]} : vector<4x256xf32> to vector<1x256xf32>
    %c11_137 = arith.constant 11 : index
    %c0_138 = arith.constant 0 : index
    %c0_139 = arith.constant 0 : index
    %424 = vector.load %arg4[%c11_137, %c0_138, %c0_139] : memref<36x4x1xf32, #tpu.memory_space<vmem>>, vector<1x4x1xf32>
    %425 = vector.shape_cast %424 : vector<1x4x1xf32> to vector<4x1xf32>
    %426 = vector.broadcast %425 : vector<4x1xf32> to vector<4x256xf32>
    %427 = vector.broadcast %423 : vector<1x256xf32> to vector<4x256xf32>
    %428 = arith.mulf %426, %427 : vector<4x256xf32>
    %429 = arith.addf %422, %428 : vector<4x256xf32>
    %c1_i32_140 = arith.constant 1 : i32
    %430 = tpu.dynamic_rotate %331 by %c1_i32_140 dim 1 : vector<4x256xf32>, i32 -> vector<4x256xf32>
    %cst_141 = arith.constant 0.000000e+00 : f32
    %431 = vector.shape_cast %18 : vector<1x256xi1> to vector<1x256xi1>
    %432 = vector.broadcast %431 : vector<1x256xi1> to vector<4x256xi1>
    %433 = vector.broadcast %cst_141 : f32 to vector<4x256xf32>
    %434 = arith.select %432, %430, %433 : vector<4x256xi1>, vector<4x256xf32>
    %435 = vector.extract_strided_slice %434 {offsets = [0, 0], sizes = [1, 256], strides = [1, 1]} : vector<4x256xf32> to vector<1x256xf32>
    %c12_142 = arith.constant 12 : index
    %c0_143 = arith.constant 0 : index
    %c0_144 = arith.constant 0 : index
    %436 = vector.load %arg4[%c12_142, %c0_143, %c0_144] : memref<36x4x1xf32, #tpu.memory_space<vmem>>, vector<1x4x1xf32>
    %437 = vector.shape_cast %436 : vector<1x4x1xf32> to vector<4x1xf32>
    %438 = vector.broadcast %437 : vector<4x1xf32> to vector<4x256xf32>
    %439 = vector.broadcast %435 : vector<1x256xf32> to vector<4x256xf32>
    %440 = arith.mulf %438, %439 : vector<4x256xf32>
    %441 = arith.addf %429, %440 : vector<4x256xf32>
    %442 = vector.extract_strided_slice %434 {offsets = [1, 0], sizes = [1, 256], strides = [1, 1]} : vector<4x256xf32> to vector<1x256xf32>
    %c13_145 = arith.constant 13 : index
    %c0_146 = arith.constant 0 : index
    %c0_147 = arith.constant 0 : index
    %443 = vector.load %arg4[%c13_145, %c0_146, %c0_147] : memref<36x4x1xf32, #tpu.memory_space<vmem>>, vector<1x4x1xf32>
    %444 = vector.shape_cast %443 : vector<1x4x1xf32> to vector<4x1xf32>
    %445 = vector.broadcast %444 : vector<4x1xf32> to vector<4x256xf32>
    %446 = vector.broadcast %442 : vector<1x256xf32> to vector<4x256xf32>
    %447 = arith.mulf %445, %446 : vector<4x256xf32>
    %448 = arith.addf %441, %447 : vector<4x256xf32>
    %449 = vector.extract_strided_slice %434 {offsets = [2, 0], sizes = [1, 256], strides = [1, 1]} : vector<4x256xf32> to vector<1x256xf32>
    %c14_148 = arith.constant 14 : index
    %c0_149 = arith.constant 0 : index
    %c0_150 = arith.constant 0 : index
    %450 = vector.load %arg4[%c14_148, %c0_149, %c0_150] : memref<36x4x1xf32, #tpu.memory_space<vmem>>, vector<1x4x1xf32>
    %451 = vector.shape_cast %450 : vector<1x4x1xf32> to vector<4x1xf32>
    %452 = vector.broadcast %451 : vector<4x1xf32> to vector<4x256xf32>
    %453 = vector.broadcast %449 : vector<1x256xf32> to vector<4x256xf32>
    %454 = arith.mulf %452, %453 : vector<4x256xf32>
    %455 = arith.addf %448, %454 : vector<4x256xf32>
    %456 = vector.extract_strided_slice %434 {offsets = [3, 0], sizes = [1, 256], strides = [1, 1]} : vector<4x256xf32> to vector<1x256xf32>
    %c15_151 = arith.constant 15 : index
    %c0_152 = arith.constant 0 : index
    %c0_153 = arith.constant 0 : index
    %457 = vector.load %arg4[%c15_151, %c0_152, %c0_153] : memref<36x4x1xf32, #tpu.memory_space<vmem>>, vector<1x4x1xf32>
    %458 = vector.shape_cast %457 : vector<1x4x1xf32> to vector<4x1xf32>
    %459 = vector.broadcast %458 : vector<4x1xf32> to vector<4x256xf32>
    %460 = vector.broadcast %456 : vector<1x256xf32> to vector<4x256xf32>
    %461 = arith.mulf %459, %460 : vector<4x256xf32>
    %462 = arith.addf %455, %461 : vector<4x256xf32>
    %463 = vector.extract_strided_slice %331 {offsets = [0, 0], sizes = [1, 256], strides = [1, 1]} : vector<4x256xf32> to vector<1x256xf32>
    %c16_154 = arith.constant 16 : index
    %c0_155 = arith.constant 0 : index
    %c0_156 = arith.constant 0 : index
    %464 = vector.load %arg4[%c16_154, %c0_155, %c0_156] : memref<36x4x1xf32, #tpu.memory_space<vmem>>, vector<1x4x1xf32>
    %465 = vector.shape_cast %464 : vector<1x4x1xf32> to vector<4x1xf32>
    %466 = vector.broadcast %465 : vector<4x1xf32> to vector<4x256xf32>
    %467 = vector.broadcast %463 : vector<1x256xf32> to vector<4x256xf32>
    %468 = arith.mulf %466, %467 : vector<4x256xf32>
    %469 = arith.addf %462, %468 : vector<4x256xf32>
    %470 = vector.extract_strided_slice %331 {offsets = [1, 0], sizes = [1, 256], strides = [1, 1]} : vector<4x256xf32> to vector<1x256xf32>
    %c17_157 = arith.constant 17 : index
    %c0_158 = arith.constant 0 : index
    %c0_159 = arith.constant 0 : index
    %471 = vector.load %arg4[%c17_157, %c0_158, %c0_159] : memref<36x4x1xf32, #tpu.memory_space<vmem>>, vector<1x4x1xf32>
    %472 = vector.shape_cast %471 : vector<1x4x1xf32> to vector<4x1xf32>
    %473 = vector.broadcast %472 : vector<4x1xf32> to vector<4x256xf32>
    %474 = vector.broadcast %470 : vector<1x256xf32> to vector<4x256xf32>
    %475 = arith.mulf %473, %474 : vector<4x256xf32>
    %476 = arith.addf %469, %475 : vector<4x256xf32>
    %477 = vector.extract_strided_slice %331 {offsets = [2, 0], sizes = [1, 256], strides = [1, 1]} : vector<4x256xf32> to vector<1x256xf32>
    %c18_160 = arith.constant 18 : index
    %c0_161 = arith.constant 0 : index
    %c0_162 = arith.constant 0 : index
    %478 = vector.load %arg4[%c18_160, %c0_161, %c0_162] : memref<36x4x1xf32, #tpu.memory_space<vmem>>, vector<1x4x1xf32>
    %479 = vector.shape_cast %478 : vector<1x4x1xf32> to vector<4x1xf32>
    %480 = vector.broadcast %479 : vector<4x1xf32> to vector<4x256xf32>
    %481 = vector.broadcast %477 : vector<1x256xf32> to vector<4x256xf32>
    %482 = arith.mulf %480, %481 : vector<4x256xf32>
    %483 = arith.addf %476, %482 : vector<4x256xf32>
    %484 = vector.extract_strided_slice %331 {offsets = [3, 0], sizes = [1, 256], strides = [1, 1]} : vector<4x256xf32> to vector<1x256xf32>
    %c19_163 = arith.constant 19 : index
    %c0_164 = arith.constant 0 : index
    %c0_165 = arith.constant 0 : index
    %485 = vector.load %arg4[%c19_163, %c0_164, %c0_165] : memref<36x4x1xf32, #tpu.memory_space<vmem>>, vector<1x4x1xf32>
    %486 = vector.shape_cast %485 : vector<1x4x1xf32> to vector<4x1xf32>
    %487 = vector.broadcast %486 : vector<4x1xf32> to vector<4x256xf32>
    %488 = vector.broadcast %484 : vector<1x256xf32> to vector<4x256xf32>
    %489 = arith.mulf %487, %488 : vector<4x256xf32>
    %490 = arith.addf %483, %489 : vector<4x256xf32>
    %c255_i32_166 = arith.constant 255 : i32
    %491 = tpu.dynamic_rotate %331 by %c255_i32_166 dim 1 : vector<4x256xf32>, i32 -> vector<4x256xf32>
    %cst_167 = arith.constant 0.000000e+00 : f32
    %492 = vector.shape_cast %20 : vector<1x256xi1> to vector<1x256xi1>
    %493 = vector.broadcast %492 : vector<1x256xi1> to vector<4x256xi1>
    %494 = vector.broadcast %cst_167 : f32 to vector<4x256xf32>
    %495 = arith.select %493, %491, %494 : vector<4x256xi1>, vector<4x256xf32>
    %496 = vector.extract_strided_slice %495 {offsets = [0, 0], sizes = [1, 256], strides = [1, 1]} : vector<4x256xf32> to vector<1x256xf32>
    %c20_168 = arith.constant 20 : index
    %c0_169 = arith.constant 0 : index
    %c0_170 = arith.constant 0 : index
    %497 = vector.load %arg4[%c20_168, %c0_169, %c0_170] : memref<36x4x1xf32, #tpu.memory_space<vmem>>, vector<1x4x1xf32>
    %498 = vector.shape_cast %497 : vector<1x4x1xf32> to vector<4x1xf32>
    %499 = vector.broadcast %498 : vector<4x1xf32> to vector<4x256xf32>
    %500 = vector.broadcast %496 : vector<1x256xf32> to vector<4x256xf32>
    %501 = arith.mulf %499, %500 : vector<4x256xf32>
    %502 = arith.addf %490, %501 : vector<4x256xf32>
    %503 = vector.extract_strided_slice %495 {offsets = [1, 0], sizes = [1, 256], strides = [1, 1]} : vector<4x256xf32> to vector<1x256xf32>
    %c21_171 = arith.constant 21 : index
    %c0_172 = arith.constant 0 : index
    %c0_173 = arith.constant 0 : index
    %504 = vector.load %arg4[%c21_171, %c0_172, %c0_173] : memref<36x4x1xf32, #tpu.memory_space<vmem>>, vector<1x4x1xf32>
    %505 = vector.shape_cast %504 : vector<1x4x1xf32> to vector<4x1xf32>
    %506 = vector.broadcast %505 : vector<4x1xf32> to vector<4x256xf32>
    %507 = vector.broadcast %503 : vector<1x256xf32> to vector<4x256xf32>
    %508 = arith.mulf %506, %507 : vector<4x256xf32>
    %509 = arith.addf %502, %508 : vector<4x256xf32>
    %510 = vector.extract_strided_slice %495 {offsets = [2, 0], sizes = [1, 256], strides = [1, 1]} : vector<4x256xf32> to vector<1x256xf32>
    %c22_174 = arith.constant 22 : index
    %c0_175 = arith.constant 0 : index
    %c0_176 = arith.constant 0 : index
    %511 = vector.load %arg4[%c22_174, %c0_175, %c0_176] : memref<36x4x1xf32, #tpu.memory_space<vmem>>, vector<1x4x1xf32>
    %512 = vector.shape_cast %511 : vector<1x4x1xf32> to vector<4x1xf32>
    %513 = vector.broadcast %512 : vector<4x1xf32> to vector<4x256xf32>
    %514 = vector.broadcast %510 : vector<1x256xf32> to vector<4x256xf32>
    %515 = arith.mulf %513, %514 : vector<4x256xf32>
    %516 = arith.addf %509, %515 : vector<4x256xf32>
    %517 = vector.extract_strided_slice %495 {offsets = [3, 0], sizes = [1, 256], strides = [1, 1]} : vector<4x256xf32> to vector<1x256xf32>
    %c23_177 = arith.constant 23 : index
    %c0_178 = arith.constant 0 : index
    %c0_179 = arith.constant 0 : index
    %518 = vector.load %arg4[%c23_177, %c0_178, %c0_179] : memref<36x4x1xf32, #tpu.memory_space<vmem>>, vector<1x4x1xf32>
    %519 = vector.shape_cast %518 : vector<1x4x1xf32> to vector<4x1xf32>
    %520 = vector.broadcast %519 : vector<4x1xf32> to vector<4x256xf32>
    %521 = vector.broadcast %517 : vector<1x256xf32> to vector<4x256xf32>
    %522 = arith.mulf %520, %521 : vector<4x256xf32>
    %523 = arith.addf %516, %522 : vector<4x256xf32>
    %c241_i32_180 = arith.constant 241 : i32
    %524 = tpu.dynamic_rotate %331 by %c241_i32_180 dim 1 : vector<4x256xf32>, i32 -> vector<4x256xf32>
    %cst_181 = arith.constant 0.000000e+00 : f32
    %525 = vector.shape_cast %25 : vector<1x256xi1> to vector<1x256xi1>
    %526 = vector.broadcast %525 : vector<1x256xi1> to vector<4x256xi1>
    %527 = vector.broadcast %cst_181 : f32 to vector<4x256xf32>
    %528 = arith.select %526, %524, %527 : vector<4x256xi1>, vector<4x256xf32>
    %529 = vector.extract_strided_slice %528 {offsets = [0, 0], sizes = [1, 256], strides = [1, 1]} : vector<4x256xf32> to vector<1x256xf32>
    %c24_182 = arith.constant 24 : index
    %c0_183 = arith.constant 0 : index
    %c0_184 = arith.constant 0 : index
    %530 = vector.load %arg4[%c24_182, %c0_183, %c0_184] : memref<36x4x1xf32, #tpu.memory_space<vmem>>, vector<1x4x1xf32>
    %531 = vector.shape_cast %530 : vector<1x4x1xf32> to vector<4x1xf32>
    %532 = vector.broadcast %531 : vector<4x1xf32> to vector<4x256xf32>
    %533 = vector.broadcast %529 : vector<1x256xf32> to vector<4x256xf32>
    %534 = arith.mulf %532, %533 : vector<4x256xf32>
    %535 = arith.addf %523, %534 : vector<4x256xf32>
    %536 = vector.extract_strided_slice %528 {offsets = [1, 0], sizes = [1, 256], strides = [1, 1]} : vector<4x256xf32> to vector<1x256xf32>
    %c25_185 = arith.constant 25 : index
    %c0_186 = arith.constant 0 : index
    %c0_187 = arith.constant 0 : index
    %537 = vector.load %arg4[%c25_185, %c0_186, %c0_187] : memref<36x4x1xf32, #tpu.memory_space<vmem>>, vector<1x4x1xf32>
    %538 = vector.shape_cast %537 : vector<1x4x1xf32> to vector<4x1xf32>
    %539 = vector.broadcast %538 : vector<4x1xf32> to vector<4x256xf32>
    %540 = vector.broadcast %536 : vector<1x256xf32> to vector<4x256xf32>
    %541 = arith.mulf %539, %540 : vector<4x256xf32>
    %542 = arith.addf %535, %541 : vector<4x256xf32>
    %543 = vector.extract_strided_slice %528 {offsets = [2, 0], sizes = [1, 256], strides = [1, 1]} : vector<4x256xf32> to vector<1x256xf32>
    %c26_188 = arith.constant 26 : index
    %c0_189 = arith.constant 0 : index
    %c0_190 = arith.constant 0 : index
    %544 = vector.load %arg4[%c26_188, %c0_189, %c0_190] : memref<36x4x1xf32, #tpu.memory_space<vmem>>, vector<1x4x1xf32>
    %545 = vector.shape_cast %544 : vector<1x4x1xf32> to vector<4x1xf32>
    %546 = vector.broadcast %545 : vector<4x1xf32> to vector<4x256xf32>
    %547 = vector.broadcast %543 : vector<1x256xf32> to vector<4x256xf32>
    %548 = arith.mulf %546, %547 : vector<4x256xf32>
    %549 = arith.addf %542, %548 : vector<4x256xf32>
    %550 = vector.extract_strided_slice %528 {offsets = [3, 0], sizes = [1, 256], strides = [1, 1]} : vector<4x256xf32> to vector<1x256xf32>
    %c27_191 = arith.constant 27 : index
    %c0_192 = arith.constant 0 : index
    %c0_193 = arith.constant 0 : index
    %551 = vector.load %arg4[%c27_191, %c0_192, %c0_193] : memref<36x4x1xf32, #tpu.memory_space<vmem>>, vector<1x4x1xf32>
    %552 = vector.shape_cast %551 : vector<1x4x1xf32> to vector<4x1xf32>
    %553 = vector.broadcast %552 : vector<4x1xf32> to vector<4x256xf32>
    %554 = vector.broadcast %550 : vector<1x256xf32> to vector<4x256xf32>
    %555 = arith.mulf %553, %554 : vector<4x256xf32>
    %556 = arith.addf %549, %555 : vector<4x256xf32>
    %c240_i32_194 = arith.constant 240 : i32
    %557 = tpu.dynamic_rotate %331 by %c240_i32_194 dim 1 : vector<4x256xf32>, i32 -> vector<4x256xf32>
    %cst_195 = arith.constant 0.000000e+00 : f32
    %558 = vector.shape_cast %27 : vector<1x256xi1> to vector<1x256xi1>
    %559 = vector.broadcast %558 : vector<1x256xi1> to vector<4x256xi1>
    %560 = vector.broadcast %cst_195 : f32 to vector<4x256xf32>
    %561 = arith.select %559, %557, %560 : vector<4x256xi1>, vector<4x256xf32>
    %562 = vector.extract_strided_slice %561 {offsets = [0, 0], sizes = [1, 256], strides = [1, 1]} : vector<4x256xf32> to vector<1x256xf32>
    %c28_196 = arith.constant 28 : index
    %c0_197 = arith.constant 0 : index
    %c0_198 = arith.constant 0 : index
    %563 = vector.load %arg4[%c28_196, %c0_197, %c0_198] : memref<36x4x1xf32, #tpu.memory_space<vmem>>, vector<1x4x1xf32>
    %564 = vector.shape_cast %563 : vector<1x4x1xf32> to vector<4x1xf32>
    %565 = vector.broadcast %564 : vector<4x1xf32> to vector<4x256xf32>
    %566 = vector.broadcast %562 : vector<1x256xf32> to vector<4x256xf32>
    %567 = arith.mulf %565, %566 : vector<4x256xf32>
    %568 = arith.addf %556, %567 : vector<4x256xf32>
    %569 = vector.extract_strided_slice %561 {offsets = [1, 0], sizes = [1, 256], strides = [1, 1]} : vector<4x256xf32> to vector<1x256xf32>
    %c29_199 = arith.constant 29 : index
    %c0_200 = arith.constant 0 : index
    %c0_201 = arith.constant 0 : index
    %570 = vector.load %arg4[%c29_199, %c0_200, %c0_201] : memref<36x4x1xf32, #tpu.memory_space<vmem>>, vector<1x4x1xf32>
    %571 = vector.shape_cast %570 : vector<1x4x1xf32> to vector<4x1xf32>
    %572 = vector.broadcast %571 : vector<4x1xf32> to vector<4x256xf32>
    %573 = vector.broadcast %569 : vector<1x256xf32> to vector<4x256xf32>
    %574 = arith.mulf %572, %573 : vector<4x256xf32>
    %575 = arith.addf %568, %574 : vector<4x256xf32>
    %576 = vector.extract_strided_slice %561 {offsets = [2, 0], sizes = [1, 256], strides = [1, 1]} : vector<4x256xf32> to vector<1x256xf32>
    %c30_202 = arith.constant 30 : index
    %c0_203 = arith.constant 0 : index
    %c0_204 = arith.constant 0 : index
    %577 = vector.load %arg4[%c30_202, %c0_203, %c0_204] : memref<36x4x1xf32, #tpu.memory_space<vmem>>, vector<1x4x1xf32>
    %578 = vector.shape_cast %577 : vector<1x4x1xf32> to vector<4x1xf32>
    %579 = vector.broadcast %578 : vector<4x1xf32> to vector<4x256xf32>
    %580 = vector.broadcast %576 : vector<1x256xf32> to vector<4x256xf32>
    %581 = arith.mulf %579, %580 : vector<4x256xf32>
    %582 = arith.addf %575, %581 : vector<4x256xf32>
    %583 = vector.extract_strided_slice %561 {offsets = [3, 0], sizes = [1, 256], strides = [1, 1]} : vector<4x256xf32> to vector<1x256xf32>
    %c31_205 = arith.constant 31 : index
    %c0_206 = arith.constant 0 : index
    %c0_207 = arith.constant 0 : index
    %584 = vector.load %arg4[%c31_205, %c0_206, %c0_207] : memref<36x4x1xf32, #tpu.memory_space<vmem>>, vector<1x4x1xf32>
    %585 = vector.shape_cast %584 : vector<1x4x1xf32> to vector<4x1xf32>
    %586 = vector.broadcast %585 : vector<4x1xf32> to vector<4x256xf32>
    %587 = vector.broadcast %583 : vector<1x256xf32> to vector<4x256xf32>
    %588 = arith.mulf %586, %587 : vector<4x256xf32>
    %589 = arith.addf %582, %588 : vector<4x256xf32>
    %c239_i32_208 = arith.constant 239 : i32
    %590 = tpu.dynamic_rotate %331 by %c239_i32_208 dim 1 : vector<4x256xf32>, i32 -> vector<4x256xf32>
    %cst_209 = arith.constant 0.000000e+00 : f32
    %591 = vector.shape_cast %32 : vector<1x256xi1> to vector<1x256xi1>
    %592 = vector.broadcast %591 : vector<1x256xi1> to vector<4x256xi1>
    %593 = vector.broadcast %cst_209 : f32 to vector<4x256xf32>
    %594 = arith.select %592, %590, %593 : vector<4x256xi1>, vector<4x256xf32>
    %595 = vector.extract_strided_slice %594 {offsets = [0, 0], sizes = [1, 256], strides = [1, 1]} : vector<4x256xf32> to vector<1x256xf32>
    %c32_210 = arith.constant 32 : index
    %c0_211 = arith.constant 0 : index
    %c0_212 = arith.constant 0 : index
    %596 = vector.load %arg4[%c32_210, %c0_211, %c0_212] : memref<36x4x1xf32, #tpu.memory_space<vmem>>, vector<1x4x1xf32>
    %597 = vector.shape_cast %596 : vector<1x4x1xf32> to vector<4x1xf32>
    %598 = vector.broadcast %597 : vector<4x1xf32> to vector<4x256xf32>
    %599 = vector.broadcast %595 : vector<1x256xf32> to vector<4x256xf32>
    %600 = arith.mulf %598, %599 : vector<4x256xf32>
    %601 = arith.addf %589, %600 : vector<4x256xf32>
    %602 = vector.extract_strided_slice %594 {offsets = [1, 0], sizes = [1, 256], strides = [1, 1]} : vector<4x256xf32> to vector<1x256xf32>
    %c33_213 = arith.constant 33 : index
    %c0_214 = arith.constant 0 : index
    %c0_215 = arith.constant 0 : index
    %603 = vector.load %arg4[%c33_213, %c0_214, %c0_215] : memref<36x4x1xf32, #tpu.memory_space<vmem>>, vector<1x4x1xf32>
    %604 = vector.shape_cast %603 : vector<1x4x1xf32> to vector<4x1xf32>
    %605 = vector.broadcast %604 : vector<4x1xf32> to vector<4x256xf32>
    %606 = vector.broadcast %602 : vector<1x256xf32> to vector<4x256xf32>
    %607 = arith.mulf %605, %606 : vector<4x256xf32>
    %608 = arith.addf %601, %607 : vector<4x256xf32>
    %609 = vector.extract_strided_slice %594 {offsets = [2, 0], sizes = [1, 256], strides = [1, 1]} : vector<4x256xf32> to vector<1x256xf32>
    %c34_216 = arith.constant 34 : index
    %c0_217 = arith.constant 0 : index
    %c0_218 = arith.constant 0 : index
    %610 = vector.load %arg4[%c34_216, %c0_217, %c0_218] : memref<36x4x1xf32, #tpu.memory_space<vmem>>, vector<1x4x1xf32>
    %611 = vector.shape_cast %610 : vector<1x4x1xf32> to vector<4x1xf32>
    %612 = vector.broadcast %611 : vector<4x1xf32> to vector<4x256xf32>
    %613 = vector.broadcast %609 : vector<1x256xf32> to vector<4x256xf32>
    %614 = arith.mulf %612, %613 : vector<4x256xf32>
    %615 = arith.addf %608, %614 : vector<4x256xf32>
    %616 = vector.extract_strided_slice %594 {offsets = [3, 0], sizes = [1, 256], strides = [1, 1]} : vector<4x256xf32> to vector<1x256xf32>
    %c35_219 = arith.constant 35 : index
    %c0_220 = arith.constant 0 : index
    %c0_221 = arith.constant 0 : index
    %617 = vector.load %arg4[%c35_219, %c0_220, %c0_221] : memref<36x4x1xf32, #tpu.memory_space<vmem>>, vector<1x4x1xf32>
    %618 = vector.shape_cast %617 : vector<1x4x1xf32> to vector<4x1xf32>
    %619 = vector.broadcast %618 : vector<4x1xf32> to vector<4x256xf32>
    %620 = vector.broadcast %616 : vector<1x256xf32> to vector<4x256xf32>
    %621 = arith.mulf %619, %620 : vector<4x256xf32>
    %622 = arith.addf %615, %621 : vector<4x256xf32>
    %c0_222 = arith.constant 0 : index
    %c0_223 = arith.constant 0 : index
    %623 = vector.load %arg5[%c0_222, %c0_223] : memref<4x1xf32, #tpu.memory_space<vmem>>, vector<4x1xf32>
    %624 = vector.broadcast %623 : vector<4x1xf32> to vector<4x256xf32>
    %625 = arith.addf %622, %624 : vector<4x256xf32>
    %626 = arith.addf %34, %625 : vector<4x256xf32>
    %c0_224 = arith.constant 0 : index
    %c0_225 = arith.constant 0 : index
    %c0_226 = arith.constant 0 : index
    %627 = vector.load %arg6[%c0_224, %c0_225, %c0_226] : memref<2x4x256xf32, #tpu.memory_space<vmem>>, vector<1x4x256xf32>
    %628 = vector.shape_cast %627 : vector<1x4x256xf32> to vector<4x256xf32>
    %629 = vector.shape_cast %626 : vector<4x256xf32> to vector<1x4x256xf32>
    tpu.vector_store %arg6[%c0_224, %c0_225, %c0_226], %629 {strides = array<i32>} : memref<2x4x256xf32, #tpu.memory_space<vmem>>, vector<1x4x256xf32>,
    %c1_227 = arith.constant 1 : index
    %c0_228 = arith.constant 0 : index
    %c0_229 = arith.constant 0 : index
    %630 = vector.load %arg1[%c1_227, %c0_228, %c0_229] : memref<2x4x256xf32, #tpu.memory_space<vmem>>, vector<1x4x256xf32>
    %631 = vector.shape_cast %630 : vector<1x4x256xf32> to vector<4x256xf32>
    %c17_i32_230 = arith.constant 17 : i32
    %632 = tpu.dynamic_rotate %631 by %c17_i32_230 dim 1 : vector<4x256xf32>, i32 -> vector<4x256xf32>
    %cst_231 = arith.constant 0.000000e+00 : f32
    %633 = vector.shape_cast %9 : vector<1x256xi1> to vector<1x256xi1>
    %634 = vector.broadcast %633 : vector<1x256xi1> to vector<4x256xi1>
    %635 = vector.broadcast %cst_231 : f32 to vector<4x256xf32>
    %636 = arith.select %634, %632, %635 : vector<4x256xi1>, vector<4x256xf32>
    %637 = vector.extract_strided_slice %636 {offsets = [0, 0], sizes = [1, 256], strides = [1, 1]} : vector<4x256xf32> to vector<1x256xf32>
    %c0_232 = arith.constant 0 : index
    %c0_233 = arith.constant 0 : index
    %c0_234 = arith.constant 0 : index
    %638 = vector.load %arg2[%c0_232, %c0_233, %c0_234] : memref<36x4x1xf32, #tpu.memory_space<vmem>>, vector<1x4x1xf32>
    %639 = vector.shape_cast %638 : vector<1x4x1xf32> to vector<4x1xf32>
    %640 = vector.broadcast %639 : vector<4x1xf32> to vector<4x256xf32>
    %641 = vector.broadcast %637 : vector<1x256xf32> to vector<4x256xf32>
    %642 = arith.mulf %640, %641 : vector<4x256xf32>
    %643 = vector.extract_strided_slice %636 {offsets = [1, 0], sizes = [1, 256], strides = [1, 1]} : vector<4x256xf32> to vector<1x256xf32>
    %c1_235 = arith.constant 1 : index
    %c0_236 = arith.constant 0 : index
    %c0_237 = arith.constant 0 : index
    %644 = vector.load %arg2[%c1_235, %c0_236, %c0_237] : memref<36x4x1xf32, #tpu.memory_space<vmem>>, vector<1x4x1xf32>
    %645 = vector.shape_cast %644 : vector<1x4x1xf32> to vector<4x1xf32>
    %646 = vector.broadcast %645 : vector<4x1xf32> to vector<4x256xf32>
    %647 = vector.broadcast %643 : vector<1x256xf32> to vector<4x256xf32>
    %648 = arith.mulf %646, %647 : vector<4x256xf32>
    %649 = arith.addf %642, %648 : vector<4x256xf32>
    %650 = vector.extract_strided_slice %636 {offsets = [2, 0], sizes = [1, 256], strides = [1, 1]} : vector<4x256xf32> to vector<1x256xf32>
    %c2_238 = arith.constant 2 : index
    %c0_239 = arith.constant 0 : index
    %c0_240 = arith.constant 0 : index
    %651 = vector.load %arg2[%c2_238, %c0_239, %c0_240] : memref<36x4x1xf32, #tpu.memory_space<vmem>>, vector<1x4x1xf32>
    %652 = vector.shape_cast %651 : vector<1x4x1xf32> to vector<4x1xf32>
    %653 = vector.broadcast %652 : vector<4x1xf32> to vector<4x256xf32>
    %654 = vector.broadcast %650 : vector<1x256xf32> to vector<4x256xf32>
    %655 = arith.mulf %653, %654 : vector<4x256xf32>
    %656 = arith.addf %649, %655 : vector<4x256xf32>
    %657 = vector.extract_strided_slice %636 {offsets = [3, 0], sizes = [1, 256], strides = [1, 1]} : vector<4x256xf32> to vector<1x256xf32>
    %c3_241 = arith.constant 3 : index
    %c0_242 = arith.constant 0 : index
    %c0_243 = arith.constant 0 : index
    %658 = vector.load %arg2[%c3_241, %c0_242, %c0_243] : memref<36x4x1xf32, #tpu.memory_space<vmem>>, vector<1x4x1xf32>
    %659 = vector.shape_cast %658 : vector<1x4x1xf32> to vector<4x1xf32>
    %660 = vector.broadcast %659 : vector<4x1xf32> to vector<4x256xf32>
    %661 = vector.broadcast %657 : vector<1x256xf32> to vector<4x256xf32>
    %662 = arith.mulf %660, %661 : vector<4x256xf32>
    %663 = arith.addf %656, %662 : vector<4x256xf32>
    %c16_i32_244 = arith.constant 16 : i32
    %664 = tpu.dynamic_rotate %631 by %c16_i32_244 dim 1 : vector<4x256xf32>, i32 -> vector<4x256xf32>
    %cst_245 = arith.constant 0.000000e+00 : f32
    %665 = vector.shape_cast %11 : vector<1x256xi1> to vector<1x256xi1>
    %666 = vector.broadcast %665 : vector<1x256xi1> to vector<4x256xi1>
    %667 = vector.broadcast %cst_245 : f32 to vector<4x256xf32>
    %668 = arith.select %666, %664, %667 : vector<4x256xi1>, vector<4x256xf32>
    %669 = vector.extract_strided_slice %668 {offsets = [0, 0], sizes = [1, 256], strides = [1, 1]} : vector<4x256xf32> to vector<1x256xf32>
    %c4_246 = arith.constant 4 : index
    %c0_247 = arith.constant 0 : index
    %c0_248 = arith.constant 0 : index
    %670 = vector.load %arg2[%c4_246, %c0_247, %c0_248] : memref<36x4x1xf32, #tpu.memory_space<vmem>>, vector<1x4x1xf32>
    %671 = vector.shape_cast %670 : vector<1x4x1xf32> to vector<4x1xf32>
    %672 = vector.broadcast %671 : vector<4x1xf32> to vector<4x256xf32>
    %673 = vector.broadcast %669 : vector<1x256xf32> to vector<4x256xf32>
    %674 = arith.mulf %672, %673 : vector<4x256xf32>
    %675 = arith.addf %663, %674 : vector<4x256xf32>
    %676 = vector.extract_strided_slice %668 {offsets = [1, 0], sizes = [1, 256], strides = [1, 1]} : vector<4x256xf32> to vector<1x256xf32>
    %c5_249 = arith.constant 5 : index
    %c0_250 = arith.constant 0 : index
    %c0_251 = arith.constant 0 : index
    %677 = vector.load %arg2[%c5_249, %c0_250, %c0_251] : memref<36x4x1xf32, #tpu.memory_space<vmem>>, vector<1x4x1xf32>
    %678 = vector.shape_cast %677 : vector<1x4x1xf32> to vector<4x1xf32>
    %679 = vector.broadcast %678 : vector<4x1xf32> to vector<4x256xf32>
    %680 = vector.broadcast %676 : vector<1x256xf32> to vector<4x256xf32>
    %681 = arith.mulf %679, %680 : vector<4x256xf32>
    %682 = arith.addf %675, %681 : vector<4x256xf32>
    %683 = vector.extract_strided_slice %668 {offsets = [2, 0], sizes = [1, 256], strides = [1, 1]} : vector<4x256xf32> to vector<1x256xf32>
    %c6_252 = arith.constant 6 : index
    %c0_253 = arith.constant 0 : index
    %c0_254 = arith.constant 0 : index
    %684 = vector.load %arg2[%c6_252, %c0_253, %c0_254] : memref<36x4x1xf32, #tpu.memory_space<vmem>>, vector<1x4x1xf32>
    %685 = vector.shape_cast %684 : vector<1x4x1xf32> to vector<4x1xf32>
    %686 = vector.broadcast %685 : vector<4x1xf32> to vector<4x256xf32>
    %687 = vector.broadcast %683 : vector<1x256xf32> to vector<4x256xf32>
    %688 = arith.mulf %686, %687 : vector<4x256xf32>
    %689 = arith.addf %682, %688 : vector<4x256xf32>
    %690 = vector.extract_strided_slice %668 {offsets = [3, 0], sizes = [1, 256], strides = [1, 1]} : vector<4x256xf32> to vector<1x256xf32>
    %c7_255 = arith.constant 7 : index
    %c0_256 = arith.constant 0 : index
    %c0_257 = arith.constant 0 : index
    %691 = vector.load %arg2[%c7_255, %c0_256, %c0_257] : memref<36x4x1xf32, #tpu.memory_space<vmem>>, vector<1x4x1xf32>
    %692 = vector.shape_cast %691 : vector<1x4x1xf32> to vector<4x1xf32>
    %693 = vector.broadcast %692 : vector<4x1xf32> to vector<4x256xf32>
    %694 = vector.broadcast %690 : vector<1x256xf32> to vector<4x256xf32>
    %695 = arith.mulf %693, %694 : vector<4x256xf32>
    %696 = arith.addf %689, %695 : vector<4x256xf32>
    %c15_i32_258 = arith.constant 15 : i32
    %697 = tpu.dynamic_rotate %631 by %c15_i32_258 dim 1 : vector<4x256xf32>, i32 -> vector<4x256xf32>
    %cst_259 = arith.constant 0.000000e+00 : f32
    %698 = vector.shape_cast %16 : vector<1x256xi1> to vector<1x256xi1>
    %699 = vector.broadcast %698 : vector<1x256xi1> to vector<4x256xi1>
    %700 = vector.broadcast %cst_259 : f32 to vector<4x256xf32>
    %701 = arith.select %699, %697, %700 : vector<4x256xi1>, vector<4x256xf32>
    %702 = vector.extract_strided_slice %701 {offsets = [0, 0], sizes = [1, 256], strides = [1, 1]} : vector<4x256xf32> to vector<1x256xf32>
    %c8_260 = arith.constant 8 : index
    %c0_261 = arith.constant 0 : index
    %c0_262 = arith.constant 0 : index
    %703 = vector.load %arg2[%c8_260, %c0_261, %c0_262] : memref<36x4x1xf32, #tpu.memory_space<vmem>>, vector<1x4x1xf32>
    %704 = vector.shape_cast %703 : vector<1x4x1xf32> to vector<4x1xf32>
    %705 = vector.broadcast %704 : vector<4x1xf32> to vector<4x256xf32>
    %706 = vector.broadcast %702 : vector<1x256xf32> to vector<4x256xf32>
    %707 = arith.mulf %705, %706 : vector<4x256xf32>
    %708 = arith.addf %696, %707 : vector<4x256xf32>
    %709 = vector.extract_strided_slice %701 {offsets = [1, 0], sizes = [1, 256], strides = [1, 1]} : vector<4x256xf32> to vector<1x256xf32>
    %c9_263 = arith.constant 9 : index
    %c0_264 = arith.constant 0 : index
    %c0_265 = arith.constant 0 : index
    %710 = vector.load %arg2[%c9_263, %c0_264, %c0_265] : memref<36x4x1xf32, #tpu.memory_space<vmem>>, vector<1x4x1xf32>
    %711 = vector.shape_cast %710 : vector<1x4x1xf32> to vector<4x1xf32>
    %712 = vector.broadcast %711 : vector<4x1xf32> to vector<4x256xf32>
    %713 = vector.broadcast %709 : vector<1x256xf32> to vector<4x256xf32>
    %714 = arith.mulf %712, %713 : vector<4x256xf32>
    %715 = arith.addf %708, %714 : vector<4x256xf32>
    %716 = vector.extract_strided_slice %701 {offsets = [2, 0], sizes = [1, 256], strides = [1, 1]} : vector<4x256xf32> to vector<1x256xf32>
    %c10_266 = arith.constant 10 : index
    %c0_267 = arith.constant 0 : index
    %c0_268 = arith.constant 0 : index
    %717 = vector.load %arg2[%c10_266, %c0_267, %c0_268] : memref<36x4x1xf32, #tpu.memory_space<vmem>>, vector<1x4x1xf32>
    %718 = vector.shape_cast %717 : vector<1x4x1xf32> to vector<4x1xf32>
    %719 = vector.broadcast %718 : vector<4x1xf32> to vector<4x256xf32>
    %720 = vector.broadcast %716 : vector<1x256xf32> to vector<4x256xf32>
    %721 = arith.mulf %719, %720 : vector<4x256xf32>
    %722 = arith.addf %715, %721 : vector<4x256xf32>
    %723 = vector.extract_strided_slice %701 {offsets = [3, 0], sizes = [1, 256], strides = [1, 1]} : vector<4x256xf32> to vector<1x256xf32>
    %c11_269 = arith.constant 11 : index
    %c0_270 = arith.constant 0 : index
    %c0_271 = arith.constant 0 : index
    %724 = vector.load %arg2[%c11_269, %c0_270, %c0_271] : memref<36x4x1xf32, #tpu.memory_space<vmem>>, vector<1x4x1xf32>
    %725 = vector.shape_cast %724 : vector<1x4x1xf32> to vector<4x1xf32>
    %726 = vector.broadcast %725 : vector<4x1xf32> to vector<4x256xf32>
    %727 = vector.broadcast %723 : vector<1x256xf32> to vector<4x256xf32>
    %728 = arith.mulf %726, %727 : vector<4x256xf32>
    %729 = arith.addf %722, %728 : vector<4x256xf32>
    %c1_i32_272 = arith.constant 1 : i32
    %730 = tpu.dynamic_rotate %631 by %c1_i32_272 dim 1 : vector<4x256xf32>, i32 -> vector<4x256xf32>
    %cst_273 = arith.constant 0.000000e+00 : f32
    %731 = vector.shape_cast %18 : vector<1x256xi1> to vector<1x256xi1>
    %732 = vector.broadcast %731 : vector<1x256xi1> to vector<4x256xi1>
    %733 = vector.broadcast %cst_273 : f32 to vector<4x256xf32>
    %734 = arith.select %732, %730, %733 : vector<4x256xi1>, vector<4x256xf32>
    %735 = vector.extract_strided_slice %734 {offsets = [0, 0], sizes = [1, 256], strides = [1, 1]} : vector<4x256xf32> to vector<1x256xf32>
    %c12_274 = arith.constant 12 : index
    %c0_275 = arith.constant 0 : index
    %c0_276 = arith.constant 0 : index
    %736 = vector.load %arg2[%c12_274, %c0_275, %c0_276] : memref<36x4x1xf32, #tpu.memory_space<vmem>>, vector<1x4x1xf32>
    %737 = vector.shape_cast %736 : vector<1x4x1xf32> to vector<4x1xf32>
    %738 = vector.broadcast %737 : vector<4x1xf32> to vector<4x256xf32>
    %739 = vector.broadcast %735 : vector<1x256xf32> to vector<4x256xf32>
    %740 = arith.mulf %738, %739 : vector<4x256xf32>
    %741 = arith.addf %729, %740 : vector<4x256xf32>
    %742 = vector.extract_strided_slice %734 {offsets = [1, 0], sizes = [1, 256], strides = [1, 1]} : vector<4x256xf32> to vector<1x256xf32>
    %c13_277 = arith.constant 13 : index
    %c0_278 = arith.constant 0 : index
    %c0_279 = arith.constant 0 : index
    %743 = vector.load %arg2[%c13_277, %c0_278, %c0_279] : memref<36x4x1xf32, #tpu.memory_space<vmem>>, vector<1x4x1xf32>
    %744 = vector.shape_cast %743 : vector<1x4x1xf32> to vector<4x1xf32>
    %745 = vector.broadcast %744 : vector<4x1xf32> to vector<4x256xf32>
    %746 = vector.broadcast %742 : vector<1x256xf32> to vector<4x256xf32>
    %747 = arith.mulf %745, %746 : vector<4x256xf32>
    %748 = arith.addf %741, %747 : vector<4x256xf32>
    %749 = vector.extract_strided_slice %734 {offsets = [2, 0], sizes = [1, 256], strides = [1, 1]} : vector<4x256xf32> to vector<1x256xf32>
    %c14_280 = arith.constant 14 : index
    %c0_281 = arith.constant 0 : index
    %c0_282 = arith.constant 0 : index
    %750 = vector.load %arg2[%c14_280, %c0_281, %c0_282] : memref<36x4x1xf32, #tpu.memory_space<vmem>>, vector<1x4x1xf32>
    %751 = vector.shape_cast %750 : vector<1x4x1xf32> to vector<4x1xf32>
    %752 = vector.broadcast %751 : vector<4x1xf32> to vector<4x256xf32>
    %753 = vector.broadcast %749 : vector<1x256xf32> to vector<4x256xf32>
    %754 = arith.mulf %752, %753 : vector<4x256xf32>
    %755 = arith.addf %748, %754 : vector<4x256xf32>
    %756 = vector.extract_strided_slice %734 {offsets = [3, 0], sizes = [1, 256], strides = [1, 1]} : vector<4x256xf32> to vector<1x256xf32>
    %c15_283 = arith.constant 15 : index
    %c0_284 = arith.constant 0 : index
    %c0_285 = arith.constant 0 : index
    %757 = vector.load %arg2[%c15_283, %c0_284, %c0_285] : memref<36x4x1xf32, #tpu.memory_space<vmem>>, vector<1x4x1xf32>
    %758 = vector.shape_cast %757 : vector<1x4x1xf32> to vector<4x1xf32>
    %759 = vector.broadcast %758 : vector<4x1xf32> to vector<4x256xf32>
    %760 = vector.broadcast %756 : vector<1x256xf32> to vector<4x256xf32>
    %761 = arith.mulf %759, %760 : vector<4x256xf32>
    %762 = arith.addf %755, %761 : vector<4x256xf32>
    %763 = vector.extract_strided_slice %631 {offsets = [0, 0], sizes = [1, 256], strides = [1, 1]} : vector<4x256xf32> to vector<1x256xf32>
    %c16_286 = arith.constant 16 : index
    %c0_287 = arith.constant 0 : index
    %c0_288 = arith.constant 0 : index
    %764 = vector.load %arg2[%c16_286, %c0_287, %c0_288] : memref<36x4x1xf32, #tpu.memory_space<vmem>>, vector<1x4x1xf32>
    %765 = vector.shape_cast %764 : vector<1x4x1xf32> to vector<4x1xf32>
    %766 = vector.broadcast %765 : vector<4x1xf32> to vector<4x256xf32>
    %767 = vector.broadcast %763 : vector<1x256xf32> to vector<4x256xf32>
    %768 = arith.mulf %766, %767 : vector<4x256xf32>
    %769 = arith.addf %762, %768 : vector<4x256xf32>
    %770 = vector.extract_strided_slice %631 {offsets = [1, 0], sizes = [1, 256], strides = [1, 1]} : vector<4x256xf32> to vector<1x256xf32>
    %c17_289 = arith.constant 17 : index
    %c0_290 = arith.constant 0 : index
    %c0_291 = arith.constant 0 : index
    %771 = vector.load %arg2[%c17_289, %c0_290, %c0_291] : memref<36x4x1xf32, #tpu.memory_space<vmem>>, vector<1x4x1xf32>
    %772 = vector.shape_cast %771 : vector<1x4x1xf32> to vector<4x1xf32>
    %773 = vector.broadcast %772 : vector<4x1xf32> to vector<4x256xf32>
    %774 = vector.broadcast %770 : vector<1x256xf32> to vector<4x256xf32>
    %775 = arith.mulf %773, %774 : vector<4x256xf32>
    %776 = arith.addf %769, %775 : vector<4x256xf32>
    %777 = vector.extract_strided_slice %631 {offsets = [2, 0], sizes = [1, 256], strides = [1, 1]} : vector<4x256xf32> to vector<1x256xf32>
    %c18_292 = arith.constant 18 : index
    %c0_293 = arith.constant 0 : index
    %c0_294 = arith.constant 0 : index
    %778 = vector.load %arg2[%c18_292, %c0_293, %c0_294] : memref<36x4x1xf32, #tpu.memory_space<vmem>>, vector<1x4x1xf32>
    %779 = vector.shape_cast %778 : vector<1x4x1xf32> to vector<4x1xf32>
    %780 = vector.broadcast %779 : vector<4x1xf32> to vector<4x256xf32>
    %781 = vector.broadcast %777 : vector<1x256xf32> to vector<4x256xf32>
    %782 = arith.mulf %780, %781 : vector<4x256xf32>
    %783 = arith.addf %776, %782 : vector<4x256xf32>
    %784 = vector.extract_strided_slice %631 {offsets = [3, 0], sizes = [1, 256], strides = [1, 1]} : vector<4x256xf32> to vector<1x256xf32>
    %c19_295 = arith.constant 19 : index
    %c0_296 = arith.constant 0 : index
    %c0_297 = arith.constant 0 : index
    %785 = vector.load %arg2[%c19_295, %c0_296, %c0_297] : memref<36x4x1xf32, #tpu.memory_space<vmem>>, vector<1x4x1xf32>
    %786 = vector.shape_cast %785 : vector<1x4x1xf32> to vector<4x1xf32>
    %787 = vector.broadcast %786 : vector<4x1xf32> to vector<4x256xf32>
    %788 = vector.broadcast %784 : vector<1x256xf32> to vector<4x256xf32>
    %789 = arith.mulf %787, %788 : vector<4x256xf32>
    %790 = arith.addf %783, %789 : vector<4x256xf32>
    %c255_i32_298 = arith.constant 255 : i32
    %791 = tpu.dynamic_rotate %631 by %c255_i32_298 dim 1 : vector<4x256xf32>, i32 -> vector<4x256xf32>
    %cst_299 = arith.constant 0.000000e+00 : f32
    %792 = vector.shape_cast %20 : vector<1x256xi1> to vector<1x256xi1>
    %793 = vector.broadcast %792 : vector<1x256xi1> to vector<4x256xi1>
    %794 = vector.broadcast %cst_299 : f32 to vector<4x256xf32>
    %795 = arith.select %793, %791, %794 : vector<4x256xi1>, vector<4x256xf32>
    %796 = vector.extract_strided_slice %795 {offsets = [0, 0], sizes = [1, 256], strides = [1, 1]} : vector<4x256xf32> to vector<1x256xf32>
    %c20_300 = arith.constant 20 : index
    %c0_301 = arith.constant 0 : index
    %c0_302 = arith.constant 0 : index
    %797 = vector.load %arg2[%c20_300, %c0_301, %c0_302] : memref<36x4x1xf32, #tpu.memory_space<vmem>>, vector<1x4x1xf32>
    %798 = vector.shape_cast %797 : vector<1x4x1xf32> to vector<4x1xf32>
    %799 = vector.broadcast %798 : vector<4x1xf32> to vector<4x256xf32>
    %800 = vector.broadcast %796 : vector<1x256xf32> to vector<4x256xf32>
    %801 = arith.mulf %799, %800 : vector<4x256xf32>
    %802 = arith.addf %790, %801 : vector<4x256xf32>
    %803 = vector.extract_strided_slice %795 {offsets = [1, 0], sizes = [1, 256], strides = [1, 1]} : vector<4x256xf32> to vector<1x256xf32>
    %c21_303 = arith.constant 21 : index
    %c0_304 = arith.constant 0 : index
    %c0_305 = arith.constant 0 : index
    %804 = vector.load %arg2[%c21_303, %c0_304, %c0_305] : memref<36x4x1xf32, #tpu.memory_space<vmem>>, vector<1x4x1xf32>
    %805 = vector.shape_cast %804 : vector<1x4x1xf32> to vector<4x1xf32>
    %806 = vector.broadcast %805 : vector<4x1xf32> to vector<4x256xf32>
    %807 = vector.broadcast %803 : vector<1x256xf32> to vector<4x256xf32>
    %808 = arith.mulf %806, %807 : vector<4x256xf32>
    %809 = arith.addf %802, %808 : vector<4x256xf32>
    %810 = vector.extract_strided_slice %795 {offsets = [2, 0], sizes = [1, 256], strides = [1, 1]} : vector<4x256xf32> to vector<1x256xf32>
    %c22_306 = arith.constant 22 : index
    %c0_307 = arith.constant 0 : index
    %c0_308 = arith.constant 0 : index
    %811 = vector.load %arg2[%c22_306, %c0_307, %c0_308] : memref<36x4x1xf32, #tpu.memory_space<vmem>>, vector<1x4x1xf32>
    %812 = vector.shape_cast %811 : vector<1x4x1xf32> to vector<4x1xf32>
    %813 = vector.broadcast %812 : vector<4x1xf32> to vector<4x256xf32>
    %814 = vector.broadcast %810 : vector<1x256xf32> to vector<4x256xf32>
    %815 = arith.mulf %813, %814 : vector<4x256xf32>
    %816 = arith.addf %809, %815 : vector<4x256xf32>
    %817 = vector.extract_strided_slice %795 {offsets = [3, 0], sizes = [1, 256], strides = [1, 1]} : vector<4x256xf32> to vector<1x256xf32>
    %c23_309 = arith.constant 23 : index
    %c0_310 = arith.constant 0 : index
    %c0_311 = arith.constant 0 : index
    %818 = vector.load %arg2[%c23_309, %c0_310, %c0_311] : memref<36x4x1xf32, #tpu.memory_space<vmem>>, vector<1x4x1xf32>
    %819 = vector.shape_cast %818 : vector<1x4x1xf32> to vector<4x1xf32>
    %820 = vector.broadcast %819 : vector<4x1xf32> to vector<4x256xf32>
    %821 = vector.broadcast %817 : vector<1x256xf32> to vector<4x256xf32>
    %822 = arith.mulf %820, %821 : vector<4x256xf32>
    %823 = arith.addf %816, %822 : vector<4x256xf32>
    %c241_i32_312 = arith.constant 241 : i32
    %824 = tpu.dynamic_rotate %631 by %c241_i32_312 dim 1 : vector<4x256xf32>, i32 -> vector<4x256xf32>
    %cst_313 = arith.constant 0.000000e+00 : f32
    %825 = vector.shape_cast %25 : vector<1x256xi1> to vector<1x256xi1>
    %826 = vector.broadcast %825 : vector<1x256xi1> to vector<4x256xi1>
    %827 = vector.broadcast %cst_313 : f32 to vector<4x256xf32>
    %828 = arith.select %826, %824, %827 : vector<4x256xi1>, vector<4x256xf32>
    %829 = vector.extract_strided_slice %828 {offsets = [0, 0], sizes = [1, 256], strides = [1, 1]} : vector<4x256xf32> to vector<1x256xf32>
    %c24_314 = arith.constant 24 : index
    %c0_315 = arith.constant 0 : index
    %c0_316 = arith.constant 0 : index
    %830 = vector.load %arg2[%c24_314, %c0_315, %c0_316] : memref<36x4x1xf32, #tpu.memory_space<vmem>>, vector<1x4x1xf32>
    %831 = vector.shape_cast %830 : vector<1x4x1xf32> to vector<4x1xf32>
    %832 = vector.broadcast %831 : vector<4x1xf32> to vector<4x256xf32>
    %833 = vector.broadcast %829 : vector<1x256xf32> to vector<4x256xf32>
    %834 = arith.mulf %832, %833 : vector<4x256xf32>
    %835 = arith.addf %823, %834 : vector<4x256xf32>
    %836 = vector.extract_strided_slice %828 {offsets = [1, 0], sizes = [1, 256], strides = [1, 1]} : vector<4x256xf32> to vector<1x256xf32>
    %c25_317 = arith.constant 25 : index
    %c0_318 = arith.constant 0 : index
    %c0_319 = arith.constant 0 : index
    %837 = vector.load %arg2[%c25_317, %c0_318, %c0_319] : memref<36x4x1xf32, #tpu.memory_space<vmem>>, vector<1x4x1xf32>
    %838 = vector.shape_cast %837 : vector<1x4x1xf32> to vector<4x1xf32>
    %839 = vector.broadcast %838 : vector<4x1xf32> to vector<4x256xf32>
    %840 = vector.broadcast %836 : vector<1x256xf32> to vector<4x256xf32>
    %841 = arith.mulf %839, %840 : vector<4x256xf32>
    %842 = arith.addf %835, %841 : vector<4x256xf32>
    %843 = vector.extract_strided_slice %828 {offsets = [2, 0], sizes = [1, 256], strides = [1, 1]} : vector<4x256xf32> to vector<1x256xf32>
    %c26_320 = arith.constant 26 : index
    %c0_321 = arith.constant 0 : index
    %c0_322 = arith.constant 0 : index
    %844 = vector.load %arg2[%c26_320, %c0_321, %c0_322] : memref<36x4x1xf32, #tpu.memory_space<vmem>>, vector<1x4x1xf32>
    %845 = vector.shape_cast %844 : vector<1x4x1xf32> to vector<4x1xf32>
    %846 = vector.broadcast %845 : vector<4x1xf32> to vector<4x256xf32>
    %847 = vector.broadcast %843 : vector<1x256xf32> to vector<4x256xf32>
    %848 = arith.mulf %846, %847 : vector<4x256xf32>
    %849 = arith.addf %842, %848 : vector<4x256xf32>
    %850 = vector.extract_strided_slice %828 {offsets = [3, 0], sizes = [1, 256], strides = [1, 1]} : vector<4x256xf32> to vector<1x256xf32>
    %c27_323 = arith.constant 27 : index
    %c0_324 = arith.constant 0 : index
    %c0_325 = arith.constant 0 : index
    %851 = vector.load %arg2[%c27_323, %c0_324, %c0_325] : memref<36x4x1xf32, #tpu.memory_space<vmem>>, vector<1x4x1xf32>
    %852 = vector.shape_cast %851 : vector<1x4x1xf32> to vector<4x1xf32>
    %853 = vector.broadcast %852 : vector<4x1xf32> to vector<4x256xf32>
    %854 = vector.broadcast %850 : vector<1x256xf32> to vector<4x256xf32>
    %855 = arith.mulf %853, %854 : vector<4x256xf32>
    %856 = arith.addf %849, %855 : vector<4x256xf32>
    %c240_i32_326 = arith.constant 240 : i32
    %857 = tpu.dynamic_rotate %631 by %c240_i32_326 dim 1 : vector<4x256xf32>, i32 -> vector<4x256xf32>
    %cst_327 = arith.constant 0.000000e+00 : f32
    %858 = vector.shape_cast %27 : vector<1x256xi1> to vector<1x256xi1>
    %859 = vector.broadcast %858 : vector<1x256xi1> to vector<4x256xi1>
    %860 = vector.broadcast %cst_327 : f32 to vector<4x256xf32>
    %861 = arith.select %859, %857, %860 : vector<4x256xi1>, vector<4x256xf32>
    %862 = vector.extract_strided_slice %861 {offsets = [0, 0], sizes = [1, 256], strides = [1, 1]} : vector<4x256xf32> to vector<1x256xf32>
    %c28_328 = arith.constant 28 : index
    %c0_329 = arith.constant 0 : index
    %c0_330 = arith.constant 0 : index
    %863 = vector.load %arg2[%c28_328, %c0_329, %c0_330] : memref<36x4x1xf32, #tpu.memory_space<vmem>>, vector<1x4x1xf32>
    %864 = vector.shape_cast %863 : vector<1x4x1xf32> to vector<4x1xf32>
    %865 = vector.broadcast %864 : vector<4x1xf32> to vector<4x256xf32>
    %866 = vector.broadcast %862 : vector<1x256xf32> to vector<4x256xf32>
    %867 = arith.mulf %865, %866 : vector<4x256xf32>
    %868 = arith.addf %856, %867 : vector<4x256xf32>
    %869 = vector.extract_strided_slice %861 {offsets = [1, 0], sizes = [1, 256], strides = [1, 1]} : vector<4x256xf32> to vector<1x256xf32>
    %c29_331 = arith.constant 29 : index
    %c0_332 = arith.constant 0 : index
    %c0_333 = arith.constant 0 : index
    %870 = vector.load %arg2[%c29_331, %c0_332, %c0_333] : memref<36x4x1xf32, #tpu.memory_space<vmem>>, vector<1x4x1xf32>
    %871 = vector.shape_cast %870 : vector<1x4x1xf32> to vector<4x1xf32>
    %872 = vector.broadcast %871 : vector<4x1xf32> to vector<4x256xf32>
    %873 = vector.broadcast %869 : vector<1x256xf32> to vector<4x256xf32>
    %874 = arith.mulf %872, %873 : vector<4x256xf32>
    %875 = arith.addf %868, %874 : vector<4x256xf32>
    %876 = vector.extract_strided_slice %861 {offsets = [2, 0], sizes = [1, 256], strides = [1, 1]} : vector<4x256xf32> to vector<1x256xf32>
    %c30_334 = arith.constant 30 : index
    %c0_335 = arith.constant 0 : index
    %c0_336 = arith.constant 0 : index
    %877 = vector.load %arg2[%c30_334, %c0_335, %c0_336] : memref<36x4x1xf32, #tpu.memory_space<vmem>>, vector<1x4x1xf32>
    %878 = vector.shape_cast %877 : vector<1x4x1xf32> to vector<4x1xf32>
    %879 = vector.broadcast %878 : vector<4x1xf32> to vector<4x256xf32>
    %880 = vector.broadcast %876 : vector<1x256xf32> to vector<4x256xf32>
    %881 = arith.mulf %879, %880 : vector<4x256xf32>
    %882 = arith.addf %875, %881 : vector<4x256xf32>
    %883 = vector.extract_strided_slice %861 {offsets = [3, 0], sizes = [1, 256], strides = [1, 1]} : vector<4x256xf32> to vector<1x256xf32>
    %c31_337 = arith.constant 31 : index
    %c0_338 = arith.constant 0 : index
    %c0_339 = arith.constant 0 : index
    %884 = vector.load %arg2[%c31_337, %c0_338, %c0_339] : memref<36x4x1xf32, #tpu.memory_space<vmem>>, vector<1x4x1xf32>
    %885 = vector.shape_cast %884 : vector<1x4x1xf32> to vector<4x1xf32>
    %886 = vector.broadcast %885 : vector<4x1xf32> to vector<4x256xf32>
    %887 = vector.broadcast %883 : vector<1x256xf32> to vector<4x256xf32>
    %888 = arith.mulf %886, %887 : vector<4x256xf32>
    %889 = arith.addf %882, %888 : vector<4x256xf32>
    %c239_i32_340 = arith.constant 239 : i32
    %890 = tpu.dynamic_rotate %631 by %c239_i32_340 dim 1 : vector<4x256xf32>, i32 -> vector<4x256xf32>
    %cst_341 = arith.constant 0.000000e+00 : f32
    %891 = vector.shape_cast %32 : vector<1x256xi1> to vector<1x256xi1>
    %892 = vector.broadcast %891 : vector<1x256xi1> to vector<4x256xi1>
    %893 = vector.broadcast %cst_341 : f32 to vector<4x256xf32>
    %894 = arith.select %892, %890, %893 : vector<4x256xi1>, vector<4x256xf32>
    %895 = vector.extract_strided_slice %894 {offsets = [0, 0], sizes = [1, 256], strides = [1, 1]} : vector<4x256xf32> to vector<1x256xf32>
    %c32_342 = arith.constant 32 : index
    %c0_343 = arith.constant 0 : index
    %c0_344 = arith.constant 0 : index
    %896 = vector.load %arg2[%c32_342, %c0_343, %c0_344] : memref<36x4x1xf32, #tpu.memory_space<vmem>>, vector<1x4x1xf32>
    %897 = vector.shape_cast %896 : vector<1x4x1xf32> to vector<4x1xf32>
    %898 = vector.broadcast %897 : vector<4x1xf32> to vector<4x256xf32>
    %899 = vector.broadcast %895 : vector<1x256xf32> to vector<4x256xf32>
    %900 = arith.mulf %898, %899 : vector<4x256xf32>
    %901 = arith.addf %889, %900 : vector<4x256xf32>
    %902 = vector.extract_strided_slice %894 {offsets = [1, 0], sizes = [1, 256], strides = [1, 1]} : vector<4x256xf32> to vector<1x256xf32>
    %c33_345 = arith.constant 33 : index
    %c0_346 = arith.constant 0 : index
    %c0_347 = arith.constant 0 : index
    %903 = vector.load %arg2[%c33_345, %c0_346, %c0_347] : memref<36x4x1xf32, #tpu.memory_space<vmem>>, vector<1x4x1xf32>
    %904 = vector.shape_cast %903 : vector<1x4x1xf32> to vector<4x1xf32>
    %905 = vector.broadcast %904 : vector<4x1xf32> to vector<4x256xf32>
    %906 = vector.broadcast %902 : vector<1x256xf32> to vector<4x256xf32>
    %907 = arith.mulf %905, %906 : vector<4x256xf32>
    %908 = arith.addf %901, %907 : vector<4x256xf32>
    %909 = vector.extract_strided_slice %894 {offsets = [2, 0], sizes = [1, 256], strides = [1, 1]} : vector<4x256xf32> to vector<1x256xf32>
    %c34_348 = arith.constant 34 : index
    %c0_349 = arith.constant 0 : index
    %c0_350 = arith.constant 0 : index
    %910 = vector.load %arg2[%c34_348, %c0_349, %c0_350] : memref<36x4x1xf32, #tpu.memory_space<vmem>>, vector<1x4x1xf32>
    %911 = vector.shape_cast %910 : vector<1x4x1xf32> to vector<4x1xf32>
    %912 = vector.broadcast %911 : vector<4x1xf32> to vector<4x256xf32>
    %913 = vector.broadcast %909 : vector<1x256xf32> to vector<4x256xf32>
    %914 = arith.mulf %912, %913 : vector<4x256xf32>
    %915 = arith.addf %908, %914 : vector<4x256xf32>
    %916 = vector.extract_strided_slice %894 {offsets = [3, 0], sizes = [1, 256], strides = [1, 1]} : vector<4x256xf32> to vector<1x256xf32>
    %c35_351 = arith.constant 35 : index
    %c0_352 = arith.constant 0 : index
    %c0_353 = arith.constant 0 : index
    %917 = vector.load %arg2[%c35_351, %c0_352, %c0_353] : memref<36x4x1xf32, #tpu.memory_space<vmem>>, vector<1x4x1xf32>
    %918 = vector.shape_cast %917 : vector<1x4x1xf32> to vector<4x1xf32>
    %919 = vector.broadcast %918 : vector<4x1xf32> to vector<4x256xf32>
    %920 = vector.broadcast %916 : vector<1x256xf32> to vector<4x256xf32>
    %921 = arith.mulf %919, %920 : vector<4x256xf32>
    %922 = arith.addf %915, %921 : vector<4x256xf32>
    %c0_354 = arith.constant 0 : index
    %c0_355 = arith.constant 0 : index
    %923 = vector.load %arg3[%c0_354, %c0_355] : memref<4x1xf32, #tpu.memory_space<vmem>>, vector<4x1xf32>
    %924 = vector.broadcast %923 : vector<4x1xf32> to vector<4x256xf32>
    %925 = arith.addf %922, %924 : vector<4x256xf32>
    %cst_356 = arith.constant 0.00999999977 : f32
    %926 = vector.broadcast %cst_356 : f32 to vector<4x256xf32>
    %927 = arith.mulf %926, %925 : vector<4x256xf32>
    %928 = arith.maximumf %925, %927 : vector<4x256xf32>
    %c17_i32_357 = arith.constant 17 : i32
    %929 = tpu.dynamic_rotate %928 by %c17_i32_357 dim 1 : vector<4x256xf32>, i32 -> vector<4x256xf32>
    %cst_358 = arith.constant 0.000000e+00 : f32
    %930 = vector.shape_cast %9 : vector<1x256xi1> to vector<1x256xi1>
    %931 = vector.broadcast %930 : vector<1x256xi1> to vector<4x256xi1>
    %932 = vector.broadcast %cst_358 : f32 to vector<4x256xf32>
    %933 = arith.select %931, %929, %932 : vector<4x256xi1>, vector<4x256xf32>
    %934 = vector.extract_strided_slice %933 {offsets = [0, 0], sizes = [1, 256], strides = [1, 1]} : vector<4x256xf32> to vector<1x256xf32>
    %c0_359 = arith.constant 0 : index
    %c0_360 = arith.constant 0 : index
    %c0_361 = arith.constant 0 : index
    %935 = vector.load %arg4[%c0_359, %c0_360, %c0_361] : memref<36x4x1xf32, #tpu.memory_space<vmem>>, vector<1x4x1xf32>
    %936 = vector.shape_cast %935 : vector<1x4x1xf32> to vector<4x1xf32>
    %937 = vector.broadcast %936 : vector<4x1xf32> to vector<4x256xf32>
    %938 = vector.broadcast %934 : vector<1x256xf32> to vector<4x256xf32>
    %939 = arith.mulf %937, %938 : vector<4x256xf32>
    %940 = vector.extract_strided_slice %933 {offsets = [1, 0], sizes = [1, 256], strides = [1, 1]} : vector<4x256xf32> to vector<1x256xf32>
    %c1_362 = arith.constant 1 : index
    %c0_363 = arith.constant 0 : index
    %c0_364 = arith.constant 0 : index
    %941 = vector.load %arg4[%c1_362, %c0_363, %c0_364] : memref<36x4x1xf32, #tpu.memory_space<vmem>>, vector<1x4x1xf32>
    %942 = vector.shape_cast %941 : vector<1x4x1xf32> to vector<4x1xf32>
    %943 = vector.broadcast %942 : vector<4x1xf32> to vector<4x256xf32>
    %944 = vector.broadcast %940 : vector<1x256xf32> to vector<4x256xf32>
    %945 = arith.mulf %943, %944 : vector<4x256xf32>
    %946 = arith.addf %939, %945 : vector<4x256xf32>
    %947 = vector.extract_strided_slice %933 {offsets = [2, 0], sizes = [1, 256], strides = [1, 1]} : vector<4x256xf32> to vector<1x256xf32>
    %c2_365 = arith.constant 2 : index
    %c0_366 = arith.constant 0 : index
    %c0_367 = arith.constant 0 : index
    %948 = vector.load %arg4[%c2_365, %c0_366, %c0_367] : memref<36x4x1xf32, #tpu.memory_space<vmem>>, vector<1x4x1xf32>
    %949 = vector.shape_cast %948 : vector<1x4x1xf32> to vector<4x1xf32>
    %950 = vector.broadcast %949 : vector<4x1xf32> to vector<4x256xf32>
    %951 = vector.broadcast %947 : vector<1x256xf32> to vector<4x256xf32>
    %952 = arith.mulf %950, %951 : vector<4x256xf32>
    %953 = arith.addf %946, %952 : vector<4x256xf32>
    %954 = vector.extract_strided_slice %933 {offsets = [3, 0], sizes = [1, 256], strides = [1, 1]} : vector<4x256xf32> to vector<1x256xf32>
    %c3_368 = arith.constant 3 : index
    %c0_369 = arith.constant 0 : index
    %c0_370 = arith.constant 0 : index
    %955 = vector.load %arg4[%c3_368, %c0_369, %c0_370] : memref<36x4x1xf32, #tpu.memory_space<vmem>>, vector<1x4x1xf32>
    %956 = vector.shape_cast %955 : vector<1x4x1xf32> to vector<4x1xf32>
    %957 = vector.broadcast %956 : vector<4x1xf32> to vector<4x256xf32>
    %958 = vector.broadcast %954 : vector<1x256xf32> to vector<4x256xf32>
    %959 = arith.mulf %957, %958 : vector<4x256xf32>
    %960 = arith.addf %953, %959 : vector<4x256xf32>
    %c16_i32_371 = arith.constant 16 : i32
    %961 = tpu.dynamic_rotate %928 by %c16_i32_371 dim 1 : vector<4x256xf32>, i32 -> vector<4x256xf32>
    %cst_372 = arith.constant 0.000000e+00 : f32
    %962 = vector.shape_cast %11 : vector<1x256xi1> to vector<1x256xi1>
    %963 = vector.broadcast %962 : vector<1x256xi1> to vector<4x256xi1>
    %964 = vector.broadcast %cst_372 : f32 to vector<4x256xf32>
    %965 = arith.select %963, %961, %964 : vector<4x256xi1>, vector<4x256xf32>
    %966 = vector.extract_strided_slice %965 {offsets = [0, 0], sizes = [1, 256], strides = [1, 1]} : vector<4x256xf32> to vector<1x256xf32>
    %c4_373 = arith.constant 4 : index
    %c0_374 = arith.constant 0 : index
    %c0_375 = arith.constant 0 : index
    %967 = vector.load %arg4[%c4_373, %c0_374, %c0_375] : memref<36x4x1xf32, #tpu.memory_space<vmem>>, vector<1x4x1xf32>
    %968 = vector.shape_cast %967 : vector<1x4x1xf32> to vector<4x1xf32>
    %969 = vector.broadcast %968 : vector<4x1xf32> to vector<4x256xf32>
    %970 = vector.broadcast %966 : vector<1x256xf32> to vector<4x256xf32>
    %971 = arith.mulf %969, %970 : vector<4x256xf32>
    %972 = arith.addf %960, %971 : vector<4x256xf32>
    %973 = vector.extract_strided_slice %965 {offsets = [1, 0], sizes = [1, 256], strides = [1, 1]} : vector<4x256xf32> to vector<1x256xf32>
    %c5_376 = arith.constant 5 : index
    %c0_377 = arith.constant 0 : index
    %c0_378 = arith.constant 0 : index
    %974 = vector.load %arg4[%c5_376, %c0_377, %c0_378] : memref<36x4x1xf32, #tpu.memory_space<vmem>>, vector<1x4x1xf32>
    %975 = vector.shape_cast %974 : vector<1x4x1xf32> to vector<4x1xf32>
    %976 = vector.broadcast %975 : vector<4x1xf32> to vector<4x256xf32>
    %977 = vector.broadcast %973 : vector<1x256xf32> to vector<4x256xf32>
    %978 = arith.mulf %976, %977 : vector<4x256xf32>
    %979 = arith.addf %972, %978 : vector<4x256xf32>
    %980 = vector.extract_strided_slice %965 {offsets = [2, 0], sizes = [1, 256], strides = [1, 1]} : vector<4x256xf32> to vector<1x256xf32>
    %c6_379 = arith.constant 6 : index
    %c0_380 = arith.constant 0 : index
    %c0_381 = arith.constant 0 : index
    %981 = vector.load %arg4[%c6_379, %c0_380, %c0_381] : memref<36x4x1xf32, #tpu.memory_space<vmem>>, vector<1x4x1xf32>
    %982 = vector.shape_cast %981 : vector<1x4x1xf32> to vector<4x1xf32>
    %983 = vector.broadcast %982 : vector<4x1xf32> to vector<4x256xf32>
    %984 = vector.broadcast %980 : vector<1x256xf32> to vector<4x256xf32>
    %985 = arith.mulf %983, %984 : vector<4x256xf32>
    %986 = arith.addf %979, %985 : vector<4x256xf32>
    %987 = vector.extract_strided_slice %965 {offsets = [3, 0], sizes = [1, 256], strides = [1, 1]} : vector<4x256xf32> to vector<1x256xf32>
    %c7_382 = arith.constant 7 : index
    %c0_383 = arith.constant 0 : index
    %c0_384 = arith.constant 0 : index
    %988 = vector.load %arg4[%c7_382, %c0_383, %c0_384] : memref<36x4x1xf32, #tpu.memory_space<vmem>>, vector<1x4x1xf32>
    %989 = vector.shape_cast %988 : vector<1x4x1xf32> to vector<4x1xf32>
    %990 = vector.broadcast %989 : vector<4x1xf32> to vector<4x256xf32>
    %991 = vector.broadcast %987 : vector<1x256xf32> to vector<4x256xf32>
    %992 = arith.mulf %990, %991 : vector<4x256xf32>
    %993 = arith.addf %986, %992 : vector<4x256xf32>
    %c15_i32_385 = arith.constant 15 : i32
    %994 = tpu.dynamic_rotate %928 by %c15_i32_385 dim 1 : vector<4x256xf32>, i32 -> vector<4x256xf32>
    %cst_386 = arith.constant 0.000000e+00 : f32
    %995 = vector.shape_cast %16 : vector<1x256xi1> to vector<1x256xi1>
    %996 = vector.broadcast %995 : vector<1x256xi1> to vector<4x256xi1>
    %997 = vector.broadcast %cst_386 : f32 to vector<4x256xf32>
    %998 = arith.select %996, %994, %997 : vector<4x256xi1>, vector<4x256xf32>
    %999 = vector.extract_strided_slice %998 {offsets = [0, 0], sizes = [1, 256], strides = [1, 1]} : vector<4x256xf32> to vector<1x256xf32>
    %c8_387 = arith.constant 8 : index
    %c0_388 = arith.constant 0 : index
    %c0_389 = arith.constant 0 : index
    %1000 = vector.load %arg4[%c8_387, %c0_388, %c0_389] : memref<36x4x1xf32, #tpu.memory_space<vmem>>, vector<1x4x1xf32>
    %1001 = vector.shape_cast %1000 : vector<1x4x1xf32> to vector<4x1xf32>
    %1002 = vector.broadcast %1001 : vector<4x1xf32> to vector<4x256xf32>
    %1003 = vector.broadcast %999 : vector<1x256xf32> to vector<4x256xf32>
    %1004 = arith.mulf %1002, %1003 : vector<4x256xf32>
    %1005 = arith.addf %993, %1004 : vector<4x256xf32>
    %1006 = vector.extract_strided_slice %998 {offsets = [1, 0], sizes = [1, 256], strides = [1, 1]} : vector<4x256xf32> to vector<1x256xf32>
    %c9_390 = arith.constant 9 : index
    %c0_391 = arith.constant 0 : index
    %c0_392 = arith.constant 0 : index
    %1007 = vector.load %arg4[%c9_390, %c0_391, %c0_392] : memref<36x4x1xf32, #tpu.memory_space<vmem>>, vector<1x4x1xf32>
    %1008 = vector.shape_cast %1007 : vector<1x4x1xf32> to vector<4x1xf32>
    %1009 = vector.broadcast %1008 : vector<4x1xf32> to vector<4x256xf32>
    %1010 = vector.broadcast %1006 : vector<1x256xf32> to vector<4x256xf32>
    %1011 = arith.mulf %1009, %1010 : vector<4x256xf32>
    %1012 = arith.addf %1005, %1011 : vector<4x256xf32>
    %1013 = vector.extract_strided_slice %998 {offsets = [2, 0], sizes = [1, 256], strides = [1, 1]} : vector<4x256xf32> to vector<1x256xf32>
    %c10_393 = arith.constant 10 : index
    %c0_394 = arith.constant 0 : index
    %c0_395 = arith.constant 0 : index
    %1014 = vector.load %arg4[%c10_393, %c0_394, %c0_395] : memref<36x4x1xf32, #tpu.memory_space<vmem>>, vector<1x4x1xf32>
    %1015 = vector.shape_cast %1014 : vector<1x4x1xf32> to vector<4x1xf32>
    %1016 = vector.broadcast %1015 : vector<4x1xf32> to vector<4x256xf32>
    %1017 = vector.broadcast %1013 : vector<1x256xf32> to vector<4x256xf32>
    %1018 = arith.mulf %1016, %1017 : vector<4x256xf32>
    %1019 = arith.addf %1012, %1018 : vector<4x256xf32>
    %1020 = vector.extract_strided_slice %998 {offsets = [3, 0], sizes = [1, 256], strides = [1, 1]} : vector<4x256xf32> to vector<1x256xf32>
    %c11_396 = arith.constant 11 : index
    %c0_397 = arith.constant 0 : index
    %c0_398 = arith.constant 0 : index
    %1021 = vector.load %arg4[%c11_396, %c0_397, %c0_398] : memref<36x4x1xf32, #tpu.memory_space<vmem>>, vector<1x4x1xf32>
    %1022 = vector.shape_cast %1021 : vector<1x4x1xf32> to vector<4x1xf32>
    %1023 = vector.broadcast %1022 : vector<4x1xf32> to vector<4x256xf32>
    %1024 = vector.broadcast %1020 : vector<1x256xf32> to vector<4x256xf32>
    %1025 = arith.mulf %1023, %1024 : vector<4x256xf32>
    %1026 = arith.addf %1019, %1025 : vector<4x256xf32>
    %c1_i32_399 = arith.constant 1 : i32
    %1027 = tpu.dynamic_rotate %928 by %c1_i32_399 dim 1 : vector<4x256xf32>, i32 -> vector<4x256xf32>
    %cst_400 = arith.constant 0.000000e+00 : f32
    %1028 = vector.shape_cast %18 : vector<1x256xi1> to vector<1x256xi1>
    %1029 = vector.broadcast %1028 : vector<1x256xi1> to vector<4x256xi1>
    %1030 = vector.broadcast %cst_400 : f32 to vector<4x256xf32>
    %1031 = arith.select %1029, %1027, %1030 : vector<4x256xi1>, vector<4x256xf32>
    %1032 = vector.extract_strided_slice %1031 {offsets = [0, 0], sizes = [1, 256], strides = [1, 1]} : vector<4x256xf32> to vector<1x256xf32>
    %c12_401 = arith.constant 12 : index
    %c0_402 = arith.constant 0 : index
    %c0_403 = arith.constant 0 : index
    %1033 = vector.load %arg4[%c12_401, %c0_402, %c0_403] : memref<36x4x1xf32, #tpu.memory_space<vmem>>, vector<1x4x1xf32>
    %1034 = vector.shape_cast %1033 : vector<1x4x1xf32> to vector<4x1xf32>
    %1035 = vector.broadcast %1034 : vector<4x1xf32> to vector<4x256xf32>
    %1036 = vector.broadcast %1032 : vector<1x256xf32> to vector<4x256xf32>
    %1037 = arith.mulf %1035, %1036 : vector<4x256xf32>
    %1038 = arith.addf %1026, %1037 : vector<4x256xf32>
    %1039 = vector.extract_strided_slice %1031 {offsets = [1, 0], sizes = [1, 256], strides = [1, 1]} : vector<4x256xf32> to vector<1x256xf32>
    %c13_404 = arith.constant 13 : index
    %c0_405 = arith.constant 0 : index
    %c0_406 = arith.constant 0 : index
    %1040 = vector.load %arg4[%c13_404, %c0_405, %c0_406] : memref<36x4x1xf32, #tpu.memory_space<vmem>>, vector<1x4x1xf32>
    %1041 = vector.shape_cast %1040 : vector<1x4x1xf32> to vector<4x1xf32>
    %1042 = vector.broadcast %1041 : vector<4x1xf32> to vector<4x256xf32>
    %1043 = vector.broadcast %1039 : vector<1x256xf32> to vector<4x256xf32>
    %1044 = arith.mulf %1042, %1043 : vector<4x256xf32>
    %1045 = arith.addf %1038, %1044 : vector<4x256xf32>
    %1046 = vector.extract_strided_slice %1031 {offsets = [2, 0], sizes = [1, 256], strides = [1, 1]} : vector<4x256xf32> to vector<1x256xf32>
    %c14_407 = arith.constant 14 : index
    %c0_408 = arith.constant 0 : index
    %c0_409 = arith.constant 0 : index
    %1047 = vector.load %arg4[%c14_407, %c0_408, %c0_409] : memref<36x4x1xf32, #tpu.memory_space<vmem>>, vector<1x4x1xf32>
    %1048 = vector.shape_cast %1047 : vector<1x4x1xf32> to vector<4x1xf32>
    %1049 = vector.broadcast %1048 : vector<4x1xf32> to vector<4x256xf32>
    %1050 = vector.broadcast %1046 : vector<1x256xf32> to vector<4x256xf32>
    %1051 = arith.mulf %1049, %1050 : vector<4x256xf32>
    %1052 = arith.addf %1045, %1051 : vector<4x256xf32>
    %1053 = vector.extract_strided_slice %1031 {offsets = [3, 0], sizes = [1, 256], strides = [1, 1]} : vector<4x256xf32> to vector<1x256xf32>
    %c15_410 = arith.constant 15 : index
    %c0_411 = arith.constant 0 : index
    %c0_412 = arith.constant 0 : index
    %1054 = vector.load %arg4[%c15_410, %c0_411, %c0_412] : memref<36x4x1xf32, #tpu.memory_space<vmem>>, vector<1x4x1xf32>
    %1055 = vector.shape_cast %1054 : vector<1x4x1xf32> to vector<4x1xf32>
    %1056 = vector.broadcast %1055 : vector<4x1xf32> to vector<4x256xf32>
    %1057 = vector.broadcast %1053 : vector<1x256xf32> to vector<4x256xf32>
    %1058 = arith.mulf %1056, %1057 : vector<4x256xf32>
    %1059 = arith.addf %1052, %1058 : vector<4x256xf32>
    %1060 = vector.extract_strided_slice %928 {offsets = [0, 0], sizes = [1, 256], strides = [1, 1]} : vector<4x256xf32> to vector<1x256xf32>
    %c16_413 = arith.constant 16 : index
    %c0_414 = arith.constant 0 : index
    %c0_415 = arith.constant 0 : index
    %1061 = vector.load %arg4[%c16_413, %c0_414, %c0_415] : memref<36x4x1xf32, #tpu.memory_space<vmem>>, vector<1x4x1xf32>
    %1062 = vector.shape_cast %1061 : vector<1x4x1xf32> to vector<4x1xf32>
    %1063 = vector.broadcast %1062 : vector<4x1xf32> to vector<4x256xf32>
    %1064 = vector.broadcast %1060 : vector<1x256xf32> to vector<4x256xf32>
    %1065 = arith.mulf %1063, %1064 : vector<4x256xf32>
    %1066 = arith.addf %1059, %1065 : vector<4x256xf32>
    %1067 = vector.extract_strided_slice %928 {offsets = [1, 0], sizes = [1, 256], strides = [1, 1]} : vector<4x256xf32> to vector<1x256xf32>
    %c17_416 = arith.constant 17 : index
    %c0_417 = arith.constant 0 : index
    %c0_418 = arith.constant 0 : index
    %1068 = vector.load %arg4[%c17_416, %c0_417, %c0_418] : memref<36x4x1xf32, #tpu.memory_space<vmem>>, vector<1x4x1xf32>
    %1069 = vector.shape_cast %1068 : vector<1x4x1xf32> to vector<4x1xf32>
    %1070 = vector.broadcast %1069 : vector<4x1xf32> to vector<4x256xf32>
    %1071 = vector.broadcast %1067 : vector<1x256xf32> to vector<4x256xf32>
    %1072 = arith.mulf %1070, %1071 : vector<4x256xf32>
    %1073 = arith.addf %1066, %1072 : vector<4x256xf32>
    %1074 = vector.extract_strided_slice %928 {offsets = [2, 0], sizes = [1, 256], strides = [1, 1]} : vector<4x256xf32> to vector<1x256xf32>
    %c18_419 = arith.constant 18 : index
    %c0_420 = arith.constant 0 : index
    %c0_421 = arith.constant 0 : index
    %1075 = vector.load %arg4[%c18_419, %c0_420, %c0_421] : memref<36x4x1xf32, #tpu.memory_space<vmem>>, vector<1x4x1xf32>
    %1076 = vector.shape_cast %1075 : vector<1x4x1xf32> to vector<4x1xf32>
    %1077 = vector.broadcast %1076 : vector<4x1xf32> to vector<4x256xf32>
    %1078 = vector.broadcast %1074 : vector<1x256xf32> to vector<4x256xf32>
    %1079 = arith.mulf %1077, %1078 : vector<4x256xf32>
    %1080 = arith.addf %1073, %1079 : vector<4x256xf32>
    %1081 = vector.extract_strided_slice %928 {offsets = [3, 0], sizes = [1, 256], strides = [1, 1]} : vector<4x256xf32> to vector<1x256xf32>
    %c19_422 = arith.constant 19 : index
    %c0_423 = arith.constant 0 : index
    %c0_424 = arith.constant 0 : index
    %1082 = vector.load %arg4[%c19_422, %c0_423, %c0_424] : memref<36x4x1xf32, #tpu.memory_space<vmem>>, vector<1x4x1xf32>
    %1083 = vector.shape_cast %1082 : vector<1x4x1xf32> to vector<4x1xf32>
    %1084 = vector.broadcast %1083 : vector<4x1xf32> to vector<4x256xf32>
    %1085 = vector.broadcast %1081 : vector<1x256xf32> to vector<4x256xf32>
    %1086 = arith.mulf %1084, %1085 : vector<4x256xf32>
    %1087 = arith.addf %1080, %1086 : vector<4x256xf32>
    %c255_i32_425 = arith.constant 255 : i32
    %1088 = tpu.dynamic_rotate %928 by %c255_i32_425 dim 1 : vector<4x256xf32>, i32 -> vector<4x256xf32>
    %cst_426 = arith.constant 0.000000e+00 : f32
    %1089 = vector.shape_cast %20 : vector<1x256xi1> to vector<1x256xi1>
    %1090 = vector.broadcast %1089 : vector<1x256xi1> to vector<4x256xi1>
    %1091 = vector.broadcast %cst_426 : f32 to vector<4x256xf32>
    %1092 = arith.select %1090, %1088, %1091 : vector<4x256xi1>, vector<4x256xf32>
    %1093 = vector.extract_strided_slice %1092 {offsets = [0, 0], sizes = [1, 256], strides = [1, 1]} : vector<4x256xf32> to vector<1x256xf32>
    %c20_427 = arith.constant 20 : index
    %c0_428 = arith.constant 0 : index
    %c0_429 = arith.constant 0 : index
    %1094 = vector.load %arg4[%c20_427, %c0_428, %c0_429] : memref<36x4x1xf32, #tpu.memory_space<vmem>>, vector<1x4x1xf32>
    %1095 = vector.shape_cast %1094 : vector<1x4x1xf32> to vector<4x1xf32>
    %1096 = vector.broadcast %1095 : vector<4x1xf32> to vector<4x256xf32>
    %1097 = vector.broadcast %1093 : vector<1x256xf32> to vector<4x256xf32>
    %1098 = arith.mulf %1096, %1097 : vector<4x256xf32>
    %1099 = arith.addf %1087, %1098 : vector<4x256xf32>
    %1100 = vector.extract_strided_slice %1092 {offsets = [1, 0], sizes = [1, 256], strides = [1, 1]} : vector<4x256xf32> to vector<1x256xf32>
    %c21_430 = arith.constant 21 : index
    %c0_431 = arith.constant 0 : index
    %c0_432 = arith.constant 0 : index
    %1101 = vector.load %arg4[%c21_430, %c0_431, %c0_432] : memref<36x4x1xf32, #tpu.memory_space<vmem>>, vector<1x4x1xf32>
    %1102 = vector.shape_cast %1101 : vector<1x4x1xf32> to vector<4x1xf32>
    %1103 = vector.broadcast %1102 : vector<4x1xf32> to vector<4x256xf32>
    %1104 = vector.broadcast %1100 : vector<1x256xf32> to vector<4x256xf32>
    %1105 = arith.mulf %1103, %1104 : vector<4x256xf32>
    %1106 = arith.addf %1099, %1105 : vector<4x256xf32>
    %1107 = vector.extract_strided_slice %1092 {offsets = [2, 0], sizes = [1, 256], strides = [1, 1]} : vector<4x256xf32> to vector<1x256xf32>
    %c22_433 = arith.constant 22 : index
    %c0_434 = arith.constant 0 : index
    %c0_435 = arith.constant 0 : index
    %1108 = vector.load %arg4[%c22_433, %c0_434, %c0_435] : memref<36x4x1xf32, #tpu.memory_space<vmem>>, vector<1x4x1xf32>
    %1109 = vector.shape_cast %1108 : vector<1x4x1xf32> to vector<4x1xf32>
    %1110 = vector.broadcast %1109 : vector<4x1xf32> to vector<4x256xf32>
    %1111 = vector.broadcast %1107 : vector<1x256xf32> to vector<4x256xf32>
    %1112 = arith.mulf %1110, %1111 : vector<4x256xf32>
    %1113 = arith.addf %1106, %1112 : vector<4x256xf32>
    %1114 = vector.extract_strided_slice %1092 {offsets = [3, 0], sizes = [1, 256], strides = [1, 1]} : vector<4x256xf32> to vector<1x256xf32>
    %c23_436 = arith.constant 23 : index
    %c0_437 = arith.constant 0 : index
    %c0_438 = arith.constant 0 : index
    %1115 = vector.load %arg4[%c23_436, %c0_437, %c0_438] : memref<36x4x1xf32, #tpu.memory_space<vmem>>, vector<1x4x1xf32>
    %1116 = vector.shape_cast %1115 : vector<1x4x1xf32> to vector<4x1xf32>
    %1117 = vector.broadcast %1116 : vector<4x1xf32> to vector<4x256xf32>
    %1118 = vector.broadcast %1114 : vector<1x256xf32> to vector<4x256xf32>
    %1119 = arith.mulf %1117, %1118 : vector<4x256xf32>
    %1120 = arith.addf %1113, %1119 : vector<4x256xf32>
    %c241_i32_439 = arith.constant 241 : i32
    %1121 = tpu.dynamic_rotate %928 by %c241_i32_439 dim 1 : vector<4x256xf32>, i32 -> vector<4x256xf32>
    %cst_440 = arith.constant 0.000000e+00 : f32
    %1122 = vector.shape_cast %25 : vector<1x256xi1> to vector<1x256xi1>
    %1123 = vector.broadcast %1122 : vector<1x256xi1> to vector<4x256xi1>
    %1124 = vector.broadcast %cst_440 : f32 to vector<4x256xf32>
    %1125 = arith.select %1123, %1121, %1124 : vector<4x256xi1>, vector<4x256xf32>
    %1126 = vector.extract_strided_slice %1125 {offsets = [0, 0], sizes = [1, 256], strides = [1, 1]} : vector<4x256xf32> to vector<1x256xf32>
    %c24_441 = arith.constant 24 : index
    %c0_442 = arith.constant 0 : index
    %c0_443 = arith.constant 0 : index
    %1127 = vector.load %arg4[%c24_441, %c0_442, %c0_443] : memref<36x4x1xf32, #tpu.memory_space<vmem>>, vector<1x4x1xf32>
    %1128 = vector.shape_cast %1127 : vector<1x4x1xf32> to vector<4x1xf32>
    %1129 = vector.broadcast %1128 : vector<4x1xf32> to vector<4x256xf32>
    %1130 = vector.broadcast %1126 : vector<1x256xf32> to vector<4x256xf32>
    %1131 = arith.mulf %1129, %1130 : vector<4x256xf32>
    %1132 = arith.addf %1120, %1131 : vector<4x256xf32>
    %1133 = vector.extract_strided_slice %1125 {offsets = [1, 0], sizes = [1, 256], strides = [1, 1]} : vector<4x256xf32> to vector<1x256xf32>
    %c25_444 = arith.constant 25 : index
    %c0_445 = arith.constant 0 : index
    %c0_446 = arith.constant 0 : index
    %1134 = vector.load %arg4[%c25_444, %c0_445, %c0_446] : memref<36x4x1xf32, #tpu.memory_space<vmem>>, vector<1x4x1xf32>
    %1135 = vector.shape_cast %1134 : vector<1x4x1xf32> to vector<4x1xf32>
    %1136 = vector.broadcast %1135 : vector<4x1xf32> to vector<4x256xf32>
    %1137 = vector.broadcast %1133 : vector<1x256xf32> to vector<4x256xf32>
    %1138 = arith.mulf %1136, %1137 : vector<4x256xf32>
    %1139 = arith.addf %1132, %1138 : vector<4x256xf32>
    %1140 = vector.extract_strided_slice %1125 {offsets = [2, 0], sizes = [1, 256], strides = [1, 1]} : vector<4x256xf32> to vector<1x256xf32>
    %c26_447 = arith.constant 26 : index
    %c0_448 = arith.constant 0 : index
    %c0_449 = arith.constant 0 : index
    %1141 = vector.load %arg4[%c26_447, %c0_448, %c0_449] : memref<36x4x1xf32, #tpu.memory_space<vmem>>, vector<1x4x1xf32>
    %1142 = vector.shape_cast %1141 : vector<1x4x1xf32> to vector<4x1xf32>
    %1143 = vector.broadcast %1142 : vector<4x1xf32> to vector<4x256xf32>
    %1144 = vector.broadcast %1140 : vector<1x256xf32> to vector<4x256xf32>
    %1145 = arith.mulf %1143, %1144 : vector<4x256xf32>
    %1146 = arith.addf %1139, %1145 : vector<4x256xf32>
    %1147 = vector.extract_strided_slice %1125 {offsets = [3, 0], sizes = [1, 256], strides = [1, 1]} : vector<4x256xf32> to vector<1x256xf32>
    %c27_450 = arith.constant 27 : index
    %c0_451 = arith.constant 0 : index
    %c0_452 = arith.constant 0 : index
    %1148 = vector.load %arg4[%c27_450, %c0_451, %c0_452] : memref<36x4x1xf32, #tpu.memory_space<vmem>>, vector<1x4x1xf32>
    %1149 = vector.shape_cast %1148 : vector<1x4x1xf32> to vector<4x1xf32>
    %1150 = vector.broadcast %1149 : vector<4x1xf32> to vector<4x256xf32>
    %1151 = vector.broadcast %1147 : vector<1x256xf32> to vector<4x256xf32>
    %1152 = arith.mulf %1150, %1151 : vector<4x256xf32>
    %1153 = arith.addf %1146, %1152 : vector<4x256xf32>
    %c240_i32_453 = arith.constant 240 : i32
    %1154 = tpu.dynamic_rotate %928 by %c240_i32_453 dim 1 : vector<4x256xf32>, i32 -> vector<4x256xf32>
    %cst_454 = arith.constant 0.000000e+00 : f32
    %1155 = vector.shape_cast %27 : vector<1x256xi1> to vector<1x256xi1>
    %1156 = vector.broadcast %1155 : vector<1x256xi1> to vector<4x256xi1>
    %1157 = vector.broadcast %cst_454 : f32 to vector<4x256xf32>
    %1158 = arith.select %1156, %1154, %1157 : vector<4x256xi1>, vector<4x256xf32>
    %1159 = vector.extract_strided_slice %1158 {offsets = [0, 0], sizes = [1, 256], strides = [1, 1]} : vector<4x256xf32> to vector<1x256xf32>
    %c28_455 = arith.constant 28 : index
    %c0_456 = arith.constant 0 : index
    %c0_457 = arith.constant 0 : index
    %1160 = vector.load %arg4[%c28_455, %c0_456, %c0_457] : memref<36x4x1xf32, #tpu.memory_space<vmem>>, vector<1x4x1xf32>
    %1161 = vector.shape_cast %1160 : vector<1x4x1xf32> to vector<4x1xf32>
    %1162 = vector.broadcast %1161 : vector<4x1xf32> to vector<4x256xf32>
    %1163 = vector.broadcast %1159 : vector<1x256xf32> to vector<4x256xf32>
    %1164 = arith.mulf %1162, %1163 : vector<4x256xf32>
    %1165 = arith.addf %1153, %1164 : vector<4x256xf32>
    %1166 = vector.extract_strided_slice %1158 {offsets = [1, 0], sizes = [1, 256], strides = [1, 1]} : vector<4x256xf32> to vector<1x256xf32>
    %c29_458 = arith.constant 29 : index
    %c0_459 = arith.constant 0 : index
    %c0_460 = arith.constant 0 : index
    %1167 = vector.load %arg4[%c29_458, %c0_459, %c0_460] : memref<36x4x1xf32, #tpu.memory_space<vmem>>, vector<1x4x1xf32>
    %1168 = vector.shape_cast %1167 : vector<1x4x1xf32> to vector<4x1xf32>
    %1169 = vector.broadcast %1168 : vector<4x1xf32> to vector<4x256xf32>
    %1170 = vector.broadcast %1166 : vector<1x256xf32> to vector<4x256xf32>
    %1171 = arith.mulf %1169, %1170 : vector<4x256xf32>
    %1172 = arith.addf %1165, %1171 : vector<4x256xf32>
    %1173 = vector.extract_strided_slice %1158 {offsets = [2, 0], sizes = [1, 256], strides = [1, 1]} : vector<4x256xf32> to vector<1x256xf32>
    %c30_461 = arith.constant 30 : index
    %c0_462 = arith.constant 0 : index
    %c0_463 = arith.constant 0 : index
    %1174 = vector.load %arg4[%c30_461, %c0_462, %c0_463] : memref<36x4x1xf32, #tpu.memory_space<vmem>>, vector<1x4x1xf32>
    %1175 = vector.shape_cast %1174 : vector<1x4x1xf32> to vector<4x1xf32>
    %1176 = vector.broadcast %1175 : vector<4x1xf32> to vector<4x256xf32>
    %1177 = vector.broadcast %1173 : vector<1x256xf32> to vector<4x256xf32>
    %1178 = arith.mulf %1176, %1177 : vector<4x256xf32>
    %1179 = arith.addf %1172, %1178 : vector<4x256xf32>
    %1180 = vector.extract_strided_slice %1158 {offsets = [3, 0], sizes = [1, 256], strides = [1, 1]} : vector<4x256xf32> to vector<1x256xf32>
    %c31_464 = arith.constant 31 : index
    %c0_465 = arith.constant 0 : index
    %c0_466 = arith.constant 0 : index
    %1181 = vector.load %arg4[%c31_464, %c0_465, %c0_466] : memref<36x4x1xf32, #tpu.memory_space<vmem>>, vector<1x4x1xf32>
    %1182 = vector.shape_cast %1181 : vector<1x4x1xf32> to vector<4x1xf32>
    %1183 = vector.broadcast %1182 : vector<4x1xf32> to vector<4x256xf32>
    %1184 = vector.broadcast %1180 : vector<1x256xf32> to vector<4x256xf32>
    %1185 = arith.mulf %1183, %1184 : vector<4x256xf32>
    %1186 = arith.addf %1179, %1185 : vector<4x256xf32>
    %c239_i32_467 = arith.constant 239 : i32
    %1187 = tpu.dynamic_rotate %928 by %c239_i32_467 dim 1 : vector<4x256xf32>, i32 -> vector<4x256xf32>
    %cst_468 = arith.constant 0.000000e+00 : f32
    %1188 = vector.shape_cast %32 : vector<1x256xi1> to vector<1x256xi1>
    %1189 = vector.broadcast %1188 : vector<1x256xi1> to vector<4x256xi1>
    %1190 = vector.broadcast %cst_468 : f32 to vector<4x256xf32>
    %1191 = arith.select %1189, %1187, %1190 : vector<4x256xi1>, vector<4x256xf32>
    %1192 = vector.extract_strided_slice %1191 {offsets = [0, 0], sizes = [1, 256], strides = [1, 1]} : vector<4x256xf32> to vector<1x256xf32>
    %c32_469 = arith.constant 32 : index
    %c0_470 = arith.constant 0 : index
    %c0_471 = arith.constant 0 : index
    %1193 = vector.load %arg4[%c32_469, %c0_470, %c0_471] : memref<36x4x1xf32, #tpu.memory_space<vmem>>, vector<1x4x1xf32>
    %1194 = vector.shape_cast %1193 : vector<1x4x1xf32> to vector<4x1xf32>
    %1195 = vector.broadcast %1194 : vector<4x1xf32> to vector<4x256xf32>
    %1196 = vector.broadcast %1192 : vector<1x256xf32> to vector<4x256xf32>
    %1197 = arith.mulf %1195, %1196 : vector<4x256xf32>
    %1198 = arith.addf %1186, %1197 : vector<4x256xf32>
    %1199 = vector.extract_strided_slice %1191 {offsets = [1, 0], sizes = [1, 256], strides = [1, 1]} : vector<4x256xf32> to vector<1x256xf32>
    %c33_472 = arith.constant 33 : index
    %c0_473 = arith.constant 0 : index
    %c0_474 = arith.constant 0 : index
    %1200 = vector.load %arg4[%c33_472, %c0_473, %c0_474] : memref<36x4x1xf32, #tpu.memory_space<vmem>>, vector<1x4x1xf32>
    %1201 = vector.shape_cast %1200 : vector<1x4x1xf32> to vector<4x1xf32>
    %1202 = vector.broadcast %1201 : vector<4x1xf32> to vector<4x256xf32>
    %1203 = vector.broadcast %1199 : vector<1x256xf32> to vector<4x256xf32>
    %1204 = arith.mulf %1202, %1203 : vector<4x256xf32>
    %1205 = arith.addf %1198, %1204 : vector<4x256xf32>
    %1206 = vector.extract_strided_slice %1191 {offsets = [2, 0], sizes = [1, 256], strides = [1, 1]} : vector<4x256xf32> to vector<1x256xf32>
    %c34_475 = arith.constant 34 : index
    %c0_476 = arith.constant 0 : index
    %c0_477 = arith.constant 0 : index
    %1207 = vector.load %arg4[%c34_475, %c0_476, %c0_477] : memref<36x4x1xf32, #tpu.memory_space<vmem>>, vector<1x4x1xf32>
    %1208 = vector.shape_cast %1207 : vector<1x4x1xf32> to vector<4x1xf32>
    %1209 = vector.broadcast %1208 : vector<4x1xf32> to vector<4x256xf32>
    %1210 = vector.broadcast %1206 : vector<1x256xf32> to vector<4x256xf32>
    %1211 = arith.mulf %1209, %1210 : vector<4x256xf32>
    %1212 = arith.addf %1205, %1211 : vector<4x256xf32>
    %1213 = vector.extract_strided_slice %1191 {offsets = [3, 0], sizes = [1, 256], strides = [1, 1]} : vector<4x256xf32> to vector<1x256xf32>
    %c35_478 = arith.constant 35 : index
    %c0_479 = arith.constant 0 : index
    %c0_480 = arith.constant 0 : index
    %1214 = vector.load %arg4[%c35_478, %c0_479, %c0_480] : memref<36x4x1xf32, #tpu.memory_space<vmem>>, vector<1x4x1xf32>
    %1215 = vector.shape_cast %1214 : vector<1x4x1xf32> to vector<4x1xf32>
    %1216 = vector.broadcast %1215 : vector<4x1xf32> to vector<4x256xf32>
    %1217 = vector.broadcast %1213 : vector<1x256xf32> to vector<4x256xf32>
    %1218 = arith.mulf %1216, %1217 : vector<4x256xf32>
    %1219 = arith.addf %1212, %1218 : vector<4x256xf32>
    %c0_481 = arith.constant 0 : index
    %c0_482 = arith.constant 0 : index
    %1220 = vector.load %arg5[%c0_481, %c0_482] : memref<4x1xf32, #tpu.memory_space<vmem>>, vector<4x1xf32>
    %1221 = vector.broadcast %1220 : vector<4x1xf32> to vector<4x256xf32>
    %1222 = arith.addf %1219, %1221 : vector<4x256xf32>
    %1223 = arith.addf %631, %1222 : vector<4x256xf32>
    %c1_483 = arith.constant 1 : index
    %c0_484 = arith.constant 0 : index
    %c0_485 = arith.constant 0 : index
    %1224 = vector.load %arg6[%c1_483, %c0_484, %c0_485] : memref<2x4x256xf32, #tpu.memory_space<vmem>>, vector<1x4x256xf32>
    %1225 = vector.shape_cast %1224 : vector<1x4x256xf32> to vector<4x256xf32>
    %1226 = vector.shape_cast %1223 : vector<4x256xf32> to vector<1x4x256xf32>
    tpu.vector_store %arg6[%c1_483, %c0_484, %c0_485], %1226 {strides = array<i32>} : memref<2x4x256xf32, #tpu.memory_space<vmem>>, vector<1x4x256xf32>,
    return
  }
  func.func @transform_0(%arg0: i32) -> (i32, i32, i32) {
    %c0_i32 = arith.constant 0 : i32
    %c0_i32_0 = arith.constant 0 : i32
    %c0_i32_1 = arith.constant 0 : i32
    return %arg0, %c0_i32, %c0_i32_0 : i32, i32, i32
  }
  func.func @transform_1(%arg0: i32) -> (i32, i32, i32) {
    %c0_i32 = arith.constant 0 : i32
    %c0_i32_0 = arith.constant 0 : i32
    %c0_i32_1 = arith.constant 0 : i32
    %c0_i32_2 = arith.constant 0 : i32
    return %c0_i32, %c0_i32_0, %c0_i32_1 : i32, i32, i32
  }
  func.func @transform_2(%arg0: i32) -> (i32, i32) {
    %c0_i32 = arith.constant 0 : i32
    %c0_i32_0 = arith.constant 0 : i32
    %c0_i32_1 = arith.constant 0 : i32
    return %c0_i32, %c0_i32_0 : i32, i32
  }
  func.func @transform_3(%arg0: i32) -> (i32, i32, i32) {
    %c0_i32 = arith.constant 0 : i32
    %c0_i32_0 = arith.constant 0 : i32
    %c0_i32_1 = arith.constant 0 : i32
    %c0_i32_2 = arith.constant 0 : i32
    return %c0_i32, %c0_i32_0, %c0_i32_1 : i32, i32, i32
  }
  func.func @transform_4(%arg0: i32) -> (i32, i32) {
    %c0_i32 = arith.constant 0 : i32
    %c0_i32_0 = arith.constant 0 : i32
    %c0_i32_1 = arith.constant 0 : i32
    return %c0_i32, %c0_i32_0 : i32, i32
  }
  func.func @transform_5(%arg0: i32) -> (i32, i32, i32) {
    %c0_i32 = arith.constant 0 : i32
    %c0_i32_0 = arith.constant 0 : i32
    %c0_i32_1 = arith.constant 0 : i32
    return %arg0, %c0_i32, %c0_i32_0 : i32, i32, i32
  }
}

</mosaic_0001>

<bundles_post_ra>
// kernel: tpu_custom_call.1
= control target key start
LH: loop header
LB: loop body
LE: loop exit
PB: predicated region body
PF: predicated region fallthrough
CT: control target
= control target key end

     0   :  { %v2503_v3 = vmov 0   ;;  %s3840_s0 = inlined_call_operand.vmem [shape: f32[2,4,256], index: 0, kind: input, shape index: {}]   ;;  %s3841_s1 = inlined_call_operand.vmem [shape: f32[36,4,1], index: 1, kind: input, shape index: {}]   ;;  %s3842_s2 = inlined_call_operand.vmem [shape: f32[4,1], index: 2, kind: input, shape index: {}]   ;;  %s3843_s3 = inlined_call_operand.vmem [shape: f32[36,4,1], index: 3, kind: input, shape index: {}]   ;;  %s3844_s4 = inlined_call_operand.vmem [shape: f32[4,1], index: 4, kind: input, shape index: {}]   ;;  %s3845_s5 = inlined_call_operand.hbm [shape: f32[2,4,256], index: 5, kind: output, shape index: {}]  }
   0x1   :  { %v2322_v0 = vld [vmem:[%s3841_s1 + $0x8] sm:$0xf]  ;;  %v64_v1 = vld [vmem:[%s3841_s1] sm:$0xf]  ;;  %2475 = vset.pattern.permute.xlu2 %v2503_v3  ;;  %2474 = vset.pattern.permute.xlu1 %v2503_v3 }
   0x2   :  { %v2554_v2 = vld [vmem:[%s3840_s0] sm:$0xff]  ;;  %91 = vperm.xlu2 %2475, %v2322_v0   ;;  %67 = vperm.xlu1 %2474, %v64_v1  }
   0x3   :  { %3876 = vst [vmem:[#allocation5_spill] sm:$0xff] %v2554_v2  ;;  %2476 = vset.pattern.permute.xlu0 %v2503_v3 }
   0x4   :  { %46 = vst [vmem:[#allocation1] ss:$2 sm:$0xff] %v2554_v2 }
   0x5   :  { %10 = vsyncpa [#allocation3], 0  ;;  %v2323_v4 = vld [vmem:[%s3841_s1 + $0xc] sm:$0xf]  ;;  %v2321_v5 = vld [vmem:[%s3841_s1 + $0x4] sm:$0xf]  ;;  %v21_v49 = vlaneseq }
   0x6   :  { %s2504_s28 = smov 17   ;;  %v2324_v8 = vld [vmem:[%s3841_s1 + $0x10] sm:$0xf]  ;;  %s2505_s6 = smov 16   ;;  %v2327_v11 = vld [vmem:[%s3841_s1 + $0x1c] sm:$0xf] }
   0x7   :  { %v2326_v12 = vld [vmem:[%s3841_s1 + $0x18] sm:$0xf]  ;;  %v2325_v15 = vld [vmem:[%s3841_s1 + $0x14] sm:$0xf]  ;;  %s2506_s13 = smov 15   ;;  %s2507_s22 = smov 1  }
   0x8   :  { %v2328_v18 = vld [vmem:[%s3841_s1 + $0x20] sm:$0xf]  ;;  %v2330_v19 = vld [vmem:[%s3841_s1 + $0x28] sm:$0xf]  ;;  %v2329_v20 = vld [vmem:[%s3841_s1 + $0x24] sm:$0xf] }
   0x9   :  { %v2331_v23 = vld [vmem:[%s3841_s1 + $0x2c] sm:$0xf]  ;;  %v2332_v24 = vld [vmem:[%s3841_s1 + $0x30] sm:$0xf]  ;;  %v2334_v25 = vld [vmem:[%s3841_s1 + $0x38] sm:$0xf] }
   0xa   :  { %104 = vperm.xlu2 %2475, %v2323_v4   ;;  %78 = vperm.xlu1 %2474, %v2321_v5   ;;  %v2333_v26 = vld [vmem:[%s3841_s1 + $0x34] sm:$0xf]  ;;  %v2335_v29 = vld [vmem:[%s3841_s1 + $0x3c] sm:$0xf]  ;;  %v2337_v30 = vld [vmem:[%s3841_s1 + $0x44] sm:$0xf] }
   0xb   :  { %v47_v6 = vld.sshfl [vmem:[#allocation1] sm:$0xff pattern:$0x75316420]  ;;  %v48_v7 = vld.sshfl [vmem:[#allocation1 + $0x8] sm:$0xff pattern:$0x75316420] }
   0xc   :  { %51 = vrot.lane.b32.xlu0 %v47_v6, %s2504_s28  ;;  %113 = vst [vmem:[#allocation1] ss:$2 sm:$0xff] %v2554_v2  ;;  %v2336_v31 = vld [vmem:[%s3841_s1 + $0x40] sm:$0xf]  ;;  %v2338_v32 = vld [vmem:[%s3841_s1 + $0x48] sm:$0xf] }
   0xd   :  { %v2339_v33 = vld [vmem:[%s3841_s1 + $0x4c] sm:$0xf]  ;;  %s2508_s17 = smov 127   ;;  %v2340_v36 = vld [vmem:[%s3841_s1 + $0x50] sm:$0xf]  ;;  %s2509_s27 = smov 113  }
   0xe   :  { %v2341_v37 = vld [vmem:[%s3841_s1 + $0x54] sm:$0xf]  ;;  %v2342_v38 = vld [vmem:[%s3841_s1 + $0x58] sm:$0xf]  ;;  %v2343_v39 = vld [vmem:[%s3841_s1 + $0x5c] sm:$0xf] }
   0xf   :  { %v2344_v41 = vld [vmem:[%s3841_s1 + $0x60] sm:$0xf]  ;;  %v2345_v42 = vld [vmem:[%s3841_s1 + $0x64] sm:$0xf]  ;;  %v2346_v44 = vld [vmem:[%s3841_s1 + $0x68] sm:$0xf] }
  0x10   :  { %v2347_v45 = vld [vmem:[%s3841_s1 + $0x6c] sm:$0xf]  ;;  %s2510_s14 = smov 112   ;;  %v2348_v47 = vld [vmem:[%s3841_s1 + $0x70] sm:$0xf]  ;;  %v2670_v52 = vand.u32 127, %v21_v49 }
  0x11   :  { %v2349_v48 = vld [vmem:[%s3841_s1 + $0x74] sm:$0xf]  ;;  %v2350_v53 = vld [vmem:[%s3841_s1 + $0x78] sm:$0xf]  ;;  %v2351_v54 = vld [vmem:[%s3841_s1 + $0x7c] sm:$0xf] }
  0x12   :  { %135 = vperm.xlu2 %2475, %v2324_v8   ;;  %v2679_v56 = vadd.s32 128, %v2670_v52  ;;  %s2511_s25 = smov 111   ;;  %v24_v59 = vshra.s32 %v2670_v52, 4  ;;  %v26_v60 = vand.u32 15, %v2670_v52  ;;  %v2352_v1 = vld [vmem:[%s3841_s1 + $0x80] sm:$0xf] }
  0x13   :  { %v115_v9 = vld.sshfl [vmem:[#allocation1 + $0x8] sm:$0xff pattern:$0x75316420]  ;;  %v114_v10 = vld.sshfl [vmem:[#allocation1] sm:$0xff pattern:$0x75316420] }
  0x14   :  { %53 = vrot.lane.b32.xlu0 %v48_v7, %s2504_s28  ;;  %183 = vst [vmem:[#allocation1] ss:$2 sm:$0xff] %v2554_v2  ;;  %120 = vrot.lane.b32.xlu1 %v115_v9, %s2505_s6  ;;  %v25_v61 = vshra.s32 %v2679_v56, 4  ;;  %v27_v62 = vand.u32 15, %v2679_v56  ;;  %v2353_v3 = vld [vmem:[%s3841_s1 + $0x84] sm:$0xf] }
  0x15   :  { %vm2696_vm0 = vcmp.ge.s32.totalorder %v24_v59, 1  ;;  %v3877_v4 = vmov 0  ;;  %vm2702_vm1 = vcmp.ge.s32.totalorder %v26_v60, 1  ;;  %v3882_v6 = vmov 0  ;;  %s2513_s7 = smov 128   ;;  %s2514_s8 = smov 8  }
  0x16   :  { %v3878_v4 = vsel %vm2696_vm0, 4294967295, %v3877_v4  ;;  %vm2709_vm2 = vcmp.ge.s32.totalorder %v25_v61, 1  ;;  %vm2715_vm3 = vcmp.ge.s32.totalorder %v27_v62, 1  ;;  %v3885_v7 = vmov 0  ;;  %vm2724_vm5 = vmand %vm2696_vm0, %vm2702_vm1 }
  0x17   :  { %3879 = vst [vmem:[#allocation6_spill] sm:$0xff] %v3878_v4  ;;  %v3883_v6 = vsel %vm2709_vm2, 4294967295, %v3882_v6  ;;  %v3886_v7 = vsel %vm2715_vm3, 4294967295, %v3885_v7  ;;  %vm3852_vm4 = vcmp.lt.s32.totalorder %v2670_v52, 17  ;;  %v3887_v9 = vmov 0  ;;  %vm2732_vm6 = vmand %vm2709_vm2, %vm2715_vm3 }
  0x18   :  { %3884 = vst [vmem:[#allocation7_spill] sm:$0xff] %v3883_v6  ;;  %v3888_v9 = vsel %vm2724_vm5, 4294967295, %v3887_v9  ;;  %vm3849_vm7 = vcmp.lt.s32.totalorder %v2670_v52, 16  ;;  %vm2798_vm8 = vcmp.lt.s32.totalorder %v26_v60, 15  ;;  %vm2808_vm9 = vcmp.lt.s32.totalorder %v27_v62, 15 }
  0x19   :  { %3889 = vst [vmem:[#allocation8_spill] sm:$0xff] %v3888_v9  ;;  %vm3848_vm10 = vcmp.lt.s32.totalorder %v2670_v52, 15  ;;  %vm2819_vm11 = vmand %vm2696_vm0, %vm2798_vm8  ;;  %vm3847_vm13 = vcmp.lt.s32.totalorder %v2670_v52, 1  ;;  %vm3846_vm14 = vcmp.lt.s32.totalorder %v2670_v52, 127  ;;  %vm2929_vm15 = vcmp.lt.s32.totalorder %v24_v59, 15 }
  0x1a   :  { %174 = vperm.xlu2 %2475, %v2327_v11   ;;  %vm2827_vm12 = vmand %vm2709_vm2, %vm2808_vm9 }
  0x1b   :  { %v185_v13 = vld.sshfl [vmem:[#allocation1 + $0x8] sm:$0xff pattern:$0x75316420]  ;;  %v184_v14 = vld.sshfl [vmem:[#allocation1] sm:$0xff pattern:$0x75316420] }
  0x1c   :  { %118 = vrot.lane.b32.xlu0 %v114_v10, %s2505_s6  ;;  %253 = vst [vmem:[#allocation1] ss:$2 sm:$0xff] %v2554_v2  ;;  %161 = vperm.xlu1 %2474, %v2326_v12   ;;  %v3890_v10 = vmov 0 }
  0x1d   :  { %v3891_v10 = vsel %vm2732_vm6, 4294967295, %v3890_v10 }
  0x1e   :  { %3892 = vst [vmem:[#allocation9_spill] sm:$0xff] %v3891_v10 }
  0x22   :  { %190 = vrot.lane.b32.xlu2 %v185_v13, %s2506_s13 }
  0x23   :  { %v255_v16 = vld.sshfl [vmem:[#allocation1 + $0x8] sm:$0xff pattern:$0x75316420]  ;;  %v254_v17 = vld.sshfl [vmem:[#allocation1] sm:$0xff pattern:$0x75316420] }
  0x24   :  { %148 = vperm.xlu0 %2476, %v2325_v15   ;;  %391 = vst [vmem:[#allocation1] ss:$2 sm:$0xff] %v2554_v2  ;;  %188 = vrot.lane.b32.xlu1 %v184_v14, %s2506_s13  ;;  %v2354_v14 = vld [vmem:[%s3841_s1 + $0x88] sm:$0xf] }
  0x2a   :  { %231 = vperm.xlu2 %2475, %v2330_v19  }
  0x2b   :  { %v392_v21 = vld.sshfl [vmem:[#allocation1] sm:$0xff pattern:$0x75316420]  ;;  %v393_v22 = vld.sshfl [vmem:[#allocation1 + $0x8] sm:$0xff pattern:$0x75316420] }
  0x2c   :  { %205 = vperm.xlu0 %2476, %v2328_v18   ;;  %218 = vperm.xlu1 %2474, %v2329_v20   ;;  %461 = vst [vmem:[#allocation1] ss:$2 sm:$0xff] %v2554_v2  ;;  %v671_v18 = vld [vmem:[%s3842_s2] sm:$0xf] }
  0x32   :  { %260 = vrot.lane.b32.xlu2 %v255_v16, %s2507_s22 }
  0x33   :  { %v462_v27 = vld.sshfl [vmem:[#allocation1] sm:$0xff pattern:$0x75316420]  ;;  %v463_v28 = vld.sshfl [vmem:[#allocation1 + $0x8] sm:$0xff pattern:$0x75316420] }
  0x34   :  { %244 = vperm.xlu0 %2476, %v2331_v23   ;;  %258 = vrot.lane.b32.xlu1 %v254_v17, %s2507_s22  ;;  %531 = vst [vmem:[#allocation1] ss:$2 sm:$0xff] %v2554_v2  ;;  %v2355_v17 = vld [vmem:[%s3841_s1 + $0x8c] sm:$0xf] }
  0x3a   :  { %301 = vperm.xlu2 %2475, %v2334_v25  }
  0x3b   :  { %v532_v34 = vld.sshfl [vmem:[#allocation1] sm:$0xff pattern:$0x75316420]  ;;  %v533_v35 = vld.sshfl [vmem:[#allocation1 + $0x8] sm:$0xff pattern:$0x75316420] }
  0x3c   :  { %275 = vperm.xlu0 %2476, %v2332_v24   ;;  %288 = vperm.xlu1 %2474, %v2333_v26   ;;  %601 = vst [vmem:[#allocation1] ss:$2 sm:$0xff] %v2554_v2 }
  0x42   :  { %344 = vperm.xlu2 %2475, %v2337_v30  }
  0x43   :  { %v602_v55 = vld.sshfl [vmem:[#allocation1] sm:$0xff pattern:$0x75316420]  ;;  %v603_v63 = vld.sshfl [vmem:[#allocation1 + $0x8] sm:$0xff pattern:$0x75316420] }
  0x44   :  { %314 = vperm.xlu0 %2476, %v2335_v29   ;;  %327 = vperm.xlu1 %2474, %v2336_v31  }
  0x4a   :  { %396 = vrot.lane.b32.xlu2 %v392_v21, %s2508_s17 }
  0x4c   :  { %361 = vperm.xlu0 %2476, %v2338_v32   ;;  %378 = vperm.xlu1 %2474, %v2339_v33   ;;  %v2357_v33 = vld [vmem:[%s3843_s3 + $0x8] sm:$0xf] }
  0x52   :  { %426 = vperm.xlu2 %2475, %v2341_v37  }
  0x54   :  { %398 = vrot.lane.b32.xlu0 %v393_v22, %s2508_s17  ;;  %413 = vperm.xlu1 %2474, %v2340_v36  }
  0x5a   :  { %466 = vrot.lane.b32.xlu2 %v462_v27, %s2509_s27 }
  0x5c   :  { %439 = vperm.xlu0 %2476, %v2342_v38   ;;  %452 = vperm.xlu1 %2474, %v2343_v39   ;;  %v2641_v40 = vpop.permute.xlu2 %91 }
  0x62   :  { %496 = vperm.xlu2 %2475, %v2345_v42  }
  0x64   :  { %468 = vrot.lane.b32.xlu0 %v463_v28, %s2509_s27  ;;  %483 = vperm.xlu1 %2474, %v2344_v41   ;;  %v2650_v43 = vpop.permute.xlu2 %104  ;;  %v2356_v28 = vld [vmem:[%s3843_s3 + $0x4] sm:$0xf] }
  0x6a   :  { %536 = vrot.lane.b32.xlu2 %v532_v34, %s2510_s14  ;;  %v691_v34 = vld [vmem:[%s3843_s3] sm:$0xf] }
  0x6c   :  { %509 = vperm.xlu0 %2476, %v2346_v44   ;;  %522 = vperm.xlu1 %2474, %v2347_v45   ;;  %v2659_v46 = vpop.permute.xlu2 %135 }
  0x72   :  { %566 = vperm.xlu2 %2475, %v2349_v48  }
  0x74   :  { %538 = vrot.lane.b32.xlu0 %v533_v35, %s2510_s14  ;;  %553 = vperm.xlu1 %2474, %v2348_v47   ;;  %v68_v50 = vpop.permute.xlu1 %67  ;;  %v2668_v51 = vpop.permute.xlu2 %174 }
  0x7a   :  { %606 = vrot.lane.b32.xlu2 %v602_v55, %s2511_s25  ;;  %v2360_v55 = vld [vmem:[%s3843_s3 + $0x14] sm:$0xf] }
  0x7c   :  { %579 = vperm.xlu0 %2476, %v2350_v53   ;;  %592 = vperm.xlu1 %2474, %v2351_v54   ;;  %v79_v58 = vpop.permute.xlu1 %78  ;;  %v2686_v0 = vpop.permute.xlu2 %190 }
  0x7e   :  { %v52_v57 = vpop.permute.xlu0 %51 }
  0x82   :  { %636 = vperm.xlu2 %2475, %v2353_v3  }
  0x84   :  { %608 = vrot.lane.b32.xlu0 %v603_v63, %s2511_s25  ;;  %623 = vperm.xlu1 %2474, %v2352_v1   ;;  %v2753_v19 = vpop.permute.xlu2 %231  ;;  %v2361_v63 = vld [vmem:[%s3843_s3 + $0x18] sm:$0xf]  ;;  %v2358_v1 = vld [vmem:[%s3843_s3 + $0xc] sm:$0xf] }
  0x86   :  { %v54_v8 = vpop.permute.xlu0 %53  ;;  %v121_v13 = vpop.permute.xlu1 %120 }
  0x87   :  { %v56_v11 = vsel %vm3852_vm4, %v52_v57, %v54_v8  ;;  %v57_v12 = vsel %vm3852_vm4, %v54_v8, %v52_v57  ;;  %vm3855_vm4 = vcmp.lt.s32.totalorder %v2670_v52, 111 }
  0x88   :  { %v62_v15 = vsel %vm2724_vm5, %v57_v12, 0.0  ;;  %v63_v16 = vsel %vm2732_vm6, %v56_v11, 0.0 }
  0x89   :  { %v70_v20 = vperm.slane %v62_v15, 0  ;;  %v71_v21 = vperm.slane %v63_v16, 0  ;;  %v81_v22 = vperm.slane %v62_v15, 1  ;;  %v82_v23 = vperm.slane %v63_v16, 1 }
  0x8a   :  { %674 = vperm.xlu2 %2475, %v671_v18   ;;  %v94_v35 = vperm.slane %v62_v15, 2  ;;  %v95_v36 = vperm.slane %v63_v16, 2  ;;  %v107_v45 = vperm.slane %v62_v15, 3  ;;  %v108_v47 = vperm.slane %v63_v16, 3 }
  0x8b   :  { %v72_v26 = vmul.f32 %v70_v20, %v68_v50  ;;  %v73_v27 = vmul.f32 %v71_v21, %v68_v50  ;;  %v83_v29 = vmul.f32 %v81_v22, %v79_v58  ;;  %v84_v30 = vmul.f32 %v82_v23, %v79_v58 }
  0x8c   :  { %649 = vperm.xlu0 %2476, %v2354_v14   ;;  %662 = vperm.xlu1 %2474, %v2355_v17   ;;  %v2779_v42 = vpop.permute.xlu2 %260  ;;  %v96_v49 = vmul.f32 %v94_v35, %v2641_v40  ;;  %v97_v50 = vmul.f32 %v95_v36, %v2641_v40  ;;  %v109_v40 = vmul.f32 %v107_v45, %v2650_v43  ;;  %v3895_v15 = vmov 0 }
  0x8d   :  { %v85_v39 = vadd.f32 %v83_v29, %v72_v26  ;;  %v86_v41 = vadd.f32 %v84_v30, %v73_v27  ;;  %v110_v3 = vmul.f32 %v108_v47, %v2650_v43  ;;  %v3896_v15 = vsel %vm2808_vm9, 4294967295, %v3895_v15  ;;  %v2364_v29 = vld [vmem:[%s3843_s3 + $0x24] sm:$0xf] }
  0x8e   :  { %v119_v24 = vpop.permute.xlu0 %118  ;;  %v2756_v25 = vpop.permute.xlu1 %161 }
  0x8f   :  { %v123_v31 = vsel %vm3849_vm7, %v119_v24, %v121_v13  ;;  %v124_v32 = vsel %vm3849_vm7, %v121_v13, %v119_v24  ;;  %v98_v57 = vadd.f32 %v96_v49, %v85_v39  ;;  %v99_v58 = vadd.f32 %v97_v50, %v86_v41 }
  0x90   :  { %v2773_v37 = vsel %vm2696_vm0, %v124_v32, 0.0  ;;  %v2777_v38 = vsel %vm2709_vm2, %v123_v31, 0.0  ;;  %v2365_v32 = vld [vmem:[%s3843_s3 + $0x28] sm:$0xf] }
  0x91   :  { %v138_v53 = vperm.slane %v2773_v37, 0  ;;  %v139_v54 = vperm.slane %v2777_v38, 0  ;;  %v151_v13 = vperm.slane %v2773_v37, 1  ;;  %v152_v14 = vperm.slane %v2777_v38, 1 }
  0x92   :  { %694 = vperm.xlu2 %2475, %v691_v34   ;;  %v111_v43 = vadd.f32 %v109_v40, %v98_v57  ;;  %v112_v60 = vadd.f32 %v110_v3, %v99_v58  ;;  %v164_v18 = vperm.slane %v2773_v37, 2  ;;  %v165_v20 = vperm.slane %v2777_v38, 2  ;;  %v2369_v40 = vld [vmem:[%s3843_s3 + $0x38] sm:$0xf] }
  0x93   :  { %v140_v11 = vmul.f32 %v138_v53, %v2659_v46  ;;  %v141_v12 = vmul.f32 %v139_v54, %v2659_v46  ;;  %v177_v35 = vperm.slane %v2773_v37, 3  ;;  %v178_v36 = vperm.slane %v2777_v38, 3 }
  0x94   :  { %705 = vperm.xlu0 %2476, %v2356_v28   ;;  %718 = vperm.xlu1 %2474, %v2357_v33   ;;  %v2837_v28 = vpop.permute.xlu2 %301  ;;  %v2359_v33 = vld [vmem:[%s3843_s3 + $0x10] sm:$0xf]  ;;  %v166_v39 = vmul.f32 %v164_v18, %v2756_v25  ;;  %v167_v41 = vmul.f32 %v165_v20, %v2756_v25  ;;  %v2368_v25 = vld [vmem:[%s3843_s3 + $0x34] sm:$0xf] }
  0x95   :  { %v142_v22 = vadd.f32 %v140_v11, %v111_v43  ;;  %v143_v23 = vadd.f32 %v141_v12, %v112_v60  ;;  %v179_v53 = vmul.f32 %v177_v35, %v2668_v51  ;;  %v180_v54 = vmul.f32 %v178_v36, %v2668_v51  ;;  %v2362_v51 = vld [vmem:[%s3843_s3 + $0x1c] sm:$0xf]  ;;  %v2372_v35 = vld [vmem:[%s3843_s3 + $0x44] sm:$0xf] }
  0x96   :  { %v149_v44 = vpop.permute.xlu0 %148  ;;  %v189_v48 = vpop.permute.xlu1 %188 }
  0x97   :  { %v153_v16 = vmul.f32 %v151_v13, %v149_v44  ;;  %v154_v17 = vmul.f32 %v152_v14, %v149_v44  ;;  %v193_v26 = vsel %vm3848_vm10, %v189_v48, %v2686_v0  ;;  %v194_v27 = vsel %vm3848_vm10, %v2686_v0, %v189_v48 }
  0x98   :  { %v199_v34 = vsel %vm2819_vm11, %v194_v27, 0.0  ;;  %v200_v0 = vsel %vm2827_vm12, %v193_v26, 0.0  ;;  %vm3850_vm10 = vcmp.lt.s32.totalorder %v2670_v52, 113 }
  0x99   :  { %v155_v30 = vadd.f32 %v153_v16, %v142_v22  ;;  %v156_v31 = vadd.f32 %v154_v17, %v143_v23  ;;  %v208_v47 = vperm.slane %v199_v34, 0  ;;  %v209_v48 = vperm.slane %v200_v0, 0 }
  0x9a   :  { %731 = vperm.xlu2 %2475, %v2358_v1   ;;  %v221_v38 = vperm.slane %v199_v34, 1  ;;  %v222_v57 = vperm.slane %v200_v0, 1  ;;  %v234_v60 = vperm.slane %v199_v34, 2  ;;  %v235_v16 = vperm.slane %v200_v0, 2 }
  0x9b   :  { %v168_v44 = vadd.f32 %v166_v39, %v155_v30  ;;  %v169_v45 = vadd.f32 %v167_v41, %v156_v31  ;;  %v247_v23 = vperm.slane %v199_v34, 3  ;;  %v248_v26 = vperm.slane %v200_v0, 3  ;;  %v2363_v34 = vld [vmem:[%s3843_s3 + $0x20] sm:$0xf] }
  0x9c   :  { %765 = vperm.xlu0 %2476, %v2360_v55   ;;  %778 = vperm.xlu1 %2474, %v2361_v63   ;;  %v2862_v1 = vpop.permute.xlu2 %344  ;;  %v236_v27 = vmul.f32 %v234_v60, %v2753_v19 }
  0x9d   :  { %v181_v58 = vadd.f32 %v179_v53, %v168_v44  ;;  %v182_v63 = vadd.f32 %v180_v54, %v169_v45 }
  0x9e   :  { %v206_v46 = vpop.permute.xlu0 %205  ;;  %v219_v21 = vpop.permute.xlu1 %218 }
  0x9f   :  { %v210_v37 = vmul.f32 %v208_v47, %v206_v46  ;;  %v211_v55 = vmul.f32 %v209_v48, %v206_v46  ;;  %v223_v3 = vmul.f32 %v221_v38, %v219_v21  ;;  %v224_v11 = vmul.f32 %v222_v57, %v219_v21 }
  0xa0   :  { %v330_v38 = vperm.slane %v2554_v2, 0  ;;  %v331_v57 = vperm.slane %v2554_v2, 4 }
  0xa1   :  { %v212_v12 = vadd.f32 %v210_v37, %v181_v58  ;;  %v213_v13 = vadd.f32 %v211_v55, %v182_v63  ;;  %v2366_v63 = vld [vmem:[%s3843_s3 + $0x2c] sm:$0xf] }
  0xa2   :  { %752 = vperm.xlu2 %2475, %v2359_v33  }
  0xa3   :  { %v225_v21 = vadd.f32 %v223_v3, %v212_v12  ;;  %v226_v22 = vadd.f32 %v224_v11, %v213_v13  ;;  %v347_v12 = vperm.slane %v2554_v2, 1  ;;  %v348_v13 = vperm.slane %v2554_v2, 5 }
  0xa4   :  { %825 = vperm.xlu0 %2476, %v2364_v29   ;;  %838 = vperm.xlu1 %2474, %v2365_v32   ;;  %v2371_v29 = vld [vmem:[%s3843_s3 + $0x40] sm:$0xf]  ;;  %v2891_v39 = vpop.permute.xlu2 %396 }
  0xa5   :  { %v238_v0 = vadd.f32 %v236_v27, %v225_v21  ;;  %v365_v27 = vperm.slane %v2554_v2, 6 }
  0xa6   :  { %v245_v49 = vpop.permute.xlu0 %244  ;;  %v259_v50 = vpop.permute.xlu1 %258 }
  0xa7   :  { %v263_v14 = vsel %vm3847_vm13, %v259_v50, %v2779_v42  ;;  %v264_v43 = vsel %vm3847_vm13, %v2779_v42, %v259_v50  ;;  %v237_v42 = vmul.f32 %v235_v16, %v2753_v19  ;;  %v249_v30 = vmul.f32 %v247_v23, %v245_v49  ;;  %vm2948_vm13 = vmand %vm2929_vm15, %vm2702_vm1 }
  0xa8   :  { %v269_v46 = vsel %vm2702_vm1, %v264_v43, 0.0  ;;  %v270_v18 = vsel %vm2715_vm3, %v263_v14, 0.0  ;;  %v250_v31 = vmul.f32 %v248_v26, %v245_v49  ;;  %v334_v14 = vperm.slane %v330_v38, 0 }
  0xa9   :  { %v278_v32 = vperm.slane %v269_v46, 0  ;;  %v279_v33 = vperm.slane %v270_v18, 0  ;;  %v239_v36 = vadd.f32 %v237_v42, %v226_v22  ;;  %v251_v44 = vadd.f32 %v249_v30, %v238_v0 }
  0xaa   :  { %791 = vperm.xlu2 %2475, %v2362_v51   ;;  %v291_v47 = vperm.slane %v269_v46, 1  ;;  %v292_v48 = vperm.slane %v270_v18, 1  ;;  %v305_v58 = vperm.slane %v270_v18, 2  ;;  %v317_v3 = vperm.slane %v269_v46, 3 }
  0xab   :  { %v252_v45 = vadd.f32 %v250_v31, %v239_v36  ;;  %v318_v11 = vperm.slane %v270_v18, 3  ;;  %v335_v43 = vperm.slane %v331_v57, 0  ;;  %v364_v18 = vperm.slane %v2554_v2, 2 }
  0xac   :  { %885 = vperm.xlu0 %2476, %v2368_v25   ;;  %898 = vperm.xlu1 %2474, %v2369_v40   ;;  %v304_v25 = vperm.slane %v269_v46, 2  ;;  %v2900_v60 = vpop.permute.xlu2 %426  ;;  %v351_v42 = vperm.slane %v347_v12, 1  ;;  %v369_v36 = vperm.slane %v365_v27, 2 }
  0xad   :  { %v368_v0 = vperm.slane %v364_v18, 2 }
  0xae   :  { %v276_v17 = vpop.permute.xlu0 %275  ;;  %v289_v20 = vpop.permute.xlu1 %288  ;;  %v306_v16 = vmul.f32 %v304_v25, %v2837_v28 }
  0xaf   :  { %v280_v19 = vmul.f32 %v278_v32, %v276_v17  ;;  %v281_v41 = vmul.f32 %v279_v33, %v276_v17  ;;  %v293_v37 = vmul.f32 %v291_v47, %v289_v20  ;;  %v294_v55 = vmul.f32 %v292_v48, %v289_v20 }
  0xb0   :  { %v307_v17 = vmul.f32 %v305_v58, %v2837_v28  ;;  %v2367_v28 = vld [vmem:[%s3843_s3 + $0x30] sm:$0xf] }
  0xb1   :  { %v282_v53 = vadd.f32 %v280_v19, %v251_v44  ;;  %v283_v54 = vadd.f32 %v281_v41, %v252_v45  ;;  %v353_v19 = vmul.f32 %v351_v42, %v2862_v1  ;;  %v3903_v42 = vmov 0 }
  0xb2   :  { %812 = vperm.xlu2 %2475, %v2363_v34   ;;  %v382_v34 = vperm.slane %v2554_v2, 7 }
  0xb3   :  { %v295_v40 = vadd.f32 %v293_v37, %v282_v53  ;;  %v296_v51 = vadd.f32 %v294_v55, %v283_v54 }
  0xb4   :  { %924 = vperm.xlu0 %2476, %v2371_v29   ;;  %937 = vperm.xlu1 %2474, %v2372_v35   ;;  %v352_v29 = vperm.slane %v348_v13, 1  ;;  %v381_v35 = vperm.slane %v2554_v2, 3  ;;  %v467_v37 = vpop.permute.xlu2 %466 }
  0xb5   :  { %v308_v26 = vadd.f32 %v306_v16, %v295_v40  ;;  %v309_v46 = vadd.f32 %v307_v17, %v296_v51  ;;  %v2370_v51 = vld [vmem:[%s3843_s3 + $0x3c] sm:$0xf] }
  0xb6   :  { %v315_v49 = vpop.permute.xlu0 %314  ;;  %v328_v50 = vpop.permute.xlu1 %327  ;;  %v354_v41 = vmul.f32 %v352_v29, %v2862_v1  ;;  %v385_v48 = vperm.slane %v381_v35, 3 }
  0xb7   :  { %v319_v20 = vmul.f32 %v317_v3, %v315_v49  ;;  %v320_v21 = vmul.f32 %v318_v11, %v315_v49  ;;  %v336_v32 = vmul.f32 %v334_v14, %v328_v50  ;;  %v337_v33 = vmul.f32 %v335_v43, %v328_v50 }
  0xb8   :  { %v386_v49 = vperm.slane %v382_v34, 3 }
  0xb9   :  { %v321_v30 = vadd.f32 %v319_v20, %v308_v26  ;;  %v322_v31 = vadd.f32 %v320_v21, %v309_v46 }
  0xba   :  { %851 = vperm.xlu2 %2475, %v2366_v63  }
  0xbb   :  { %v338_v44 = vadd.f32 %v336_v32, %v321_v30  ;;  %v339_v45 = vadd.f32 %v337_v33, %v322_v31 }
  0xbc   :  { %v497_v46 = vpop.permute.xlu2 %496 }
  0xbd   :  { %v355_v25 = vadd.f32 %v353_v19, %v338_v44  ;;  %v356_v58 = vadd.f32 %v354_v41, %v339_v45 }
  0xbe   :  { %v362_v22 = vpop.permute.xlu0 %361  ;;  %v379_v23 = vpop.permute.xlu1 %378 }
  0xbf   :  { %v370_v55 = vmul.f32 %v368_v0, %v362_v22  ;;  %v371_v38 = vmul.f32 %v369_v36, %v362_v22  ;;  %v387_v11 = vmul.f32 %v385_v48, %v379_v23  ;;  %v388_v12 = vmul.f32 %v386_v49, %v379_v23  ;;  %v2373_v23 = vld [vmem:[%s3843_s3 + $0x48] sm:$0xf] }
  0xc1   :  { %v372_v3 = vadd.f32 %v370_v55, %v355_v25 }
  0xc2   :  { %872 = vperm.xlu2 %2475, %v2367_v28  }
  0xc3   :  { %v389_v17 = vadd.f32 %v387_v11, %v372_v3 }
  0xc4   :  { %v537_v55 = vpop.permute.xlu2 %536 }
  0xc6   :  { %v399_v47 = vpop.permute.xlu0 %398  ;;  %v414_v54 = vpop.permute.xlu1 %413 }
  0xc7   :  { %v401_v50 = vsel %vm3846_vm14, %v2891_v39, %v399_v47  ;;  %v402_v53 = vsel %vm3846_vm14, %v399_v47, %v2891_v39  ;;  %v373_v39 = vadd.f32 %v371_v38, %v356_v58  ;;  %vm2938_vm14 = vcmp.lt.s32.totalorder %v25_v61, 15 }
  0xc8   :  { %v407_v1 = vsel %vm2798_vm8, %v401_v50, 0.0  ;;  %v408_v57 = vsel %vm2808_vm9, %v402_v53, 0.0  ;;  %v3904_v42 = vsel %vm2938_vm14, 4294967295, %v3903_v42  ;;  %vm2957_vm7 = vmand %vm2938_vm14, %vm2715_vm3  ;;  %v3907_v61 = vmov 0 }
  0xc9   :  { %v416_v63 = vperm.slane %v407_v1, 0  ;;  %v417_v40 = vperm.slane %v408_v57, 0  ;;  %v390_v20 = vadd.f32 %v388_v12, %v373_v39  ;;  %v429_v21 = vperm.slane %v407_v1, 1 }
  0xca   :  { %911 = vperm.xlu2 %2475, %v2370_v51   ;;  %v430_v22 = vperm.slane %v408_v57, 1  ;;  %v442_v31 = vperm.slane %v407_v1, 2  ;;  %v443_v56 = vperm.slane %v408_v57, 2  ;;  %v3908_v61 = vsel %vm2957_vm7, 4294967295, %v3907_v61 }
  0xcb   :  { %v418_v13 = vmul.f32 %v416_v63, %v414_v54  ;;  %v419_v14 = vmul.f32 %v417_v40, %v414_v54  ;;  %v431_v29 = vmul.f32 %v429_v21, %v2900_v60  ;;  %v455_v44 = vperm.slane %v407_v1, 3 }
  0xcc   :  { %v432_v59 = vmul.f32 %v430_v22, %v2900_v60  ;;  %v456_v45 = vperm.slane %v408_v57, 3 }
  0xcd   :  { %v420_v18 = vadd.f32 %v418_v13, %v389_v17  ;;  %v421_v27 = vadd.f32 %v419_v14, %v390_v20  ;;  %v567_v20 = vpop.permute.xlu2 %566 }
  0xce   :  { %v440_v43 = vpop.permute.xlu0 %439  ;;  %v453_v16 = vpop.permute.xlu1 %452 }
  0xcf   :  { %v433_v60 = vadd.f32 %v431_v29, %v420_v18  ;;  %v434_v32 = vadd.f32 %v432_v59, %v421_v27  ;;  %v444_v28 = vmul.f32 %v442_v31, %v440_v43  ;;  %v445_v35 = vmul.f32 %v443_v56, %v440_v43 }
  0xd0   :  { %v457_v53 = vmul.f32 %v455_v44, %v453_v16  ;;  %v458_v54 = vmul.f32 %v456_v45, %v453_v16 }
  0xd1   :  { %v446_v49 = vadd.f32 %v444_v28, %v433_v60  ;;  %v447_v50 = vadd.f32 %v445_v35, %v434_v32 }
  0xd2   :  { %950 = vperm.xlu2 %2475, %v2373_v23  }
  0xd3   :  { %v460_v63 = vadd.f32 %v458_v54, %v447_v50 }
  0xd6   :  { %v469_v33 = vpop.permute.xlu0 %468  ;;  %v484_v36 = vpop.permute.xlu1 %483 }
  0xd7   :  { %v471_v34 = vsel %vm3850_vm10, %v467_v37, %v469_v33  ;;  %v472_v0 = vsel %vm3850_vm10, %v469_v33, %v467_v37  ;;  %v459_v37 = vadd.f32 %v457_v53, %v446_v49  ;;  %vm3851_vm10 = vcmp.lt.s32.totalorder %v2670_v52, 112  ;;  %v607_v49 = vpop.permute.xlu2 %606 }
  0xd8   :  { %v477_v19 = vsel %vm2948_vm13, %v471_v34, 0.0  ;;  %v478_v41 = vsel %vm2957_vm7, %v472_v0, 0.0  ;;  %vm2991_vm7 = vmand %vm2938_vm14, %vm2808_vm9 }
  0xd9   :  { %v486_v47 = vperm.slane %v477_v19, 0  ;;  %v487_v48 = vperm.slane %v478_v41, 0  ;;  %v499_v40 = vperm.slane %v477_v19, 1  ;;  %v500_v51 = vperm.slane %v478_v41, 1 }
  0xda   :  { %v512_v57 = vperm.slane %v477_v19, 2  ;;  %v513_v13 = vperm.slane %v478_v41, 2  ;;  %v525_v21 = vperm.slane %v477_v19, 3  ;;  %v526_v22 = vperm.slane %v478_v41, 3 }
  0xdb   :  { %v488_v38 = vmul.f32 %v486_v47, %v484_v36  ;;  %v489_v25 = vmul.f32 %v487_v48, %v484_v36  ;;  %v501_v12 = vmul.f32 %v499_v40, %v497_v46  ;;  %v502_v1 = vmul.f32 %v500_v51, %v497_v46 }
  0xdd   :  { %v490_v39 = vadd.f32 %v488_v38, %v459_v37  ;;  %v491_v11 = vadd.f32 %v489_v25, %v460_v63 }
  0xde   :  { %v510_v58 = vpop.permute.xlu0 %509  ;;  %v523_v3 = vpop.permute.xlu1 %522 }
  0xdf   :  { %v503_v14 = vadd.f32 %v501_v12, %v490_v39  ;;  %v504_v43 = vadd.f32 %v502_v1, %v491_v11  ;;  %v514_v16 = vmul.f32 %v512_v57, %v510_v58  ;;  %v515_v17 = vmul.f32 %v513_v13, %v510_v58 }
  0xe0   :  { %v527_v46 = vmul.f32 %v525_v21, %v523_v3  ;;  %v528_v59 = vmul.f32 %v526_v22, %v523_v3  ;;  %v3911_v3 = vmov 0 }
  0xe1   :  { %v516_v60 = vadd.f32 %v514_v16, %v503_v14  ;;  %v517_v32 = vadd.f32 %v515_v17, %v504_v43  ;;  %v3912_v3 = vsel %vm2991_vm7, 4294967295, %v3911_v3 }
  0xe2   :  { %3913 = vst [vmem:[#allocation10_spill] sm:$0xff] %v3912_v3 }
  0xe3   :  { %v529_v0 = vadd.f32 %v527_v46, %v516_v60  ;;  %v530_v36 = vadd.f32 %v528_v59, %v517_v32 }
  0xe6   :  { %v539_v18 = vpop.permute.xlu0 %538  ;;  %v554_v29 = vpop.permute.xlu1 %553 }
  0xe7   :  { %v541_v27 = vsel %vm3851_vm10, %v537_v55, %v539_v18  ;;  %v542_v23 = vsel %vm3851_vm10, %v539_v18, %v537_v55  ;;  %vm2982_vm10 = vmand %vm2929_vm15, %vm2798_vm8 }
  0xe8   :  { %v547_v31 = vsel %vm2929_vm15, %v541_v27, 0.0  ;;  %v548_v56 = vsel %vm2938_vm14, %v542_v23, 0.0  ;;  %v637_v27 = vpop.permute.xlu2 %636 }
  0xe9   :  { %v556_v33 = vperm.slane %v547_v31, 0  ;;  %v557_v28 = vperm.slane %v548_v56, 0  ;;  %v569_v19 = vperm.slane %v547_v31, 1  ;;  %v570_v41 = vperm.slane %v548_v56, 1 }
  0xea   :  { %v582_v54 = vperm.slane %v547_v31, 2  ;;  %v583_v55 = vperm.slane %v548_v56, 2  ;;  %v595_v63 = vperm.slane %v547_v31, 3  ;;  %v596_v40 = vperm.slane %v548_v56, 3 }
  0xeb   :  { %v558_v35 = vmul.f32 %v556_v33, %v554_v29  ;;  %v559_v34 = vmul.f32 %v557_v28, %v554_v29  ;;  %v571_v50 = vmul.f32 %v569_v19, %v567_v20  ;;  %v572_v53 = vmul.f32 %v570_v41, %v567_v20 }
  0xed   :  { %v560_v45 = vadd.f32 %v558_v35, %v529_v0  ;;  %v561_v47 = vadd.f32 %v559_v34, %v530_v36 }
  0xee   :  { %v580_v44 = vpop.permute.xlu0 %579  ;;  %v593_v48 = vpop.permute.xlu1 %592 }
  0xef   :  { %v573_v38 = vadd.f32 %v571_v50, %v560_v45  ;;  %v574_v25 = vadd.f32 %v572_v53, %v561_v47  ;;  %v584_v58 = vmul.f32 %v582_v54, %v580_v44  ;;  %v585_v37 = vmul.f32 %v583_v55, %v580_v44 }
  0xf0   :  { %v597_v39 = vmul.f32 %v595_v63, %v593_v48  ;;  %v598_v11 = vmul.f32 %v596_v40, %v593_v48  ;;  %v675_v55 = vpop.permute.xlu2 %674 }
  0xf1   :  { %v586_v1 = vadd.f32 %v584_v58, %v573_v38  ;;  %v587_v57 = vadd.f32 %v585_v37, %v574_v25 }
  0xf3   :  { %v599_v23 = vadd.f32 %v597_v39, %v586_v1  ;;  %v600_v29 = vadd.f32 %v598_v11, %v587_v57  ;;  %v2377_v57 = vld [vmem:[%s3843_s3 + $0x58] sm:$0xf] }
  0xf6   :  { %v609_v12 = vpop.permute.xlu0 %608  ;;  %v624_v43 = vpop.permute.xlu1 %623 }
  0xf7   :  { %v611_v13 = vsel %vm3855_vm4, %v607_v49, %v609_v12  ;;  %v612_v14 = vsel %vm3855_vm4, %v609_v12, %v607_v49  ;;  %vm3914_vm4 = vcmp.lt.s32.totalorder %v2670_v52, 17 }
  0xf8   :  { %v617_v16 = vsel %vm2982_vm10, %v611_v13, 0.0  ;;  %v618_v17 = vsel %vm2991_vm7, %v612_v14, 0.0  ;;  %v3030_v14 = vpop.permute.xlu2 %694  ;;  %vm3915_vm7 = vmmov %vm3914_vm4 }
  0xf9   :  { %v639_v20 = vperm.slane %v617_v16, 1  ;;  %v640_v21 = vperm.slane %v618_v17, 1  ;;  %v626_v22 = vperm.slane %v617_v16, 0  ;;  %v627_v18 = vperm.slane %v618_v17, 0 }
  0xfa   :  { %v652_v31 = vperm.slane %v617_v16, 2  ;;  %v653_v56 = vperm.slane %v618_v17, 2  ;;  %v665_v34 = vperm.slane %v617_v16, 3  ;;  %v666_v0 = vperm.slane %v618_v17, 3 }
  0xfb   :  { %v628_v46 = vmul.f32 %v626_v22, %v624_v43  ;;  %v629_v59 = vmul.f32 %v627_v18, %v624_v43  ;;  %v641_v33 = vmul.f32 %v639_v20, %v637_v27  ;;  %v642_v28 = vmul.f32 %v640_v21, %v637_v27  ;;  %v2381_v20 = vld [vmem:[%s3843_s3 + $0x68] sm:$0xf] }
  0xfc   :  { %v3056_v22 = vld [vmem:[%s3840_s0 + $0x8] sm:$0xff] }
  0xfd   :  { %v630_v60 = vadd.f32 %v628_v46, %v599_v23  ;;  %v631_v32 = vadd.f32 %v629_v59, %v600_v29  ;;  %1231 = vst [vmem:[#allocation1] ss:$2 sm:$0xff] %v3056_v22 }
  0xfe   :  { %v650_v35 = vpop.permute.xlu0 %649  ;;  %v663_v45 = vpop.permute.xlu1 %662 }
  0xff   :  { %v643_v36 = vadd.f32 %v641_v33, %v630_v60  ;;  %v644_v19 = vadd.f32 %v642_v28, %v631_v32  ;;  %v654_v41 = vmul.f32 %v652_v31, %v650_v35  ;;  %v655_v44 = vmul.f32 %v653_v56, %v650_v35  ;;  %v2374_v31 = vld [vmem:[%s3843_s3 + $0x4c] sm:$0xf]  ;;  %v2375_v33 = vld [vmem:[%s3843_s3 + $0x50] sm:$0xf]  ;;  %v2385_v28 = vld [vmem:[%s3843_s3 + $0x78] sm:$0xf] }
 0x100   :  { %v667_v47 = vmul.f32 %v665_v34, %v663_v45  ;;  %v668_v48 = vmul.f32 %v666_v0, %v663_v45  ;;  %v3047_v21 = vpop.permute.xlu2 %731  ;;  %v2376_v35 = vld [vmem:[%s3843_s3 + $0x54] sm:$0xf]  ;;  %v2378_v0 = vld [vmem:[%s3843_s3 + $0x5c] sm:$0xf]  ;;  %v2389_v45 = vld [vmem:[%s3843_s3 + $0x88] sm:$0xf] }
 0x101   :  { %v656_v49 = vadd.f32 %v654_v41, %v643_v36  ;;  %v657_v50 = vadd.f32 %v655_v44, %v644_v19  ;;  %v2379_v44 = vld [vmem:[%s3843_s3 + $0x60] sm:$0xf] }
 0x103   :  { %v669_v53 = vadd.f32 %v667_v47, %v656_v49  ;;  %v670_v54 = vadd.f32 %v668_v48, %v657_v50  ;;  %v2380_v47 = vld [vmem:[%s3843_s3 + $0x64] sm:$0xf]  ;;  %v2382_v48 = vld [vmem:[%s3843_s3 + $0x6c] sm:$0xf] }
 0x104   :  { %v1232_v60 = vld.sshfl [vmem:[#allocation1] sm:$0xff pattern:$0x75316420]  ;;  %v1233_v32 = vld.sshfl [vmem:[#allocation1 + $0x8] sm:$0xff pattern:$0x75316420] }
 0x105   :  { %v677_v38 = vadd.f32 %v675_v55, %v669_v53  ;;  %v678_v25 = vadd.f32 %v675_v55, %v670_v54  ;;  %1290 = vst [vmem:[#allocation1] ss:$2 sm:$0xff] %v3056_v22  ;;  %v2383_v54 = vld [vmem:[%s3843_s3 + $0x70] sm:$0xf]  ;;  %v2392_v55 = vld [vmem:[%s3841_s1 + $0x4] sm:$0xf] }
 0x106   :  { %v3003_v58 = vpop.permute.xlu0 %705  ;;  %v3005_v40 = vpop.permute.xlu1 %718 }
 0x107   :  { %v679_v37 = vmul.f32 0.01, %v677_v38  ;;  %v680_v63 = vmul.f32 0.01, %v678_v25 }
 0x108   :  { %v3074_v56 = vpop.permute.xlu2 %752 }
 0x109   :  { %v3007_v39 = vmax.f32 %v677_v38, %v679_v37  ;;  %v3009_v11 = vmax.f32 %v678_v25, %v680_v63  ;;  %v2384_v38 = vld [vmem:[%s3843_s3 + $0x74] sm:$0xf]  ;;  %v2386_v37 = vld [vmem:[%s3843_s3 + $0x7c] sm:$0xf] }
 0x10b   :  { %683 = vrot.lane.b32.xlu0 %v3007_v39, %s2504_s28  ;;  %974 = vrot.lane.b32.xlu2 %v3009_v11, %s2508_s17  ;;  %v928_v18 = vperm.slane %v3009_v11, 0  ;;  %v941_v23 = vperm.slane %v3009_v11, 1 }
 0x10c   :  { %685 = vrot.lane.b32.xlu1 %v3009_v11, %s2504_s28  ;;  %v1291_v36 = vld.sshfl [vmem:[#allocation1] sm:$0xff pattern:$0x75316420]  ;;  %v3097_v19 = vld.sshfl [vmem:[#allocation1 + $0x8] sm:$0xff pattern:$0x75316420] }
 0x10d   :  { %1351 = vst [vmem:[#allocation1] ss:$2 sm:$0xff] %v3056_v22 }
 0x10e   :  { %v3017_v12 = vpop.permute.xlu0 %765  ;;  %v3019_v1 = vpop.permute.xlu1 %778 }
 0x110   :  { %v3090_v34 = vpop.permute.xlu2 %791 }
 0x113   :  { %740 = vrot.lane.b32.xlu0 %v3007_v39, %s2505_s6  ;;  %1010 = vperm.xlu2 %2475, %v2377_v57   ;;  %v2387_v57 = vld [vmem:[%s3843_s3 + $0x80] sm:$0xf] }
 0x114   :  { %742 = vrot.lane.b32.xlu1 %v3009_v11, %s2505_s6  ;;  %v1352_v50 = vld.sshfl [vmem:[#allocation1] sm:$0xff pattern:$0x75316420]  ;;  %v3119_v53 = vld.sshfl [vmem:[#allocation1 + $0x8] sm:$0xff pattern:$0x75316420] }
 0x115   :  { %1412 = vst [vmem:[#allocation1] ss:$2 sm:$0xff] %v3056_v22 }
 0x116   :  { %v3028_v13 = vpop.permute.xlu0 %825  ;;  %v3032_v43 = vpop.permute.xlu1 %838 }
 0x118   :  { %v3102_v41 = vpop.permute.xlu2 %812 }
 0x11b   :  { %800 = vrot.lane.b32.xlu0 %v3007_v39, %s2506_s13  ;;  %1034 = vrot.lane.b32.xlu2 %v3009_v11, %s2509_s27 }
 0x11c   :  { %802 = vrot.lane.b32.xlu1 %v3009_v11, %s2506_s13 }
 0x11e   :  { %v3040_v16 = vpop.permute.xlu0 %885  ;;  %v3042_v17 = vpop.permute.xlu1 %898 }
 0x120   :  { %v3116_v49 = vpop.permute.xlu2 %851 }
 0x123   :  { %860 = vrot.lane.b32.xlu0 %v3007_v39, %s2507_s22  ;;  %1070 = vperm.xlu2 %2475, %v2381_v20   ;;  %v2396_v20 = vld [vmem:[%s3841_s1 + $0x14] sm:$0xf] }
 0x124   :  { %862 = vrot.lane.b32.xlu1 %v3009_v11, %s2507_s22 }
 0x126   :  { %v3060_v27 = vpop.permute.xlu0 %924  ;;  %v3066_v46 = vpop.permute.xlu1 %937 }
 0x127   :  { %v3064_v29 = vmul.f32 %v928_v18, %v3060_v27  ;;  %v3069_v59 = vmul.f32 %v941_v23, %v3066_v46  ;;  %v2388_v18 = vld [vmem:[%s3843_s3 + $0x84] sm:$0xf] }
 0x128   :  { %v3133_v25 = vpop.permute.xlu2 %872 }
 0x12b   :  { %963 = vperm.xlu0 %2476, %v2374_v31   ;;  %1094 = vrot.lane.b32.xlu2 %v3009_v11, %s2510_s14  ;;  %v2390_v31 = vld [vmem:[%s3843_s3 + $0x8c] sm:$0xf] }
 0x12c   :  { %972 = vrot.lane.b32.xlu1 %v3007_v39, %s2508_s17 }
 0x130   :  { %v3141_v63 = vpop.permute.xlu2 %911 }
 0x133   :  { %984 = vperm.xlu0 %2476, %v2375_v33   ;;  %1130 = vperm.xlu2 %2475, %v2385_v28   ;;  %v2400_v28 = vld [vmem:[%s3841_s1 + $0x24] sm:$0xf] }
 0x134   :  { %997 = vperm.xlu1 %2474, %v2376_v35   ;;  %v1244_v35 = vld [vmem:[%s3841_s1] sm:$0xf] }
 0x138   :  { %v3152_v23 = vpop.permute.xlu2 %950 }
 0x13b   :  { %1023 = vperm.xlu0 %2476, %v2378_v0   ;;  %1154 = vrot.lane.b32.xlu2 %v3009_v11, %s2511_s25  ;;  %v2393_v0 = vld [vmem:[%s3841_s1 + $0x8] sm:$0xf] }
 0x13c   :  { %1032 = vrot.lane.b32.xlu1 %v3007_v39, %s2509_s27 }
 0x143   :  { %1044 = vperm.xlu0 %2476, %v2379_v44   ;;  %1190 = vperm.xlu2 %2475, %v2389_v45   ;;  %v2394_v45 = vld [vmem:[%s3841_s1 + $0xc] sm:$0xf] }
 0x144   :  { %1057 = vperm.xlu1 %2474, %v2380_v47  }
 0x14b   :  { %1083 = vperm.xlu0 %2476, %v2382_v48   ;;  %1236 = vrot.lane.b32.xlu2 %v1232_v60, %s2504_s28  ;;  %v1212_v60 = vld [vmem:[%s3844_s4] sm:$0xf] }
 0x14c   :  { %1092 = vrot.lane.b32.xlu1 %v3007_v39, %s2510_s14 }
 0x153   :  { %1104 = vperm.xlu0 %2476, %v2383_v54   ;;  %1257 = vperm.xlu2 %2475, %v2392_v55  }
 0x154   :  { %1117 = vperm.xlu1 %2474, %v2384_v38  }
 0x15b   :  { %1143 = vperm.xlu0 %2476, %v2386_v37   ;;  %1295 = vrot.lane.b32.xlu2 %v1291_v36, %s2505_s6  ;;  %v1413_v36 = vld.sshfl [vmem:[#allocation1] sm:$0xff pattern:$0x75316420] }
 0x15c   :  { %1152 = vrot.lane.b32.xlu1 %v3007_v39, %s2511_s25 }
 0x163   :  { %1164 = vperm.xlu0 %2476, %v2387_v57   ;;  %1318 = vperm.xlu2 %2475, %v2396_v20  }
 0x164   :  { %1177 = vperm.xlu1 %2474, %v2388_v18   ;;  %v2404_v18 = vld [vmem:[%s3841_s1 + $0x34] sm:$0xf] }
 0x165   :  { %v3161_v33 = vpop.permute.xlu2 %974 }
 0x16b   :  { %1203 = vperm.xlu0 %2476, %v2390_v31   ;;  %1356 = vrot.lane.b32.xlu2 %v1352_v50, %s2506_s13 }
 0x16c   :  { %1215 = vperm.xlu1 %2474, %v1212_v60  }
 0x16d   :  { %v3173_v44 = vpop.permute.xlu2 %1010 }
 0x173   :  { %1238 = vrot.lane.b32.xlu0 %v1233_v32, %s2504_s28  ;;  %1379 = vperm.xlu2 %2475, %v2400_v28   ;;  %v2395_v28 = vld [vmem:[%s3841_s1 + $0x10] sm:$0xf] }
 0x174   :  { %1247 = vperm.xlu1 %2474, %v1244_v35  }
 0x175   :  { %v3193_v35 = vpop.permute.xlu2 %1034 }
 0x17b   :  { %1269 = vperm.xlu0 %2476, %v2393_v0   ;;  %1417 = vrot.lane.b32.xlu2 %v1413_v36, %s2507_s22 }
 0x17c   :  { %1281 = vperm.xlu1 %2474, %v2394_v45  }
 0x17d   :  { %v684_v47 = vpop.permute.xlu0 %683 }
 0x17e   :  { %v686_v48 = vpop.permute.xlu1 %685 }
 0x17f   :  { %v687_v32 = vsel %vm3914_vm4, %v684_v47, %v686_v48  ;;  %v688_v50 = vsel %vm3915_vm7, %v686_v48, %v684_v47  ;;  %vm3916_vm4 = vcmp.lt.s32.totalorder %v2670_v52, 16 }
 0x180   :  { %v689_v54 = vsel %vm2724_vm5, %v688_v50, 0.0  ;;  %v690_v55 = vsel %vm2732_vm6, %v687_v32, 0.0  ;;  %vm3917_vm7 = vmmov %vm3916_vm4 }
 0x181   :  { %v697_v38 = vperm.slane %v689_v54, 0  ;;  %v698_v37 = vperm.slane %v690_v55, 0  ;;  %v708_v57 = vperm.slane %v689_v54, 1  ;;  %v709_v20 = vperm.slane %v690_v55, 1 }
 0x182   :  { %v721_v31 = vperm.slane %v689_v54, 2  ;;  %v722_v60 = vperm.slane %v690_v55, 2  ;;  %v734_v48 = vperm.slane %v689_v54, 3  ;;  %v735_v32 = vperm.slane %v690_v55, 3 }
 0x183   :  { %v699_v0 = vmul.f32 %v697_v38, %v3030_v14  ;;  %v700_v36 = vmul.f32 %v698_v37, %v3030_v14  ;;  %v710_v45 = vmul.f32 %v708_v57, %v3003_v58  ;;  %v711_v47 = vmul.f32 %v709_v20, %v3003_v58  ;;  %1297 = vrot.lane.b32.xlu0 %v3097_v19, %s2505_s6  ;;  %v3207_v54 = vld.sshfl [vmem:[#allocation1 + $0x8] sm:$0xff pattern:$0x75316420]  ;;  %v2407_v20 = vld [vmem:[%s3841_s1 + $0x40] sm:$0xf] }
 0x184   :  { %1440 = vperm.xlu2 %2475, %v2404_v18   ;;  %v723_v9 = vmul.f32 %v721_v31, %v3005_v40  ;;  %v724_v2 = vmul.f32 %v722_v60, %v3005_v40  ;;  %1306 = vperm.xlu1 %2474, %v2395_v28   ;;  %v2397_v40 = vld [vmem:[%s3841_s1 + $0x18] sm:$0xf]  ;;  %1537 = vst [vmem:[#allocation1] ss:$2 sm:$0xff] %v3056_v22 }
 0x185   :  { %v712_v50 = vadd.f32 %v710_v45, %v699_v0  ;;  %v713_v10 = vadd.f32 %v711_v47, %v700_v36  ;;  %v741_v38 = vpop.permute.xlu0 %740  ;;  %v2398_v0 = vld [vmem:[%s3841_s1 + $0x1c] sm:$0xf] }
 0x186   :  { %v743_v3 = vpop.permute.xlu1 %742 }
 0x187   :  { %v725_v14 = vadd.f32 %v723_v9, %v712_v50  ;;  %v726_v37 = vadd.f32 %v724_v2, %v713_v10  ;;  %v744_v58 = vsel %vm3916_vm4, %v741_v38, %v743_v3  ;;  %v745_v19 = vsel %vm3917_vm7, %v743_v3, %v741_v38  ;;  %v3227_v50 = vpop.permute.xlu2 %1070 }
 0x188   :  { %v746_v55 = vsel %vm2696_vm0, %v745_v19, 0.0  ;;  %v747_v57 = vsel %vm2709_vm2, %v744_v58, 0.0  ;;  %v736_v2 = vmul.f32 %v734_v48, %v3047_v21  ;;  %v737_v9 = vmul.f32 %v735_v32, %v3047_v21 }
 0x189   :  { %v755_v10 = vperm.slane %v746_v55, 0  ;;  %v756_v3 = vperm.slane %v747_v57, 0  ;;  %v768_v18 = vperm.slane %v746_v55, 1  ;;  %v769_v31 = vperm.slane %v747_v57, 1 }
 0x18a   :  { %v781_v60 = vperm.slane %v746_v55, 2  ;;  %v782_v28 = vperm.slane %v747_v57, 2  ;;  %v738_v36 = vadd.f32 %v736_v2, %v725_v14  ;;  %v739_v45 = vadd.f32 %v737_v9, %v726_v37 }
 0x18b   :  { %v757_v47 = vmul.f32 %v755_v10, %v3074_v56  ;;  %v758_v21 = vmul.f32 %v756_v3, %v3074_v56  ;;  %1330 = vperm.xlu0 %2476, %v2397_v40   ;;  %v794_v48 = vperm.slane %v746_v55, 3  ;;  %v795_v32 = vperm.slane %v747_v57, 3 }
 0x18c   :  { %1476 = vperm.xlu2 %2475, %v2407_v20   ;;  %v770_v19 = vmul.f32 %v768_v18, %v3017_v12  ;;  %v771_v6 = vmul.f32 %v769_v31, %v3017_v12  ;;  %1342 = vperm.xlu1 %2474, %v2398_v0   ;;  %v783_v14 = vmul.f32 %v781_v60, %v3019_v1  ;;  %vm3918_vm4 = vcmp.lt.s32.totalorder %v2670_v52, 15  ;;  %v2410_v31 = vld [vmem:[%s3841_s1 + $0x4c] sm:$0xf] }
 0x18d   :  { %v759_v38 = vadd.f32 %v757_v47, %v738_v36  ;;  %v760_v58 = vadd.f32 %v758_v21, %v739_v45  ;;  %v801_v4 = vpop.permute.xlu0 %800  ;;  %v784_v37 = vmul.f32 %v782_v28, %v3019_v1  ;;  %vm3919_vm7 = vmmov %vm3918_vm4  ;;  %v796_v9 = vmul.f32 %v794_v48, %v3090_v34 }
 0x18e   :  { %v803_v2 = vpop.permute.xlu1 %802  ;;  %v797_v10 = vmul.f32 %v795_v32, %v3090_v34  ;;  %v2399_v34 = vld [vmem:[%s3841_s1 + $0x20] sm:$0xf] }
 0x18f   :  { %v772_v56 = vadd.f32 %v770_v19, %v759_v38  ;;  %v773_v40 = vadd.f32 %v771_v6, %v760_v58  ;;  %v804_v55 = vsel %vm3918_vm4, %v801_v4, %v803_v2  ;;  %v805_v57 = vsel %vm3919_vm7, %v803_v2, %v801_v4 }
 0x190   :  { %v806_v12 = vsel %vm2819_vm11, %v805_v57, 0.0  ;;  %v807_v3 = vsel %vm2827_vm12, %v804_v55, 0.0  ;;  %vm3920_vm4 = vcmp.lt.s32.totalorder %v2670_v52, 1 }
 0x191   :  { %v785_v1 = vadd.f32 %v783_v14, %v772_v56  ;;  %v786_v20 = vadd.f32 %v784_v37, %v773_v40  ;;  %v815_v18 = vperm.slane %v806_v12, 0  ;;  %v816_v6 = vperm.slane %v807_v3, 0  ;;  %v3255_v56 = vpop.permute.xlu2 %1094  ;;  %vm3921_vm7 = vmmov %vm3920_vm4 }
 0x192   :  { %v828_v60 = vperm.slane %v806_v12, 1  ;;  %v829_v4 = vperm.slane %v807_v3, 1  ;;  %v841_v28 = vperm.slane %v806_v12, 2  ;;  %v842_v0 = vperm.slane %v807_v3, 2 }
 0x193   :  { %v798_v36 = vadd.f32 %v796_v9, %v785_v1  ;;  %v799_v45 = vadd.f32 %v797_v10, %v786_v20  ;;  %v817_v47 = vmul.f32 %v815_v18, %v3102_v41  ;;  %v818_v21 = vmul.f32 %v816_v6, %v3102_v41  ;;  %1358 = vrot.lane.b32.xlu0 %v3119_v53, %s2506_s13 }
 0x194   :  { %v830_v48 = vmul.f32 %v828_v60, %v3028_v13  ;;  %v831_v32 = vmul.f32 %v829_v4, %v3028_v13  ;;  %1524 = vperm.xlu2 %2475, %v2410_v31   ;;  %v854_v19 = vperm.slane %v806_v12, 3  ;;  %v855_v14 = vperm.slane %v807_v3, 3  ;;  %1367 = vperm.xlu1 %2474, %v2399_v34   ;;  %v2401_v12 = vld [vmem:[%s3841_s1 + $0x28] sm:$0xf]  ;;  %v2402_v4 = vld [vmem:[%s3841_s1 + $0x2c] sm:$0xf] }
 0x195   :  { %v819_v38 = vadd.f32 %v817_v47, %v798_v36  ;;  %v820_v58 = vadd.f32 %v818_v21, %v799_v45  ;;  %v861_v37 = vpop.permute.xlu0 %860  ;;  %v843_v41 = vmul.f32 %v841_v28, %v3032_v43  ;;  %v844_v53 = vmul.f32 %v842_v0, %v3032_v43  ;;  %v3280_v21 = vld.sshfl [vmem:[#allocation1] sm:$0xff pattern:$0x75316420] }
 0x196   :  { %v863_v2 = vpop.permute.xlu1 %862  ;;  %v856_v57 = vmul.f32 %v854_v19, %v3116_v49  ;;  %v857_v13 = vmul.f32 %v855_v14, %v3116_v49  ;;  %v2411_v49 = vld [vmem:[%s3841_s1 + $0x50] sm:$0xf] }
 0x197   :  { %v832_v40 = vadd.f32 %v830_v48, %v819_v38  ;;  %v833_v55 = vadd.f32 %v831_v32, %v820_v58  ;;  %v864_v9 = vsel %vm3920_vm4, %v861_v37, %v863_v2  ;;  %v865_v10 = vsel %vm3921_vm7, %v863_v2, %v861_v37  ;;  %v3282_v48 = vld.sshfl [vmem:[#allocation1 + $0x8] sm:$0xff pattern:$0x75316420] }
 0x198   :  { %v866_v20 = vsel %vm2702_vm1, %v865_v10, 0.0  ;;  %v867_v43 = vsel %vm2715_vm3, %v864_v9, 0.0  ;;  %1598 = vst [vmem:[#allocation1] ss:$2 sm:$0xff] %v3056_v22  ;;  %vm3922_vm4 = vcmp.lt.s32.totalorder %v2670_v52, 127 }
 0x199   :  { %v845_v3 = vadd.f32 %v843_v41, %v832_v40  ;;  %v846_v1 = vadd.f32 %v844_v53, %v833_v55  ;;  %v875_v18 = vperm.slane %v866_v20, 0  ;;  %v876_v6 = vperm.slane %v867_v43, 0  ;;  %vm3923_vm7 = vmmov %vm3922_vm4 }
 0x19a   :  { %v888_v31 = vperm.slane %v866_v20, 1  ;;  %v889_v60 = vperm.slane %v867_v43, 1  ;;  %v901_v34 = vperm.slane %v866_v20, 2  ;;  %v902_v36 = vperm.slane %v867_v43, 2 }
 0x19b   :  { %v858_v28 = vadd.f32 %v856_v57, %v845_v3  ;;  %v859_v0 = vadd.f32 %v857_v13, %v846_v1  ;;  %1391 = vperm.xlu0 %2476, %v2401_v12   ;;  %v877_v45 = vmul.f32 %v875_v18, %v3133_v25  ;;  %v878_v47 = vmul.f32 %v876_v6, %v3133_v25  ;;  %v3290_v13 = vpop.permute.xlu2 %1130  ;;  %v2403_v1 = vld [vmem:[%s3841_s1 + $0x30] sm:$0xf] }
 0x19c   :  { %1553 = vperm.xlu2 %2475, %v2411_v49   ;;  %v890_v32 = vmul.f32 %v888_v31, %v3040_v16  ;;  %v891_v38 = vmul.f32 %v889_v60, %v3040_v16  ;;  %1403 = vperm.xlu1 %2474, %v2402_v4   ;;  %v914_v37 = vperm.slane %v866_v20, 3  ;;  %v915_v2 = vperm.slane %v867_v43, 3  ;;  %v2414_v16 = vld [vmem:[%s3841_s1 + $0x5c] sm:$0xf] }
 0x19d   :  { %v964_v58 = vpop.permute.xlu0 %963  ;;  %v879_v19 = vadd.f32 %v877_v45, %v858_v28  ;;  %v880_v14 = vadd.f32 %v878_v47, %v859_v0  ;;  %v903_v41 = vmul.f32 %v901_v34, %v3042_v17  ;;  %v904_v53 = vmul.f32 %v902_v36, %v3042_v17 }
 0x19e   :  { %v973_v40 = vpop.permute.xlu1 %972  ;;  %v927_v57 = vperm.slane %v3007_v39, 0  ;;  %v916_v12 = vmul.f32 %v914_v37, %v3141_v63  ;;  %v917_v3 = vmul.f32 %v915_v2, %v3141_v63  ;;  %v940_v20 = vperm.slane %v3007_v39, 1 }
 0x19f   :  { %v892_v55 = vadd.f32 %v890_v32, %v879_v19  ;;  %v893_v25 = vadd.f32 %v891_v38, %v880_v14  ;;  %v953_v18 = vperm.slane %v3007_v39, 2  ;;  %v954_v31 = vperm.slane %v3009_v11, 2  ;;  %v2415_v32 = vld [vmem:[%s3841_s1 + $0x60] sm:$0xf] }
 0x1a0   :  { %v929_v17 = vmul.f32 %v927_v57, %v3060_v27  ;;  %v942_v63 = vmul.f32 %v940_v20, %v3066_v46  ;;  %v976_v27 = vsel %vm3922_vm4, %v973_v40, %v3161_v33  ;;  %v977_v0 = vsel %vm3923_vm7, %v3161_v33, %v973_v40  ;;  %v3334_v2 = vld.sshfl [vmem:[#allocation1] sm:$0xff pattern:$0x75316420]  ;;  %v3336_v40 = vld.sshfl [vmem:[#allocation1 + $0x8] sm:$0xff pattern:$0x75316420] }
 0x1a1   :  { %v905_v9 = vadd.f32 %v903_v41, %v892_v55  ;;  %v906_v10 = vadd.f32 %v904_v53, %v893_v25  ;;  %v955_v34 = vmul.f32 %v953_v18, %v3152_v23  ;;  %v956_v46 = vmul.f32 %v954_v31, %v3152_v23  ;;  %1659 = vst [vmem:[#allocation1] ss:$2 sm:$0xff] %v3056_v22 }
 0x1a2   :  { %v978_v19 = vsel %vm2798_vm8, %v976_v27, 0.0  ;;  %v979_v23 = vsel %vm2808_vm9, %v977_v0, 0.0  ;;  %vm3924_vm4 = vcmp.lt.s32.totalorder %v2670_v52, 113  ;;  %vm3926_vm9 = vnez %v3908_v61 }
 0x1a3   :  { %1419 = vrot.lane.b32.xlu0 %v3207_v54, %s2507_s22  ;;  %v918_v43 = vadd.f32 %v916_v12, %v905_v9  ;;  %v919_v49 = vadd.f32 %v917_v3, %v906_v10  ;;  %v967_v54 = vperm.slane %v3009_v11, 3  ;;  %v966_v11 = vperm.slane %v3007_v39, 3  ;;  %v3332_v14 = vpop.permute.xlu2 %1154  ;;  %vm3925_vm7 = vmmov %vm3924_vm4 }
 0x1a4   :  { %1589 = vperm.xlu2 %2475, %v2414_v16   ;;  %1428 = vperm.xlu1 %2474, %v2403_v1   ;;  %v987_v25 = vperm.slane %v978_v19, 0  ;;  %v988_v41 = vperm.slane %v979_v23, 0  ;;  %v1000_v3 = vperm.slane %v978_v19, 1  ;;  %v1001_v1 = vperm.slane %v979_v23, 1 }
 0x1a5   :  { %v985_v6 = vpop.permute.xlu0 %984  ;;  %v931_v60 = vadd.f32 %v929_v17, %v918_v43  ;;  %v932_v4 = vadd.f32 %v3064_v29, %v919_v49  ;;  %v2405_v29 = vld [vmem:[%s3841_s1 + $0x38] sm:$0xf]  ;;  %v969_v47 = vmul.f32 %v967_v54, %v964_v58  ;;  %v968_v39 = vmul.f32 %v966_v11, %v964_v58  ;;  %v2408_v58 = vld [vmem:[%s3841_s1 + $0x44] sm:$0xf]  ;;  %v2418_v17 = vld [vmem:[%s3841_s1 + $0x6c] sm:$0xf] }
 0x1a6   :  { %v998_v28 = vpop.permute.xlu1 %997  ;;  %v989_v16 = vmul.f32 %v987_v25, %v985_v6  ;;  %v990_v9 = vmul.f32 %v988_v41, %v985_v6  ;;  %v1013_v20 = vperm.slane %v978_v19, 2  ;;  %v1014_v43 = vperm.slane %v979_v23, 2  ;;  %v2409_v49 = vld [vmem:[%s3841_s1 + $0x48] sm:$0xf] }
 0x1a7   :  { %v944_v36 = vadd.f32 %v942_v63, %v931_v60  ;;  %v945_v45 = vadd.f32 %v3069_v59, %v932_v4  ;;  %v2406_v59 = vld [vmem:[%s3841_s1 + $0x3c] sm:$0xf]  ;;  %v1002_v18 = vmul.f32 %v1000_v3, %v998_v28  ;;  %v1003_v6 = vmul.f32 %v1001_v1, %v998_v28 }
 0x1a9   :  { %v957_v38 = vadd.f32 %v955_v34, %v944_v36  ;;  %v958_v33 = vadd.f32 %v956_v46, %v945_v45  ;;  %v1015_v46 = vmul.f32 %v1013_v20, %v3173_v44  ;;  %v1016_v36 = vmul.f32 %v1014_v43, %v3173_v44  ;;  %v3369_v44 = vld.sshfl [vmem:[#allocation1 + $0x8] sm:$0xff pattern:$0x75316420]  ;;  %v2422_v20 = vld [vmem:[%s3841_s1 + $0x7c] sm:$0xf] }
 0x1aa   :  { %v1027_v45 = vperm.slane %v979_v23, 3 }
 0x1ab   :  { %1452 = vperm.xlu0 %2476, %v2405_v29   ;;  %v971_v37 = vadd.f32 %v969_v47, %v958_v33  ;;  %v970_v55 = vadd.f32 %v968_v39, %v957_v38  ;;  %v3354_v60 = vpop.permute.xlu2 %1190  ;;  %v2419_v38 = vld [vmem:[%s3841_s1 + $0x70] sm:$0xf] }
 0x1ac   :  { %1614 = vperm.xlu2 %2475, %v2415_v32   ;;  %1464 = vperm.xlu1 %2474, %v2406_v59  }
 0x1ad   :  { %v1024_v53 = vpop.permute.xlu0 %1023  ;;  %v991_v10 = vadd.f32 %v989_v16, %v970_v55  ;;  %v992_v12 = vadd.f32 %v990_v9, %v971_v37  ;;  %v3367_v55 = vld.sshfl [vmem:[#allocation1] sm:$0xff pattern:$0x75316420] }
 0x1ae   :  { %v1033_v57 = vpop.permute.xlu1 %1032  ;;  %v1029_v59 = vmul.f32 %v1027_v45, %v1024_v53  ;;  %1720 = vst [vmem:[#allocation1] ss:$2 sm:$0xff] %v3056_v22 }
 0x1af   :  { %v1036_v63 = vsel %vm3924_vm4, %v1033_v57, %v3193_v35  ;;  %v1037_v31 = vsel %vm3925_vm7, %v3193_v35, %v1033_v57  ;;  %v1004_v4 = vadd.f32 %v1002_v18, %v991_v10  ;;  %v1005_v54 = vadd.f32 %v1003_v6, %v992_v12 }
 0x1b0   :  { %v1038_v0 = vsel %vm2948_vm13, %v1036_v63, 0.0  ;;  %v1039_v28 = vsel %vm3926_vm9, %v1037_v31, 0.0  ;;  %v1026_v35 = vperm.slane %v978_v19, 3  ;;  %vm3927_vm4 = vcmp.lt.s32.totalorder %v2670_v52, 112 }
 0x1b1   :  { %v1017_v29 = vadd.f32 %v1015_v46, %v1004_v4  ;;  %v1018_v11 = vadd.f32 %v1016_v36, %v1005_v54  ;;  %v1047_v47 = vperm.slane %v1038_v0, 0  ;;  %v1048_v32 = vperm.slane %v1039_v28, 0  ;;  %vm3928_vm7 = vmmov %vm3927_vm4 }
 0x1b2   :  { %v1028_v33 = vmul.f32 %v1026_v35, %v1024_v53  ;;  %v1060_v41 = vperm.slane %v1038_v0, 1  ;;  %v1061_v53 = vperm.slane %v1039_v28, 1  ;;  %v1073_v12 = vperm.slane %v1038_v0, 2 }
 0x1b3   :  { %1492 = vperm.xlu0 %2476, %v2408_v58   ;;  %v1031_v23 = vadd.f32 %v1029_v59, %v1018_v11  ;;  %v3374_v16 = vpop.permute.xlu2 %1236  ;;  %v1074_v3 = vperm.slane %v1039_v28, 2  ;;  %v1086_v63 = vperm.slane %v1038_v0, 3  ;;  %v1087_v31 = vperm.slane %v1039_v28, 3 }
 0x1b4   :  { %1650 = vperm.xlu2 %2475, %v2418_v17   ;;  %1508 = vperm.xlu1 %2474, %v2409_v49   ;;  %v1030_v19 = vadd.f32 %v1028_v33, %v1017_v29  ;;  %v1075_v4 = vmul.f32 %v1073_v12, %v3227_v50 }
 0x1b5   :  { %v1045_v27 = vpop.permute.xlu0 %1044  ;;  %v1076_v54 = vmul.f32 %v1074_v3, %v3227_v50  ;;  %v2423_v50 = vld [vmem:[%s3841_s1 + $0x80] sm:$0xf] }
 0x1b6   :  { %v1058_v34 = vpop.permute.xlu1 %1057  ;;  %v1049_v39 = vmul.f32 %v1047_v47, %v1045_v27  ;;  %v1050_v37 = vmul.f32 %v1048_v32, %v1045_v27 }
 0x1b7   :  { %v1062_v1 = vmul.f32 %v1060_v41, %v1058_v34  ;;  %v1063_v17 = vmul.f32 %v1061_v53, %v1058_v34 }
 0x1b8   :  { %v1051_v9 = vadd.f32 %v1049_v39, %v1030_v19 }
 0x1ba   :  { %v1064_v18 = vadd.f32 %v1062_v1, %v1051_v9 }
 0x1bb   :  { %1542 = vrot.lane.b32.xlu0 %v3280_v21, %s2508_s17  ;;  %v1052_v21 = vadd.f32 %v1050_v37, %v1031_v23 }
 0x1bc   :  { %1675 = vperm.xlu2 %2475, %v2419_v38   ;;  %1544 = vrot.lane.b32.xlu1 %v3282_v48, %s2508_s17  ;;  %v2412_v48 = vld [vmem:[%s3841_s1 + $0x54] sm:$0xf]  ;;  %v1077_v29 = vadd.f32 %v1075_v4, %v1064_v18  ;;  %v3397_v38 = vpop.permute.xlu2 %1257 }
 0x1bd   :  { %v1084_v25 = vpop.permute.xlu0 %1083  ;;  %v1065_v6 = vadd.f32 %v1063_v17, %v1052_v21 }
 0x1be   :  { %v1093_v57 = vpop.permute.xlu1 %1092  ;;  %v1088_v27 = vmul.f32 %v1086_v63, %v1084_v25  ;;  %v1089_v34 = vmul.f32 %v1087_v31, %v1084_v25 }
 0x1bf   :  { %v1096_v58 = vsel %vm3927_vm4, %v1093_v57, %v3255_v56  ;;  %v1097_v10 = vsel %vm3928_vm7, %v3255_v56, %v1093_v57  ;;  %v2413_v56 = vld [vmem:[%s3841_s1 + $0x58] sm:$0xf]  ;;  %v1078_v11 = vadd.f32 %v1076_v54, %v1065_v6  ;;  %vm3929_vm4 = vcmp.lt.s32.totalorder %v2670_v52, 111 }
 0x1c0   :  { %v1098_v43 = vsel %vm2929_vm15, %v1096_v58, 0.0  ;;  %v1099_v49 = vsel %vm2938_vm14, %v1097_v10, 0.0  ;;  %v1090_v0 = vadd.f32 %v1088_v27, %v1077_v29  ;;  %vm3930_vm7 = vmmov %vm3929_vm4 }
 0x1c1   :  { %v1107_v36 = vperm.slane %v1098_v43, 0  ;;  %v1108_v35 = vperm.slane %v1099_v49, 0  ;;  %v1091_v28 = vadd.f32 %v1089_v34, %v1078_v11  ;;  %v1120_v39 = vperm.slane %v1098_v43, 1 }
 0x1c2   :  { %v1121_v37 = vperm.slane %v1099_v49, 1  ;;  %v1133_v19 = vperm.slane %v1098_v43, 2  ;;  %v1134_v23 = vperm.slane %v1099_v49, 2  ;;  %v1146_v57 = vperm.slane %v1098_v43, 3  ;;  %v3931_v43 = vld [vmem:[#allocation10_spill] sm:$0xff] }
 0x1c3   :  { %1565 = vperm.xlu0 %2476, %v2412_v48   ;;  %v1147_v9 = vperm.slane %v1099_v49, 3  ;;  %vm3932_vm14 = vnez %v3931_v43 }
 0x1c4   :  { %1711 = vperm.xlu2 %2475, %v2422_v20   ;;  %1577 = vperm.xlu1 %2474, %v2413_v56   ;;  %v1135_v3 = vmul.f32 %v1133_v19, %v3290_v13  ;;  %v1136_v48 = vmul.f32 %v1134_v23, %v3290_v13  ;;  %v2417_v13 = vld [vmem:[%s3841_s1 + $0x68] sm:$0xf]  ;;  %v3427_v56 = vpop.permute.xlu2 %1295 }
 0x1c5   :  { %v1105_v46 = vpop.permute.xlu0 %1104 }
 0x1c6   :  { %v1118_v45 = vpop.permute.xlu1 %1117  ;;  %v1109_v47 = vmul.f32 %v1107_v36, %v1105_v46  ;;  %v1110_v32 = vmul.f32 %v1108_v35, %v1105_v46 }
 0x1c7   :  { %v1122_v25 = vmul.f32 %v1120_v39, %v1118_v45  ;;  %v1123_v41 = vmul.f32 %v1121_v37, %v1118_v45 }
 0x1c8   :  { %v1111_v33 = vadd.f32 %v1109_v47, %v1090_v0  ;;  %v1112_v59 = vadd.f32 %v1110_v32, %v1091_v28 }
 0x1ca   :  { %v1124_v58 = vadd.f32 %v1122_v25, %v1111_v33  ;;  %v1125_v10 = vadd.f32 %v1123_v41, %v1112_v59 }
 0x1cb   :  { %1603 = vrot.lane.b32.xlu0 %v3334_v2, %s2509_s27 }
 0x1cc   :  { %1736 = vperm.xlu2 %2475, %v2423_v50   ;;  %1605 = vrot.lane.b32.xlu1 %v3336_v40, %s2509_s27  ;;  %v2416_v40 = vld [vmem:[%s3841_s1 + $0x64] sm:$0xf]  ;;  %v1137_v18 = vadd.f32 %v1135_v3, %v1124_v58  ;;  %v1138_v6 = vadd.f32 %v1136_v48, %v1125_v10  ;;  %v3433_v23 = vpop.permute.xlu2 %1318 }
 0x1cd   :  { %v1144_v53 = vpop.permute.xlu0 %1143 }
 0x1ce   :  { %v1153_v21 = vpop.permute.xlu1 %1152  ;;  %v1148_v1 = vmul.f32 %v1146_v57, %v1144_v53  ;;  %v1149_v17 = vmul.f32 %v1147_v9, %v1144_v53 }
 0x1cf   :  { %v1156_v12 = vsel %vm3929_vm4, %v1153_v21, %v3332_v14  ;;  %v1157_v2 = vsel %vm3930_vm7, %v3332_v14, %v1153_v21  ;;  %v2426_v14 = vld [vmem:[%s3841_s1 + $0x8c] sm:$0xf]  ;;  %vm3873_vm4 = vcmask 1043456   ;;  %vm3934_vm7 = vcmp.lt.s32.totalorder %v2670_v52, 17 }
 0x1d0   :  { %v1158_v20 = vsel %vm2982_vm10, %v1156_v12, 0.0  ;;  %v1159_v49 = vsel %vm3932_vm14, %v1157_v2, 0.0  ;;  %v1150_v4 = vadd.f32 %v1148_v1, %v1137_v18  ;;  %v1151_v54 = vadd.f32 %v1149_v17, %v1138_v6  ;;  %v3933_v17 = vld [vmem:[#allocation5_spill] sm:$0xff]  ;;  %v2424_v6 = vld [vmem:[%s3841_s1 + $0x84] sm:$0xf] }
 0x1d1   :  { %v1167_v63 = vperm.slane %v1158_v20, 0  ;;  %v1168_v31 = vperm.slane %v1159_v49, 0  ;;  %v1180_v36 = vperm.slane %v1158_v20, 1  ;;  %v1181_v35 = vperm.slane %v1159_v49, 1 }
 0x1d2   :  { %v1193_v29 = vperm.slane %v1158_v20, 2  ;;  %v1194_v11 = vperm.slane %v1159_v49, 2  ;;  %v1206_v59 = vperm.slane %v1158_v20, 3  ;;  %v1207_v39 = vperm.slane %v1159_v49, 3 }
 0x1d3   :  { %1626 = vperm.xlu0 %2476, %v2416_v40   ;;  %v1721_v49 = vld.sshfl [vmem:[#allocation1] sm:$0xff pattern:$0x75316420] }
 0x1d4   :  { %1772 = vperm.xlu2 %2475, %v2426_v14   ;;  %1638 = vperm.xlu1 %2474, %v2417_v13   ;;  %v1195_v37 = vmul.f32 %v1193_v29, %v3354_v60  ;;  %v1196_v19 = vmul.f32 %v1194_v11, %v3354_v60  ;;  %v2421_v60 = vld [vmem:[%s3841_s1 + $0x78] sm:$0xf]  ;;  %v3444_v1 = vpop.permute.xlu2 %1356  ;;  %v1722_v14 = vld.sshfl [vmem:[#allocation1 + $0x8] sm:$0xff pattern:$0x75316420] }
 0x1d5   :  { %v1165_v27 = vpop.permute.xlu0 %1164  ;;  %v1781_v29 = vld [vmem:[%s3842_s2] sm:$0xf] }
 0x1d6   :  { %v1169_v34 = vmul.f32 %v1167_v63, %v1165_v27  ;;  %v1170_v46 = vmul.f32 %v1168_v31, %v1165_v27  ;;  %v1178_v45 = vpop.permute.xlu1 %1177  ;;  %v2425_v31 = vld [vmem:[%s3841_s1 + $0x88] sm:$0xf] }
 0x1d7   :  { %v1182_v0 = vmul.f32 %v1180_v36, %v1178_v45  ;;  %v1183_v28 = vmul.f32 %v1181_v35, %v1178_v45 }
 0x1d8   :  { %v1171_v47 = vadd.f32 %v1169_v34, %v1150_v4  ;;  %v1172_v32 = vadd.f32 %v1170_v46, %v1151_v54  ;;  %v2459_v34 = vld [vmem:[%s3843_s3 + $0x84] sm:$0xf] }
 0x1da   :  { %v1184_v50 = vadd.f32 %v1182_v0, %v1171_v47  ;;  %v1185_v33 = vadd.f32 %v1183_v28, %v1172_v32 }
 0x1db   :  { %1664 = vrot.lane.b32.xlu0 %v3367_v55, %s2510_s14  ;;  %v2420_v55 = vld [vmem:[%s3841_s1 + $0x74] sm:$0xf] }
 0x1dc   :  { %1666 = vrot.lane.b32.xlu1 %v3369_v44, %s2510_s14  ;;  %v1197_v57 = vadd.f32 %v1195_v37, %v1184_v50  ;;  %v1198_v21 = vadd.f32 %v1196_v19, %v1185_v33  ;;  %v3452_v63 = vpop.permute.xlu2 %1379 }
 0x1dd   :  { %v1204_v25 = vpop.permute.xlu0 %1203 }
 0x1de   :  { %v1208_v41 = vmul.f32 %v1206_v59, %v1204_v25  ;;  %v1209_v53 = vmul.f32 %v1207_v39, %v1204_v25  ;;  %v1216_v9 = vpop.permute.xlu1 %1215 }
 0x1e0   :  { %v1210_v58 = vadd.f32 %v1208_v41, %v1197_v57  ;;  %v1211_v10 = vadd.f32 %v1209_v53, %v1198_v21 }
 0x1e2   :  { %v1219_v12 = vadd.f32 %v1216_v9, %v1211_v10  ;;  %v1218_v44 = vadd.f32 %v1216_v9, %v1210_v58 }
 0x1e3   :  { %1687 = vperm.xlu0 %2476, %v2420_v55  }
 0x1e4   :  { %v1222_v2 = vrot.slane %v1219_v12, 4  ;;  %1699 = vperm.xlu1 %2474, %v2421_v60   ;;  %v3470_v28 = vpop.permute.xlu2 %1417 }
 0x1e5   :  { %v1239_v3 = vpop.permute.xlu0 %1238 }
 0x1e6   :  { %v1224_v48 = vsel %vm3873_vm4, %v1218_v44, %v1222_v2  ;;  %v1248_v40 = vpop.permute.xlu1 %1247  ;;  %v1240_v4 = vsel %vm3934_vm7, %v3374_v16, %v1239_v3  ;;  %vm3935_vm4 = vmmov %vm3934_vm7 }
 0x1e7   :  { %v1226_v20 = vadd.f32 %v1224_v48, %v3933_v17  ;;  %v1241_v54 = vsel %vm3935_vm4, %v1239_v3, %v3374_v16  ;;  %v1243_v35 = vsel %vm2732_vm6, %v1240_v4, 0.0  ;;  %vm3938_vm4 = vcmp.lt.s32.totalorder %v2670_v52, 16 }
 0x1e8   :  { %v1242_v46 = vsel %vm2724_vm5, %v1241_v54, 0.0  ;;  %v1261_v47 = vperm.slane %v1243_v35, 1  ;;  %v1251_v0 = vperm.slane %v1243_v35, 0  ;;  %vm3939_vm7 = vmmov %vm3938_vm4  ;;  %v1273_v59 = vperm.slane %v1243_v35, 2 }
 0x1e9   :  { %1227 = vst [vmem:[#allocation2] sm:$0xff] %v1226_v20  ;;  %v1260_v11 = vperm.slane %v1242_v46, 1  ;;  %v1250_v32 = vperm.slane %v1242_v46, 0  ;;  %v1272_v33 = vperm.slane %v1242_v46, 2  ;;  %v1284_v48 = vperm.slane %v1242_v46, 3 }
 0x1ea   :  { %v1263_v37 = vmul.f32 %v1261_v47, %v3397_v38  ;;  %v1253_v25 = vmul.f32 %v1251_v0, %v1248_v40 }
 0x1eb   :  { %1725 = vrot.lane.b32.xlu0 %v1721_v49, %s2511_s25  ;;  %v1262_v39 = vmul.f32 %v1260_v11, %v3397_v38  ;;  %v1252_v19 = vmul.f32 %v1250_v32, %v1248_v40  ;;  %v1285_v40 = vperm.slane %v1243_v35, 3  ;;  %v2429_v11 = vld [vmem:[%s3843_s3 + $0xc] sm:$0xf] }
 0x1ec   :  { %1727 = vrot.lane.b32.xlu1 %v1722_v14, %s2511_s25  ;;  %v1265_v60 = vadd.f32 %v1263_v37, %v1253_v25  ;;  %v3487_v17 = vpop.permute.xlu2 %1440 }
 0x1ed   :  { %v1270_v13 = vpop.permute.xlu0 %1269  ;;  %v1264_v12 = vadd.f32 %v1262_v39, %v1252_v19 }
 0x1ee   :  { %v1282_v18 = vpop.permute.xlu1 %1281  ;;  %v1274_v58 = vmul.f32 %v1272_v33, %v1270_v13  ;;  %v1275_v10 = vmul.f32 %v1273_v59, %v1270_v13 }
 0x1ef   :  { %v1286_v20 = vmul.f32 %v1284_v48, %v1282_v18  ;;  %v1287_v49 = vmul.f32 %v1285_v40, %v1282_v18 }
 0x1f0   :  { %v1276_v2 = vadd.f32 %v1274_v58, %v1264_v12  ;;  %v1277_v3 = vadd.f32 %v1275_v10, %v1265_v60 }
 0x1f2   :  { %v1289_v4 = vadd.f32 %v1287_v49, %v1277_v3 }
 0x1f3   :  { %1748 = vperm.xlu0 %2476, %v2424_v6  }
 0x1f4   :  { %1760 = vperm.xlu1 %2474, %v2425_v31   ;;  %v1288_v31 = vadd.f32 %v1286_v20, %v1276_v2  ;;  %v3504_v58 = vpop.permute.xlu2 %1476 }
 0x1f5   :  { %v1298_v27 = vpop.permute.xlu0 %1297 }
 0x1f6   :  { %v1307_v45 = vpop.permute.xlu1 %1306  ;;  %v1299_v16 = vsel %vm3938_vm4, %v3427_v56, %v1298_v27  ;;  %v1300_v50 = vsel %vm3939_vm7, %v1298_v27, %v3427_v56  ;;  %v1801_v56 = vld [vmem:[%s3843_s3] sm:$0xf]  ;;  %vm3942_vm4 = vcmp.lt.s32.totalorder %v2670_v52, 15 }
 0x1f7   :  { %v1301_v57 = vsel %vm2696_vm0, %v1300_v50, 0.0  ;;  %v1302_v21 = vsel %vm2709_vm2, %v1299_v16, 0.0  ;;  %vm3943_vm7 = vmmov %vm3942_vm4 }
 0x1f8   :  { %v1309_v44 = vperm.slane %v1301_v57, 0  ;;  %v1310_v38 = vperm.slane %v1302_v21, 0  ;;  %v1321_v54 = vperm.slane %v1301_v57, 1  ;;  %v1322_v27 = vperm.slane %v1302_v21, 1 }
 0x1f9   :  { %v1333_v0 = vperm.slane %v1301_v57, 2  ;;  %v1334_v16 = vperm.slane %v1302_v21, 2 }
 0x1fa   :  { %v1311_v14 = vmul.f32 %v1309_v44, %v1307_v45  ;;  %v1312_v13 = vmul.f32 %v1310_v38, %v1307_v45  ;;  %v1323_v45 = vmul.f32 %v1321_v54, %v3433_v23  ;;  %v1324_v32 = vmul.f32 %v1322_v27, %v3433_v23  ;;  %v2430_v23 = vld [vmem:[%s3843_s3 + $0x10] sm:$0xf] }
 0x1fb   :  { %1784 = vperm.xlu0 %2476, %v1781_v29   ;;  %v1345_v44 = vperm.slane %v1301_v57, 3  ;;  %v1346_v38 = vperm.slane %v1302_v21, 3 }
 0x1fc   :  { %v1313_v47 = vadd.f32 %v1311_v14, %v1288_v31  ;;  %v1314_v46 = vadd.f32 %v1312_v13, %v1289_v4  ;;  %v3518_v54 = vpop.permute.xlu2 %1524 }
 0x1fd   :  { %v1331_v41 = vpop.permute.xlu0 %1330 }
 0x1fe   :  { %v1343_v55 = vpop.permute.xlu1 %1342  ;;  %v1325_v59 = vadd.f32 %v1323_v45, %v1313_v47  ;;  %v1326_v39 = vadd.f32 %v1324_v32, %v1314_v46  ;;  %v1335_v37 = vmul.f32 %v1333_v0, %v1331_v41  ;;  %v1336_v19 = vmul.f32 %v1334_v16, %v1331_v41 }
 0x1ff   :  { %v1347_v2 = vmul.f32 %v1345_v44, %v1343_v55  ;;  %v1348_v3 = vmul.f32 %v1346_v38, %v1343_v55  ;;  %v2433_v55 = vld [vmem:[%s3843_s3 + $0x1c] sm:$0xf] }
 0x200   :  { %v1337_v12 = vadd.f32 %v1335_v37, %v1325_v59  ;;  %v1338_v60 = vadd.f32 %v1336_v19, %v1326_v39 }
 0x202   :  { %v1349_v41 = vadd.f32 %v1347_v2, %v1337_v12  ;;  %v1350_v20 = vadd.f32 %v1348_v3, %v1338_v60 }
 0x203   :  { %1804 = vperm.xlu0 %2476, %v1801_v56  }
 0x204   :  { %v3529_v38 = vpop.permute.xlu2 %1553 }
 0x205   :  { %v1359_v6 = vpop.permute.xlu0 %1358 }
 0x206   :  { %v1368_v29 = vpop.permute.xlu1 %1367  ;;  %v1360_v35 = vsel %vm3942_vm4, %v3444_v1, %v1359_v6  ;;  %v1361_v18 = vsel %vm3943_vm7, %v1359_v6, %v3444_v1  ;;  %vm3944_vm4 = vcmp.lt.s32.totalorder %v2670_v52, 1 }
 0x207   :  { %v1362_v50 = vsel %vm2819_vm11, %v1361_v18, 0.0  ;;  %v1363_v33 = vsel %vm2827_vm12, %v1360_v35, 0.0  ;;  %vm3945_vm7 = vmmov %vm3944_vm4 }
 0x208   :  { %v1370_v1 = vperm.slane %v1362_v50, 0  ;;  %v1371_v10 = vperm.slane %v1363_v33, 0  ;;  %v1382_v49 = vperm.slane %v1362_v50, 1  ;;  %v1383_v14 = vperm.slane %v1363_v33, 1 }
 0x209   :  { %v1395_v47 = vperm.slane %v1363_v33, 2  ;;  %v1406_v19 = vperm.slane %v1362_v50, 3 }
 0x20a   :  { %v1372_v48 = vmul.f32 %v1370_v1, %v1368_v29  ;;  %v1373_v40 = vmul.f32 %v1371_v10, %v1368_v29  ;;  %v1384_v27 = vmul.f32 %v1382_v49, %v3452_v63  ;;  %v1385_v29 = vmul.f32 %v1383_v14, %v3452_v63  ;;  %v2434_v10 = vld [vmem:[%s3843_s3 + $0x20] sm:$0xf] }
 0x20b   :  { %1838 = vperm.xlu0 %2476, %v2429_v11   ;;  %v1394_v11 = vperm.slane %v1362_v50, 2  ;;  %v1407_v63 = vperm.slane %v1363_v33, 3 }
 0x20c   :  { %v1374_v6 = vadd.f32 %v1372_v48, %v1349_v41  ;;  %v1375_v31 = vadd.f32 %v1373_v40, %v1350_v20 }
 0x20d   :  { %v1392_v25 = vpop.permute.xlu0 %1391 }
 0x20e   :  { %v1404_v56 = vpop.permute.xlu1 %1403  ;;  %v1387_v18 = vadd.f32 %v1385_v29, %v1375_v31  ;;  %v1396_v45 = vmul.f32 %v1394_v11, %v1392_v25  ;;  %v1397_v32 = vmul.f32 %v1395_v47, %v1392_v25  ;;  %v1496_v29 = vperm.slane %v3056_v22, 5 }
 0x20f   :  { %v1409_v12 = vmul.f32 %v1407_v63, %v1404_v56  ;;  %v2438_v63 = vld [vmem:[%s3843_s3 + $0x30] sm:$0xf] }
 0x210   :  { %v1399_v37 = vadd.f32 %v1397_v32, %v1387_v18 }
 0x212   :  { %v1411_v2 = vadd.f32 %v1409_v12, %v1399_v37  ;;  %v1500_v37 = vperm.slane %v1496_v29, 1  ;;  %v1511_v12 = vperm.slane %v3056_v22, 2 }
 0x213   :  { %1858 = vperm.xlu0 %2476, %v2430_v23   ;;  %v1408_v23 = vmul.f32 %v1406_v19, %v1404_v56  ;;  %v2437_v56 = vld [vmem:[%s3843_s3 + $0x2c] sm:$0xf] }
 0x215   :  { %v1420_v13 = vpop.permute.xlu0 %1419 }
 0x216   :  { %v1421_v4 = vsel %vm3944_vm4, %v3470_v28, %v1420_v13  ;;  %v1422_v57 = vsel %vm3945_vm7, %v1420_v13, %v3470_v28  ;;  %v1429_v21 = vpop.permute.xlu1 %1428  ;;  %v1386_v28 = vadd.f32 %v1384_v27, %v1374_v6  ;;  %v1495_v27 = vperm.slane %v3056_v22, 1 }
 0x217   :  { %v1423_v46 = vsel %vm2702_vm1, %v1422_v57, 0.0  ;;  %v1424_v35 = vsel %vm2715_vm3, %v1421_v4, 0.0  ;;  %vm3946_vm4 = vcmp.lt.s32.totalorder %v2670_v52, 127  ;;  %vm3948_vm3 = vnez %v3896_v15 }
 0x218   :  { %v1431_v0 = vperm.slane %v1423_v46, 0  ;;  %v1432_v16 = vperm.slane %v1424_v35, 0  ;;  %v1398_v39 = vadd.f32 %v1396_v45, %v1386_v28  ;;  %v1443_v3 = vperm.slane %v1423_v46, 1  ;;  %vm3947_vm7 = vmmov %vm3946_vm4 }
 0x219   :  { %v1444_v48 = vperm.slane %v1424_v35, 1  ;;  %v1455_v49 = vperm.slane %v1423_v46, 2  ;;  %v1456_v14 = vperm.slane %v1424_v35, 2  ;;  %v1467_v28 = vperm.slane %v1423_v46, 3 }
 0x21a   :  { %v1433_v60 = vmul.f32 %v1431_v0, %v1429_v21  ;;  %v1434_v44 = vmul.f32 %v1432_v16, %v1429_v21  ;;  %v1410_v25 = vadd.f32 %v1408_v23, %v1398_v39  ;;  %v1445_v33 = vmul.f32 %v1443_v3, %v3487_v17 }
 0x21b   :  { %1894 = vperm.xlu0 %2476, %v2433_v55   ;;  %v1446_v20 = vmul.f32 %v1444_v48, %v3487_v17  ;;  %v1479_v21 = vperm.slane %v3056_v22, 0  ;;  %v1480_v55 = vperm.slane %v3056_v22, 4  ;;  %v3540_v17 = vpop.permute.xlu2 %1589  ;;  %v1468_v18 = vperm.slane %v1424_v35, 3 }
 0x21c   :  { %v1435_v40 = vadd.f32 %v1433_v60, %v1410_v25  ;;  %v1436_v41 = vadd.f32 %v1434_v44, %v1411_v2  ;;  %v1499_v39 = vperm.slane %v1495_v27, 1  ;;  %v1512_v60 = vperm.slane %v3056_v22, 6 }
 0x21d   :  { %v1453_v59 = vpop.permute.xlu0 %1452  ;;  %v1483_v32 = vperm.slane %v1479_v21, 0  ;;  %v1484_v0 = vperm.slane %v1480_v55, 0  ;;  %v1527_v3 = vperm.slane %v3056_v22, 3  ;;  %v1528_v48 = vperm.slane %v3056_v22, 7  ;;  %v2441_v21 = vld [vmem:[%s3843_s3 + $0x3c] sm:$0xf] }
 0x21e   :  { %v1465_v1 = vpop.permute.xlu1 %1464  ;;  %v1447_v6 = vadd.f32 %v1445_v33, %v1435_v40  ;;  %v1448_v31 = vadd.f32 %v1446_v20, %v1436_v41  ;;  %v1457_v4 = vmul.f32 %v1455_v49, %v1453_v59  ;;  %v1458_v57 = vmul.f32 %v1456_v14, %v1453_v59 }
 0x21f   :  { %v1469_v16 = vmul.f32 %v1467_v28, %v1465_v1  ;;  %v1470_v59 = vmul.f32 %v1468_v18, %v1465_v1  ;;  %v1485_v46 = vmul.f32 %v1483_v32, %v3504_v58  ;;  %v1486_v35 = vmul.f32 %v1484_v0, %v3504_v58 }
 0x220   :  { %v1459_v11 = vadd.f32 %v1457_v4, %v1447_v6  ;;  %v1460_v47 = vadd.f32 %v1458_v57, %v1448_v31  ;;  %v1515_v33 = vperm.slane %v1511_v12, 2  ;;  %v1516_v20 = vperm.slane %v1512_v60, 2 }
 0x221   :  { %v1531_v4 = vperm.slane %v1527_v3, 3  ;;  %v1532_v57 = vperm.slane %v1528_v48, 3 }
 0x222   :  { %v1472_v23 = vadd.f32 %v1470_v59, %v1460_v47 }
 0x223   :  { %1914 = vperm.xlu0 %2476, %v2434_v10   ;;  %v1471_v10 = vadd.f32 %v1469_v16, %v1459_v11  ;;  %v1615_v14 = vpop.permute.xlu2 %1614  ;;  %v1533_v18 = vmul.f32 %v1531_v4, %v3518_v54 }
 0x224   :  { %v1488_v41 = vadd.f32 %v1486_v35, %v1472_v23 }
 0x225   :  { %v1493_v50 = vpop.permute.xlu0 %1492  ;;  %v1487_v40 = vadd.f32 %v1485_v46, %v1471_v10 }
 0x226   :  { %v1509_v13 = vpop.permute.xlu1 %1508  ;;  %v1501_v44 = vmul.f32 %v1499_v39, %v1493_v50  ;;  %v1502_v25 = vmul.f32 %v1500_v37, %v1493_v50 }
 0x227   :  { %v1517_v55 = vmul.f32 %v1515_v33, %v1509_v13  ;;  %v1518_v27 = vmul.f32 %v1516_v20, %v1509_v13 }
 0x228   :  { %v1504_v6 = vadd.f32 %v1502_v25, %v1488_v41 }
 0x22a   :  { %v1520_v28 = vadd.f32 %v1518_v27, %v1504_v6 }
 0x22b   :  { %1950 = vperm.xlu0 %2476, %v2437_v56   ;;  %v1503_v56 = vadd.f32 %v1501_v44, %v1487_v40  ;;  %v1651_v60 = vpop.permute.xlu2 %1650 }
 0x22d   :  { %v1543_v45 = vpop.permute.xlu0 %1542  ;;  %v1519_v47 = vadd.f32 %v1517_v55, %v1503_v56 }
 0x22e   :  { %v1545_v19 = vpop.permute.xlu1 %1544 }
 0x22f   :  { %v1546_v1 = vsel %vm3946_vm4, %v1543_v45, %v1545_v19  ;;  %v1547_v2 = vsel %vm3947_vm7, %v1545_v19, %v1543_v45  ;;  %v1534_v45 = vmul.f32 %v1532_v57, %v3518_v54  ;;  %v1535_v37 = vadd.f32 %v1533_v18, %v1519_v47  ;;  %v2444_v54 = vld [vmem:[%s3843_s3 + $0x48] sm:$0xf] }
 0x230   :  { %v1548_v58 = vsel %vm2798_vm8, %v1546_v1, 0.0  ;;  %v1549_v50 = vsel %vm3948_vm3, %v1547_v2, 0.0  ;;  %vm3949_vm4 = vcmp.lt.s32.totalorder %v2670_v52, 113 }
 0x231   :  { %v1556_v29 = vperm.slane %v1548_v58, 0  ;;  %v1557_v11 = vperm.slane %v1549_v50, 0  ;;  %v1568_v16 = vperm.slane %v1548_v58, 1  ;;  %v1569_v59 = vperm.slane %v1549_v50, 1  ;;  %vm3950_vm7 = vmmov %vm3949_vm4 }
 0x232   :  { %v1536_v19 = vadd.f32 %v1534_v45, %v1520_v28  ;;  %v1580_v2 = vperm.slane %v1548_v58, 2  ;;  %v1581_v3 = vperm.slane %v1549_v50, 2  ;;  %v1592_v48 = vperm.slane %v1548_v58, 3 }
 0x233   :  { %1970 = vperm.xlu0 %2476, %v2438_v63   ;;  %v1558_v32 = vmul.f32 %v1556_v29, %v3529_v38  ;;  %v1559_v0 = vmul.f32 %v1557_v11, %v3529_v38  ;;  %v1593_v40 = vperm.slane %v1549_v50, 3  ;;  %v1676_v28 = vpop.permute.xlu2 %1675 }
 0x235   :  { %v1566_v49 = vpop.permute.xlu0 %1565  ;;  %v1560_v38 = vadd.f32 %v1558_v32, %v1535_v37  ;;  %v1561_v46 = vadd.f32 %v1559_v0, %v1536_v19  ;;  %v1595_v55 = vmul.f32 %v1593_v40, %v3540_v17 }
 0x236   :  { %v1578_v31 = vpop.permute.xlu1 %1577  ;;  %v1570_v63 = vmul.f32 %v1568_v16, %v1566_v49  ;;  %v1571_v13 = vmul.f32 %v1569_v59, %v1566_v49 }
 0x237   :  { %v1582_v41 = vmul.f32 %v1580_v2, %v1578_v31  ;;  %v1583_v33 = vmul.f32 %v1581_v3, %v1578_v31 }
 0x238   :  { %v1572_v25 = vadd.f32 %v1570_v63, %v1560_v38  ;;  %v1573_v1 = vadd.f32 %v1571_v13, %v1561_v46 }
 0x23a   :  { %v1584_v6 = vadd.f32 %v1582_v41, %v1572_v25  ;;  %v1585_v4 = vadd.f32 %v1583_v33, %v1573_v1 }
 0x23b   :  { %2006 = vperm.xlu0 %2476, %v2441_v21   ;;  %v1594_v21 = vmul.f32 %v1592_v48, %v3540_v17  ;;  %v1712_v2 = vpop.permute.xlu2 %1711 }
 0x23c   :  { %v1597_v58 = vadd.f32 %v1595_v55, %v1585_v4 }
 0x23d   :  { %v1604_v39 = vpop.permute.xlu0 %1603  ;;  %v1596_v18 = vadd.f32 %v1594_v21, %v1584_v6 }
 0x23e   :  { %v1606_v10 = vpop.permute.xlu1 %1605 }
 0x23f   :  { %v1607_v23 = vsel %vm3949_vm4, %v1604_v39, %v1606_v10  ;;  %v1608_v12 = vsel %vm3950_vm7, %v1606_v10, %v1604_v39  ;;  %vm3951_vm4 = vcmp.lt.s32.totalorder %v2670_v52, 112 }
 0x240   :  { %v1609_v35 = vsel %vm2948_vm13, %v1607_v23, 0.0  ;;  %v1610_v44 = vsel %vm3926_vm9, %v1608_v12, 0.0  ;;  %vm3952_vm7 = vmmov %vm3951_vm4  ;;  %vm3953_vm9 = vnez %v3904_v42 }
 0x241   :  { %v1617_v20 = vperm.slane %v1609_v35, 0  ;;  %v1618_v49 = vperm.slane %v1610_v44, 0  ;;  %v1629_v11 = vperm.slane %v1609_v35, 1  ;;  %v1630_v47 = vperm.slane %v1610_v44, 1 }
 0x242   :  { %v1641_v39 = vperm.slane %v1609_v35, 2  ;;  %v1642_v37 = vperm.slane %v1610_v44, 2  ;;  %v1653_v63 = vperm.slane %v1609_v35, 3  ;;  %v1654_v13 = vperm.slane %v1610_v44, 3 }
 0x243   :  { %2042 = vperm.xlu0 %2476, %v2444_v54   ;;  %v1619_v27 = vmul.f32 %v1617_v20, %v1615_v14  ;;  %v1620_v29 = vmul.f32 %v1618_v49, %v1615_v14 }
 0x244   :  { %v1655_v35 = vmul.f32 %v1653_v63, %v1651_v60  ;;  %v1656_v44 = vmul.f32 %v1654_v13, %v1651_v60 }
 0x245   :  { %v1627_v56 = vpop.permute.xlu0 %1626  ;;  %v1621_v31 = vadd.f32 %v1619_v27, %v1596_v18  ;;  %v1622_v32 = vadd.f32 %v1620_v29, %v1597_v58 }
 0x246   :  { %v1639_v57 = vpop.permute.xlu1 %1638  ;;  %v1631_v50 = vmul.f32 %v1629_v11, %v1627_v56  ;;  %v1632_v45 = vmul.f32 %v1630_v47, %v1627_v56 }
 0x247   :  { %v1643_v10 = vmul.f32 %v1641_v39, %v1639_v57  ;;  %v1644_v23 = vmul.f32 %v1642_v37, %v1639_v57 }
 0x248   :  { %v1633_v16 = vadd.f32 %v1631_v50, %v1621_v31  ;;  %v1634_v59 = vadd.f32 %v1632_v45, %v1622_v32  ;;  %v1737_v45 = vpop.permute.xlu2 %1736 }
 0x24a   :  { %v1645_v25 = vadd.f32 %v1643_v10, %v1633_v16  ;;  %v1646_v1 = vadd.f32 %v1644_v23, %v1634_v59 }
 0x24c   :  { %v1657_v20 = vadd.f32 %v1655_v35, %v1645_v25  ;;  %v1658_v49 = vadd.f32 %v1656_v44, %v1646_v1 }
 0x24d   :  { %v1665_v0 = vpop.permute.xlu0 %1664 }
 0x24e   :  { %v1667_v19 = vpop.permute.xlu1 %1666 }
 0x24f   :  { %v1668_v17 = vsel %vm3951_vm4, %v1665_v0, %v1667_v19  ;;  %v1669_v14 = vsel %vm3952_vm7, %v1667_v19, %v1665_v0  ;;  %vm3954_vm4 = vcmp.lt.s32.totalorder %v2670_v52, 111 }
 0x250   :  { %v1670_v12 = vsel %vm2929_vm15, %v1668_v17, 0.0  ;;  %v1671_v54 = vsel %vm3953_vm9, %v1669_v14, 0.0  ;;  %vm3955_vm7 = vmmov %vm3954_vm4 }
 0x251   :  { %v1678_v38 = vperm.slane %v1670_v12, 0  ;;  %v1679_v46 = vperm.slane %v1671_v54, 0  ;;  %v1690_v41 = vperm.slane %v1670_v12, 1  ;;  %v1691_v33 = vperm.slane %v1671_v54, 1 }
 0x252   :  { %v1702_v29 = vperm.slane %v1670_v12, 2  ;;  %v1703_v11 = vperm.slane %v1671_v54, 2  ;;  %v1714_v47 = vperm.slane %v1670_v12, 3  ;;  %v1715_v18 = vperm.slane %v1671_v54, 3 }
 0x253   :  { %v1680_v48 = vmul.f32 %v1678_v38, %v1676_v28  ;;  %v1681_v40 = vmul.f32 %v1679_v46, %v1676_v28 }
 0x254   :  { %v1716_v59 = vmul.f32 %v1714_v47, %v1712_v2  ;;  %v1717_v39 = vmul.f32 %v1715_v18, %v1712_v2 }
 0x255   :  { %v1688_v3 = vpop.permute.xlu0 %1687  ;;  %v1682_v57 = vadd.f32 %v1680_v48, %v1657_v20  ;;  %v1683_v21 = vadd.f32 %v1681_v40, %v1658_v49 }
 0x256   :  { %v1692_v56 = vmul.f32 %v1690_v41, %v1688_v3  ;;  %v1693_v6 = vmul.f32 %v1691_v33, %v1688_v3  ;;  %v1700_v4 = vpop.permute.xlu1 %1699 }
 0x257   :  { %v1704_v60 = vmul.f32 %v1702_v29, %v1700_v4  ;;  %v1705_v58 = vmul.f32 %v1703_v11, %v1700_v4 }
 0x258   :  { %v1694_v55 = vadd.f32 %v1692_v56, %v1682_v57  ;;  %v1695_v27 = vadd.f32 %v1693_v6, %v1683_v21  ;;  %v1773_v56 = vpop.permute.xlu2 %1772 }
 0x25a   :  { %v1706_v28 = vadd.f32 %v1704_v60, %v1694_v55  ;;  %v1707_v31 = vadd.f32 %v1705_v58, %v1695_v27 }
 0x25c   :  { %v1718_v17 = vadd.f32 %v1716_v59, %v1706_v28  ;;  %v1719_v14 = vadd.f32 %v1717_v39, %v1707_v31  ;;  %v2428_v28 = vld [vmem:[%s3843_s3 + $0x8] sm:$0xf]  ;;  %v2427_v31 = vld [vmem:[%s3843_s3 + $0x4] sm:$0xf]  ;;  %v2456_v59 = vld [vmem:[%s3843_s3 + $0x78] sm:$0xf] }
 0x25d   :  { %v1726_v50 = vpop.permute.xlu0 %1725  ;;  %v2436_v39 = vld [vmem:[%s3843_s3 + $0x28] sm:$0xf] }
 0x25e   :  { %v1728_v32 = vpop.permute.xlu1 %1727 }
 0x25f   :  { %v1729_v0 = vsel %vm3954_vm4, %v1726_v50, %v1728_v32  ;;  %v1730_v16 = vsel %vm3955_vm7, %v1728_v32, %v1726_v50  ;;  %v2452_v32 = vld [vmem:[%s3843_s3 + $0x68] sm:$0xf]  ;;  %vm3956_vm4 = vcmp.lt.s32.totalorder %v2670_v52, 17  ;;  %vm3958_vm7 = vcmp.lt.s32.totalorder %v2670_v52, 16 }
 0x260   :  { %v1731_v37 = vsel %vm2982_vm10, %v1729_v0, 0.0  ;;  %v1732_v19 = vsel %vm3932_vm14, %v1730_v16, 0.0  ;;  %v2432_v0 = vld [vmem:[%s3843_s3 + $0x18] sm:$0xf]  ;;  %v2431_v16 = vld [vmem:[%s3843_s3 + $0x14] sm:$0xf] }
 0x261   :  { %v1739_v63 = vperm.slane %v1731_v37, 0  ;;  %v1740_v13 = vperm.slane %v1732_v19, 0  ;;  %v1751_v12 = vperm.slane %v1731_v37, 1  ;;  %v1752_v54 = vperm.slane %v1732_v19, 1 }
 0x262   :  { %v1775_v38 = vperm.slane %v1731_v37, 3  ;;  %v1776_v46 = vperm.slane %v1732_v19, 3  ;;  %v1763_v1 = vperm.slane %v1731_v37, 2  ;;  %v1764_v35 = vperm.slane %v1732_v19, 2  ;;  %v2435_v37 = vld [vmem:[%s3843_s3 + $0x24] sm:$0xf] }
 0x263   :  { %v1741_v10 = vmul.f32 %v1739_v63, %v1737_v45  ;;  %v1742_v23 = vmul.f32 %v1740_v13, %v1737_v45  ;;  %v2448_v45 = vld [vmem:[%s3843_s3 + $0x58] sm:$0xf]  ;;  %v2457_v19 = vld [vmem:[%s3843_s3 + $0x7c] sm:$0xf]  ;;  %v2460_v63 = vld [vmem:[%s3843_s3 + $0x88] sm:$0xf] }
 0x264   :  { %v1777_v57 = vmul.f32 %v1775_v38, %v1773_v56  ;;  %v1778_v21 = vmul.f32 %v1776_v46, %v1773_v56  ;;  %v2440_v13 = vld [vmem:[%s3843_s3 + $0x38] sm:$0xf]  ;;  %v2449_v38 = vld [vmem:[%s3843_s3 + $0x5c] sm:$0xf] }
 0x265   :  { %v1749_v25 = vpop.permute.xlu0 %1748  ;;  %v1743_v44 = vadd.f32 %v1741_v10, %v1718_v17  ;;  %v1744_v2 = vadd.f32 %v1742_v23, %v1719_v14  ;;  %v2439_v17 = vld [vmem:[%s3843_s3 + $0x34] sm:$0xf]  ;;  %v2443_v14 = vld [vmem:[%s3843_s3 + $0x44] sm:$0xf]  ;;  %v2442_v10 = vld [vmem:[%s3843_s3 + $0x40] sm:$0xf] }
 0x266   :  { %v1753_v3 = vmul.f32 %v1751_v12, %v1749_v25  ;;  %v1754_v48 = vmul.f32 %v1752_v54, %v1749_v25  ;;  %v1761_v40 = vpop.permute.xlu1 %1760  ;;  %v2445_v23 = vld [vmem:[%s3843_s3 + $0x4c] sm:$0xf]  ;;  %v2447_v12 = vld [vmem:[%s3843_s3 + $0x54] sm:$0xf]  ;;  %v2446_v54 = vld [vmem:[%s3843_s3 + $0x50] sm:$0xf] }
 0x267   :  { %v1765_v20 = vmul.f32 %v1763_v1, %v1761_v40  ;;  %v1766_v49 = vmul.f32 %v1764_v35, %v1761_v40  ;;  %v2451_v1 = vld [vmem:[%s3843_s3 + $0x64] sm:$0xf]  ;;  %v2450_v35 = vld [vmem:[%s3843_s3 + $0x60] sm:$0xf]  ;;  %v2455_v40 = vld [vmem:[%s3843_s3 + $0x74] sm:$0xf] }
 0x268   :  { %v1755_v41 = vadd.f32 %v1753_v3, %v1743_v44  ;;  %v1756_v33 = vadd.f32 %v1754_v48, %v1744_v2  ;;  %v2453_v3 = vld [vmem:[%s3843_s3 + $0x6c] sm:$0xf] }
 0x26a   :  { %v1767_v6 = vadd.f32 %v1765_v20, %v1755_v41  ;;  %v1768_v4 = vadd.f32 %v1766_v49, %v1756_v33  ;;  %v2454_v41 = vld [vmem:[%s3843_s3 + $0x70] sm:$0xf] }
 0x26c   :  { %v1779_v55 = vadd.f32 %v1777_v57, %v1767_v6  ;;  %v1780_v27 = vadd.f32 %v1778_v21, %v1768_v4 }
 0x26d   :  { %v1785_v29 = vpop.permute.xlu0 %1784 }
 0x26e   :  { %v1787_v11 = vadd.f32 %v1785_v29, %v1779_v55  ;;  %v1788_v47 = vadd.f32 %v1785_v29, %v1780_v27 }
 0x270   :  { %v1789_v18 = vmul.f32 0.01, %v1787_v11  ;;  %v1790_v60 = vmul.f32 0.01, %v1788_v47 }
 0x272   :  { %v3595_v58 = vmax.f32 %v1787_v11, %v1789_v18  ;;  %v3597_v50 = vmax.f32 %v1788_v47, %v1790_v60 }
 0x274   :  { %2065 = vrot.lane.b32.xlu0 %v3597_v50, %s2508_s17  ;;  %1795 = vrot.lane.b32.xlu2 %v3597_v50, %s2504_s28 }
 0x275   :  { %1793 = vrot.lane.b32.xlu1 %v3595_v58, %s2504_s28  ;;  %v1805_v25 = vpop.permute.xlu0 %1804  ;;  %s2309_s28 = sshll.u32 %s3845_s5, 4  ;;  %s2310_s28 = int_to_ptr.hbm [resolvable:$true] %s2309_s28 }
 0x27c   :  { %2098 = vperm.xlu0 %2476, %v2448_v45   ;;  %1826 = vperm.xlu2 %2475, %v2428_v28   ;;  %v2458_v28 = vld [vmem:[%s3843_s3 + $0x80] sm:$0xf] }
 0x27d   :  { %1814 = vperm.xlu1 %2474, %v2427_v31   ;;  %v3688_v2 = vpop.permute.xlu0 %1838 }
 0x284   :  { %2121 = vrot.lane.b32.xlu0 %v3597_v50, %s2509_s27  ;;  %1849 = vrot.lane.b32.xlu2 %v3597_v50, %s2505_s6 }
 0x285   :  { %1847 = vrot.lane.b32.xlu1 %v3595_v58, %s2505_s6  ;;  %v1859_v33 = vpop.permute.xlu0 %1858 }
 0x28c   :  { %2154 = vperm.xlu0 %2476, %v2452_v32   ;;  %1882 = vperm.xlu2 %2475, %v2432_v0  }
 0x28d   :  { %1870 = vperm.xlu1 %2474, %v2431_v16   ;;  %v3709_v21 = vpop.permute.xlu0 %1894 }
 0x294   :  { %2177 = vrot.lane.b32.xlu0 %v3597_v50, %s2510_s14  ;;  %1905 = vrot.lane.b32.xlu2 %v3597_v50, %s2506_s13 }
 0x295   :  { %1903 = vrot.lane.b32.xlu1 %v3595_v58, %s2506_s13  ;;  %v3720_v16 = vpop.permute.xlu0 %1914 }
 0x29c   :  { %2210 = vperm.xlu0 %2476, %v2456_v59   ;;  %1938 = vperm.xlu2 %2475, %v2436_v39   ;;  %v2287_v39 = vld [vmem:[%s3844_s4] sm:$0xf] }
 0x29d   :  { %1926 = vperm.xlu1 %2474, %v2435_v37   ;;  %v2461_v37 = vld [vmem:[%s3843_s3 + $0x8c] sm:$0xf]  ;;  %s2512_s3 = smov [#allocation2]  }
 0x29e   :  { %s2307_s4 = sshll.u32 %s2512_s3, 4  ;;  %s2308_s4 = int_to_ptr.vmem [resolvable:$true] %s2307_s4 }
 0x2a4   :  { %2222 = vperm.xlu0 %2476, %v2457_v19   ;;  %1961 = vrot.lane.b32.xlu2 %v3597_v50, %s2507_s22 }
 0x2a5   :  { %1959 = vrot.lane.b32.xlu1 %v3595_v58, %s2507_s22 }
 0x2ac   :  { %2266 = vperm.xlu0 %2476, %v2460_v63   ;;  %1994 = vperm.xlu2 %2475, %v2440_v13  }
 0x2ad   :  { %1982 = vperm.xlu1 %2474, %v2439_v17  }
 0x2b4   :  { %2030 = vperm.xlu2 %2475, %v2443_v14   ;;  %v3734_v14 = vpop.permute.xlu0 %1950 }
 0x2b5   :  { %2018 = vperm.xlu1 %2474, %v2442_v10  }
 0x2bc   :  { %2063 = vrot.lane.b32.xlu2 %v3595_v58, %s2508_s17 }
 0x2bd   :  { %2054 = vperm.xlu1 %2474, %v2445_v23  }
 0x2c4   :  { %2086 = vperm.xlu2 %2475, %v2447_v12  }
 0x2c5   :  { %2074 = vperm.xlu1 %2474, %v2446_v54  }
 0x2cc   :  { %2119 = vrot.lane.b32.xlu2 %v3595_v58, %s2509_s27 }
 0x2cd   :  { %2110 = vperm.xlu1 %2474, %v2449_v38  }
 0x2ce   :  { %v1796_v46 = vpop.permute.xlu2 %1795 }
 0x2d4   :  { %2142 = vperm.xlu2 %2475, %v2451_v1  }
 0x2d5   :  { %2130 = vperm.xlu1 %2474, %v2450_v35  }
 0x2d6   :  { %v1827_v44 = vpop.permute.xlu2 %1826 }
 0x2dc   :  { %2175 = vrot.lane.b32.xlu2 %v3595_v58, %s2510_s14 }
 0x2dd   :  { %2166 = vperm.xlu1 %2474, %v2453_v3  }
 0x2de   :  { %v1850_v48 = vpop.permute.xlu2 %1849 }
 0x2e4   :  { %2198 = vperm.xlu2 %2475, %v2455_v40  }
 0x2e5   :  { %2186 = vperm.xlu1 %2474, %v2454_v41  }
 0x2e6   :  { %v3701_v20 = vpop.permute.xlu2 %1882 }
 0x2e7   :  { %v1794_v49 = vpop.permute.xlu1 %1793 }
 0x2e8   :  { %v1798_v56 = vsel %vm3956_vm4, %v1796_v46, %v1794_v49 }
 0x2e9   :  { %v1799_v6 = vsel %vm2724_vm5, %v1798_v56, 0.0  ;;  %vm3957_vm5 = vmmov %vm3956_vm4  ;;  %v3744_v56 = vpop.permute.xlu0 %1970 }
 0x2ea   :  { %v1807_v4 = vperm.slane %v1799_v6, 0  ;;  %v1829_v55 = vperm.slane %v1799_v6, 2  ;;  %v1817_v27 = vperm.slane %v1799_v6, 1  ;;  %v1841_v11 = vperm.slane %v1799_v6, 3  ;;  %vm3959_vm4 = vmmov %vm3958_vm7 }
 0x2eb   :  { %v1797_v63 = vsel %vm3957_vm5, %v1794_v49, %v1796_v46 }
 0x2ec   :  { %2233 = vrot.lane.b32.xlu2 %v3597_v50, %s2511_s25  ;;  %v1809_v57 = vmul.f32 %v1807_v4, %v1805_v25  ;;  %v1831_v60 = vmul.f32 %v1829_v55, %v1827_v44  ;;  %v1843_v31 = vmul.f32 %v1841_v11, %v3688_v2  ;;  %v1800_v17 = vsel %vm2732_vm6, %v1797_v63, 0.0 }
 0x2ed   :  { %2231 = vrot.lane.b32.xlu1 %v3595_v58, %s2511_s25  ;;  %v1808_v10 = vperm.slane %v1800_v17, 0  ;;  %v1818_v23 = vperm.slane %v1800_v17, 1  ;;  %v1830_v35 = vperm.slane %v1800_v17, 2  ;;  %v1842_v49 = vperm.slane %v1800_v17, 3 }
 0x2ee   :  { %v1906_v18 = vpop.permute.xlu2 %1905  ;;  %vm3962_vm6 = vcmp.lt.s32.totalorder %v2670_v52, 1 }
 0x2ef   :  { %v1815_v29 = vpop.permute.xlu1 %1814  ;;  %v1810_v3 = vmul.f32 %v1808_v10, %v1805_v25  ;;  %v1832_v6 = vmul.f32 %v1830_v35, %v1827_v44 }
 0x2f0   :  { %v1819_v47 = vmul.f32 %v1817_v27, %v1815_v29  ;;  %v1820_v12 = vmul.f32 %v1818_v23, %v1815_v29 }
 0x2f2   :  { %v1821_v45 = vadd.f32 %v1819_v47, %v1809_v57  ;;  %v1822_v41 = vadd.f32 %v1820_v12, %v1810_v3 }
 0x2f4   :  { %v1833_v32 = vadd.f32 %v1831_v60, %v1821_v45  ;;  %2254 = vperm.xlu2 %2475, %v2459_v34   ;;  %v1834_v55 = vadd.f32 %v1832_v6, %v1822_v41 }
 0x2f5   :  { %2242 = vperm.xlu1 %2474, %v2458_v28  }
 0x2f6   :  { %v1845_v0 = vadd.f32 %v1843_v31, %v1833_v32  ;;  %v3728_v19 = vpop.permute.xlu2 %1938 }
 0x2f7   :  { %v1848_v59 = vpop.permute.xlu1 %1847 }
 0x2f8   :  { %v1851_v54 = vsel %vm3958_vm7, %v1848_v59, %v1850_v48  ;;  %v1852_v38 = vsel %vm3959_vm4, %v1850_v48, %v1848_v59  ;;  %v1844_v48 = vmul.f32 %v1842_v49, %v3688_v2  ;;  %v3753_v59 = vpop.permute.xlu0 %2006  ;;  %vm3969_vm7 = vnez %v3908_v61 }
 0x2f9   :  { %v1853_v40 = vsel %vm2696_vm0, %v1852_v38, 0.0  ;;  %v1854_v36 = vsel %vm2709_vm2, %v1851_v54, 0.0  ;;  %vm3960_vm0 = vcmp.lt.s32.totalorder %v2670_v52, 15 }
 0x2fa   :  { %v1861_v4 = vperm.slane %v1853_v40, 0  ;;  %v1862_v57 = vperm.slane %v1854_v36, 0  ;;  %v1873_v25 = vperm.slane %v1853_v40, 1  ;;  %v1874_v11 = vperm.slane %v1854_v36, 1  ;;  %vm3961_vm2 = vmmov %vm3960_vm0 }
 0x2fb   :  { %v1846_v34 = vadd.f32 %v1844_v48, %v1834_v55  ;;  %v1885_v28 = vperm.slane %v1853_v40, 2  ;;  %v1886_v31 = vperm.slane %v1854_v36, 2  ;;  %v1898_v17 = vperm.slane %v1854_v36, 3 }
 0x2fc   :  { %2290 = vperm.xlu2 %2475, %v2287_v39   ;;  %v1863_v27 = vmul.f32 %v1861_v4, %v1859_v33  ;;  %v1864_v29 = vmul.f32 %v1862_v57, %v1859_v33 }
 0x2fd   :  { %2278 = vperm.xlu1 %2474, %v2461_v37   ;;  %v1887_v10 = vmul.f32 %v1885_v28, %v3701_v20  ;;  %v1900_v62 = vmul.f32 %v1898_v17, %v3709_v21 }
 0x2fe   :  { %v1962_v1 = vpop.permute.xlu2 %1961  ;;  %v1865_v32 = vadd.f32 %v1863_v27, %v1845_v0  ;;  %v1866_v2 = vadd.f32 %v1864_v29, %v1846_v34 }
 0x2ff   :  { %v1871_v13 = vpop.permute.xlu1 %1870 }
 0x300   :  { %v1875_v9 = vmul.f32 %v1873_v25, %v1871_v13  ;;  %v1876_v60 = vmul.f32 %v1874_v11, %v1871_v13  ;;  %v1897_v13 = vperm.slane %v1853_v40, 3  ;;  %v3771_v55 = vpop.permute.xlu0 %2042 }
 0x302   :  { %v1877_v33 = vadd.f32 %v1875_v9, %v1865_v32  ;;  %v1878_v39 = vadd.f32 %v1876_v60, %v1866_v2  ;;  %v1899_v3 = vmul.f32 %v1897_v13, %v3709_v21 }
 0x304   :  { %v1889_v54 = vadd.f32 %v1887_v10, %v1877_v33 }
 0x306   :  { %v3747_v47 = vpop.permute.xlu2 %1994  ;;  %v1901_v41 = vadd.f32 %v1899_v3, %v1889_v54 }
 0x307   :  { %v1904_v46 = vpop.permute.xlu1 %1903 }
 0x308   :  { %v1907_v45 = vsel %vm3960_vm0, %v1904_v46, %v1906_v18  ;;  %v1908_v44 = vsel %vm3961_vm2, %v1906_v18, %v1904_v46  ;;  %v1888_v18 = vmul.f32 %v1886_v31, %v3701_v20  ;;  %v2066_v33 = vpop.permute.xlu0 %2065 }
 0x309   :  { %v1909_v37 = vsel %vm2819_vm11, %v1908_v44, 0.0  ;;  %v1910_v63 = vsel %vm2827_vm12, %v1907_v45, 0.0  ;;  %vm3963_vm11 = vmmov %vm3962_vm6  ;;  %vm3964_vm12 = vnez %v3886_v7 }
 0x30a   :  { %v1917_v12 = vperm.slane %v1909_v37, 0  ;;  %v1918_v0 = vperm.slane %v1910_v63, 0  ;;  %v1890_v38 = vadd.f32 %v1888_v18, %v1878_v39  ;;  %v1929_v40 = vperm.slane %v1909_v37, 1 }
 0x30b   :  { %v1930_v36 = vperm.slane %v1910_v63, 1  ;;  %v1941_v21 = vperm.slane %v1909_v37, 2  ;;  %v1942_v27 = vperm.slane %v1910_v63, 2  ;;  %v1953_v9 = vperm.slane %v1909_v37, 3 }
 0x30c   :  { %v1919_v24 = vmul.f32 %v1917_v12, %v3720_v16  ;;  %v1920_v46 = vmul.f32 %v1918_v0, %v3720_v16  ;;  %v1902_v49 = vadd.f32 %v1900_v62, %v1890_v38  ;;  %v1954_v60 = vperm.slane %v1910_v63, 3 }
 0x30d   :  { %v1944_v44 = vmul.f32 %v1942_v27, %v3728_v19  ;;  %v1955_v5 = vmul.f32 %v1953_v9, %v3734_v14 }
 0x30e   :  { %v3761_v35 = vpop.permute.xlu2 %2030  ;;  %v1921_v29 = vadd.f32 %v1919_v24, %v1901_v41  ;;  %v1922_v25 = vadd.f32 %v1920_v46, %v1902_v49  ;;  %v1956_v39 = vmul.f32 %v1954_v60, %v3734_v14 }
 0x30f   :  { %v1927_v53 = vpop.permute.xlu1 %1926 }
 0x310   :  { %v1931_v20 = vmul.f32 %v1929_v40, %v1927_v53  ;;  %v1932_v6 = vmul.f32 %v1930_v36, %v1927_v53  ;;  %v3785_v41 = vpop.permute.xlu0 %2098 }
 0x312   :  { %v1933_v53 = vadd.f32 %v1931_v20, %v1921_v29  ;;  %v1934_v34 = vadd.f32 %v1932_v6, %v1922_v25  ;;  %v2022_v6 = vperm.slane %v3597_v50, 0 }
 0x314   :  { %v1946_v2 = vadd.f32 %v1944_v44, %v1934_v34 }
 0x316   :  { %v2064_v45 = vpop.permute.xlu2 %2063  ;;  %v1958_v18 = vadd.f32 %v1956_v39, %v1946_v2 }
 0x317   :  { %v1960_v23 = vpop.permute.xlu1 %1959 }
 0x318   :  { %v1963_v4 = vsel %vm3962_vm6, %v1960_v23, %v1962_v1  ;;  %v1964_v57 = vsel %vm3963_vm11, %v1962_v1, %v1960_v23  ;;  %v1943_v1 = vmul.f32 %v1941_v21, %v3728_v19 }
 0x319   :  { %v1965_v16 = vsel %vm2702_vm1, %v1964_v57, 0.0  ;;  %v1966_v11 = vsel %vm3964_vm12, %v1963_v4, 0.0  ;;  %v2021_v4 = vperm.slane %v3595_v58, 0  ;;  %vm3965_vm1 = vcmp.lt.s32.totalorder %v2670_v52, 127 }
 0x31a   :  { %v1973_v28 = vperm.slane %v1965_v16, 0  ;;  %v1974_v31 = vperm.slane %v1966_v11, 0  ;;  %v1945_v32 = vadd.f32 %v1943_v1, %v1933_v53  ;;  %v1985_v63 = vperm.slane %v1965_v16, 1  ;;  %vm3966_vm5 = vmmov %vm3965_vm1 }
 0x31b   :  { %v1986_v17 = vperm.slane %v1966_v11, 1  ;;  %v1997_v12 = vperm.slane %v1965_v16, 2  ;;  %v1998_v0 = vperm.slane %v1966_v11, 2  ;;  %v2009_v14 = vperm.slane %v1965_v16, 3 }
 0x31c   :  { %v1975_v13 = vmul.f32 %v1973_v28, %v3744_v56  ;;  %v1976_v37 = vmul.f32 %v1974_v31, %v3744_v56  ;;  %v1957_v10 = vadd.f32 %v1955_v5, %v1945_v32  ;;  %v2010_v40 = vperm.slane %v1966_v11, 3  ;;  %v2122_v32 = vpop.permute.xlu0 %2121 }
 0x31d   :  { %v1999_v36 = vmul.f32 %v1997_v12, %v3747_v47  ;;  %v2000_v56 = vmul.f32 %v1998_v0, %v3747_v47  ;;  %v2011_v57 = vmul.f32 %v2009_v14, %v3753_v59  ;;  %v2033_v16 = vperm.slane %v3595_v58, 1 }
 0x31e   :  { %v1977_v54 = vadd.f32 %v1975_v13, %v1957_v10  ;;  %v1978_v38 = vadd.f32 %v1976_v37, %v1958_v18  ;;  %v2087_v3 = vpop.permute.xlu2 %2086  ;;  %v2034_v47 = vperm.slane %v3597_v50, 1  ;;  %v2067_v34 = vsel %vm3965_vm1, %v2064_v45, %v2066_v33 }
 0x31f   :  { %v1983_v48 = vpop.permute.xlu1 %1982  ;;  %v2068_v9 = vsel %vm3966_vm5, %v2066_v33, %v2064_v45  ;;  %v2045_v28 = vperm.slane %v3595_v58, 2  ;;  %v2046_v31 = vperm.slane %v3597_v50, 2  ;;  %v2069_v2 = vsel %vm2798_vm8, %v2067_v34, 0.0 }
 0x320   :  { %v1987_v23 = vmul.f32 %v1985_v63, %v1983_v48  ;;  %v1988_v19 = vmul.f32 %v1986_v17, %v1983_v48  ;;  %v2012_v48 = vmul.f32 %v2010_v40, %v3753_v59  ;;  %v2035_v59 = vmul.f32 %v2033_v16, %v3761_v35 }
 0x321   :  { %v2036_v44 = vmul.f32 %v2034_v47, %v3761_v35  ;;  %v2070_v5 = vsel %vm3948_vm3, %v2068_v9, 0.0  ;;  %v2058_v45 = vperm.slane %v3597_v50, 3  ;;  %v2057_v33 = vperm.slane %v3595_v58, 3 }
 0x322   :  { %v1989_v62 = vadd.f32 %v1987_v23, %v1977_v54  ;;  %v1990_v24 = vadd.f32 %v1988_v19, %v1978_v38  ;;  %v2047_v13 = vmul.f32 %v2045_v28, %v3771_v55  ;;  %v2048_v35 = vmul.f32 %v2046_v31, %v3771_v55 }
 0x323   :  { %v2077_v17 = vperm.slane %v2069_v2, 0  ;;  %v2078_v10 = vperm.slane %v2070_v5, 0  ;;  %v2089_v38 = vperm.slane %v2069_v2, 1  ;;  %v2090_v50 = vperm.slane %v2070_v5, 1 }
 0x324   :  { %v2001_v49 = vadd.f32 %v1999_v36, %v1989_v62  ;;  %v2002_v20 = vadd.f32 %v2000_v56, %v1990_v24  ;;  %vm3967_vm3 = vcmp.lt.s32.totalorder %v2670_v52, 113  ;;  %v2101_v14 = vperm.slane %v2069_v2, 2 }
 0x325   :  { %vm3968_vm8 = vmmov %vm3967_vm3  ;;  %v2102_v40 = vperm.slane %v2070_v5, 2  ;;  %v2091_v36 = vmul.f32 %v2089_v38, %v2087_v3  ;;  %v2092_v56 = vmul.f32 %v2090_v50, %v2087_v3 }
 0x326   :  { %v2013_v29 = vadd.f32 %v2011_v57, %v2001_v49  ;;  %v2014_v25 = vadd.f32 %v2012_v48, %v2002_v20  ;;  %v2120_v11 = vpop.permute.xlu2 %2119  ;;  %v2113_v48 = vperm.slane %v2069_v2, 3 }
 0x327   :  { %v2019_v7 = vpop.permute.xlu1 %2018  ;;  %v2123_v58 = vsel %vm3967_vm3, %v2120_v11, %v2122_v32  ;;  %v2124_v55 = vsel %vm3968_vm8, %v2122_v32, %v2120_v11 }
 0x328   :  { %v2023_v21 = vmul.f32 %v2021_v4, %v2019_v7  ;;  %v2024_v27 = vmul.f32 %v2022_v6, %v2019_v7  ;;  %v2125_v49 = vsel %vm2948_vm13, %v2123_v58, 0.0  ;;  %v2126_v20 = vsel %vm3969_vm7, %v2124_v55, 0.0 }
 0x329   :  { %v2133_v47 = vperm.slane %v2125_v49, 0  ;;  %v2134_v11 = vperm.slane %v2126_v20, 0  ;;  %vm3970_vm13 = vcmp.lt.s32.totalorder %v2670_v52, 112 }
 0x32a   :  { %v2025_v60 = vadd.f32 %v2023_v21, %v2013_v29  ;;  %v2026_v1 = vadd.f32 %v2024_v27, %v2014_v25  ;;  %v2114_v21 = vperm.slane %v2070_v5, 3  ;;  %v2103_v27 = vmul.f32 %v2101_v14, %v3785_v41  ;;  %vm3971_vm4 = vmmov %vm3970_vm13 }
 0x32b   :  { %v2104_v29 = vmul.f32 %v2102_v40, %v3785_v41  ;;  %v2157_v5 = vperm.slane %v2125_v49, 2 }
 0x32c   :  { %v2037_v39 = vadd.f32 %v2035_v59, %v2025_v60  ;;  %v2038_v7 = vadd.f32 %v2036_v44, %v2026_v1  ;;  %v2145_v59 = vperm.slane %v2125_v49, 1  ;;  %v2146_v44 = vperm.slane %v2126_v20, 1 }
 0x32e   :  { %v2050_v8 = vadd.f32 %v2048_v35, %v2038_v7  ;;  %v2049_v23 = vadd.f32 %v2047_v13, %v2037_v39  ;;  %v2143_v12 = vpop.permute.xlu2 %2142  ;;  %v2158_v39 = vperm.slane %v2126_v20, 2 }
 0x32f   :  { %v2055_v46 = vpop.permute.xlu1 %2054  ;;  %v2147_v7 = vmul.f32 %v2145_v59, %v2143_v12 }
 0x330   :  { %v2059_v37 = vmul.f32 %v2057_v33, %v2055_v46  ;;  %v2060_v63 = vmul.f32 %v2058_v45, %v2055_v46  ;;  %v2155_v46 = vpop.permute.xlu0 %2154  ;;  %v2148_v45 = vmul.f32 %v2146_v44, %v2143_v12 }
 0x332   :  { %v2061_v0 = vadd.f32 %v2059_v37, %v2049_v23  ;;  %v2062_v54 = vadd.f32 %v2060_v63, %v2050_v8  ;;  %v2169_v63 = vperm.slane %v2125_v49, 3  ;;  %v2160_v8 = vmul.f32 %v2158_v39, %v2155_v46 }
 0x336   :  { %v2176_v3 = vpop.permute.xlu2 %2175 }
 0x337   :  { %v2075_v53 = vpop.permute.xlu1 %2074 }
 0x338   :  { %v2079_v19 = vmul.f32 %v2077_v17, %v2075_v53  ;;  %v2080_v15 = vmul.f32 %v2078_v10, %v2075_v53  ;;  %v2178_v1 = vpop.permute.xlu0 %2177  ;;  %v2170_v17 = vperm.slane %v2126_v20, 3 }
 0x339   :  { %v2179_v31 = vsel %vm3970_vm13, %v2176_v3, %v2178_v1  ;;  %v2180_v41 = vsel %vm3971_vm4, %v2178_v1, %v2176_v3 }
 0x33a   :  { %v2081_v62 = vadd.f32 %v2079_v19, %v2061_v0  ;;  %v2082_v24 = vadd.f32 %v2080_v15, %v2062_v54  ;;  %v2181_v33 = vsel %vm2929_vm15, %v2179_v31, 0.0  ;;  %v2182_v13 = vsel %vm3953_vm9, %v2180_v41, 0.0 }
 0x33b   :  { %v2189_v15 = vperm.slane %v2181_v33, 0  ;;  %v2190_v0 = vperm.slane %v2182_v13, 0  ;;  %vm3972_vm9 = vcmp.lt.s32.totalorder %v2670_v52, 111 }
 0x33c   :  { %v2093_v4 = vadd.f32 %v2091_v36, %v2081_v62  ;;  %v2094_v57 = vadd.f32 %v2092_v56, %v2082_v24  ;;  %v2201_v62 = vperm.slane %v2181_v33, 1  ;;  %v2202_v24 = vperm.slane %v2182_v13, 1  ;;  %vm3973_vm15 = vmmov %vm3972_vm9 }
 0x33d   :  { %v2213_v36 = vperm.slane %v2181_v33, 2  ;;  %v2214_v56 = vperm.slane %v2182_v13, 2 }
 0x33e   :  { %v2106_v53 = vadd.f32 %v2104_v29, %v2094_v57  ;;  %v2105_v30 = vadd.f32 %v2103_v27, %v2093_v4  ;;  %v2199_v10 = vpop.permute.xlu2 %2198  ;;  %v2225_v27 = vperm.slane %v2181_v33, 3  ;;  %v2226_v29 = vperm.slane %v2182_v13, 3 }
 0x33f   :  { %v2111_v18 = vpop.permute.xlu1 %2110  ;;  %v2203_v49 = vmul.f32 %v2201_v62, %v2199_v10 }
 0x340   :  { %v2115_v25 = vmul.f32 %v2113_v48, %v2111_v18  ;;  %v2116_v16 = vmul.f32 %v2114_v21, %v2111_v18  ;;  %v2159_v18 = vmul.f32 %v2157_v5, %v2155_v46  ;;  %v2211_v58 = vpop.permute.xlu0 %2210  ;;  %v2204_v46 = vmul.f32 %v2202_v24, %v2199_v10 }
 0x342   :  { %v2117_v61 = vadd.f32 %v2115_v25, %v2105_v30  ;;  %v2118_v60 = vadd.f32 %v2116_v16, %v2106_v53  ;;  %v2215_v25 = vmul.f32 %v2213_v36, %v2211_v58  ;;  %v2216_v16 = vmul.f32 %v2214_v56, %v2211_v58 }
 0x346   :  { %v2234_v20 = vpop.permute.xlu2 %2233 }
 0x347   :  { %v2131_v6 = vpop.permute.xlu1 %2130 }
 0x348   :  { %v2135_v34 = vmul.f32 %v2133_v47, %v2131_v6  ;;  %v2136_v9 = vmul.f32 %v2134_v11, %v2131_v6  ;;  %v2223_v47 = vpop.permute.xlu0 %2222 }
 0x34a   :  { %v2137_v32 = vadd.f32 %v2135_v34, %v2117_v61  ;;  %v2138_v2 = vadd.f32 %v2136_v9, %v2118_v60  ;;  %v2227_v34 = vmul.f32 %v2225_v27, %v2223_v47  ;;  %v2228_v9 = vmul.f32 %v2226_v29, %v2223_v47 }
 0x34c   :  { %v2149_v35 = vadd.f32 %v2147_v7, %v2137_v32  ;;  %v2150_v37 = vadd.f32 %v2148_v45, %v2138_v2 }
 0x34e   :  { %v2162_v38 = vadd.f32 %v2160_v8, %v2150_v37  ;;  %v2161_v12 = vadd.f32 %v2159_v18, %v2149_v35  ;;  %v2255_v32 = vpop.permute.xlu2 %2254 }
 0x34f   :  { %v2167_v28 = vpop.permute.xlu1 %2166 }
 0x350   :  { %v2171_v23 = vmul.f32 %v2169_v63, %v2167_v28  ;;  %v2172_v19 = vmul.f32 %v2170_v17, %v2167_v28  ;;  %v2267_v13 = vpop.permute.xlu0 %2266 }
 0x352   :  { %v2173_v55 = vadd.f32 %v2171_v23, %v2161_v12  ;;  %v2174_v42 = vadd.f32 %v2172_v19, %v2162_v38 }
 0x357   :  { %v2187_v54 = vpop.permute.xlu1 %2186 }
 0x358   :  { %v2191_v50 = vmul.f32 %v2189_v15, %v2187_v54  ;;  %v2192_v26 = vmul.f32 %v2190_v0, %v2187_v54  ;;  %v2291_v54 = vpop.permute.xlu2 %2290 }
 0x35a   :  { %v2193_v14 = vadd.f32 %v2191_v50, %v2173_v55  ;;  %v2194_v40 = vadd.f32 %v2192_v26, %v2174_v42 }
 0x35c   :  { %v2205_v4 = vadd.f32 %v2203_v49, %v2193_v14  ;;  %v2206_v57 = vadd.f32 %v2204_v46, %v2194_v40 }
 0x35e   :  { %v2218_v53 = vadd.f32 %v2216_v16, %v2206_v57  ;;  %v2217_v30 = vadd.f32 %v2215_v25, %v2205_v4 }
 0x35f   :  { %v2232_v6 = vpop.permute.xlu1 %2231 }
 0x360   :  { %v2235_v48 = vsel %vm3972_vm9, %v2232_v6, %v2234_v20  ;;  %v2236_v21 = vsel %vm3973_vm15, %v2234_v20, %v2232_v6  ;;  %v2230_v44 = vadd.f32 %v2228_v9, %v2218_v53  ;;  %v2229_v28 = vadd.f32 %v2227_v34, %v2217_v30 }
 0x361   :  { %v2237_v11 = vsel %vm2982_vm10, %v2235_v48, 0.0  ;;  %v2238_v3 = vsel %vm3932_vm14, %v2236_v21, 0.0  ;;  %vm3974_vm10 = vcmask 1043456  }
 0x362   :  { %v2257_v61 = vperm.slane %v2237_v11, 1  ;;  %v2258_v60 = vperm.slane %v2238_v3, 1  ;;  %v2245_v1 = vperm.slane %v2237_v11, 0  ;;  %v2246_v52 = vperm.slane %v2238_v3, 0 }
 0x363   :  { %v2269_v2 = vperm.slane %v2237_v11, 2  ;;  %v2270_v51 = vperm.slane %v2238_v3, 2  ;;  %v2281_v63 = vperm.slane %v2237_v11, 3  ;;  %v2282_v17 = vperm.slane %v2238_v3, 3 }
 0x364   :  { %v2259_v5 = vmul.f32 %v2257_v61, %v2255_v32  ;;  %v2260_v39 = vmul.f32 %v2258_v60, %v2255_v32 }
 0x365   :  { %v2271_v35 = vmul.f32 %v2269_v2, %v2267_v13  ;;  %v2272_v37 = vmul.f32 %v2270_v51, %v2267_v13 }
 0x367   :  { %v2243_v59 = vpop.permute.xlu1 %2242 }
 0x368   :  { %v2247_v31 = vmul.f32 %v2245_v1, %v2243_v59  ;;  %v2248_v41 = vmul.f32 %v2246_v52, %v2243_v59 }
 0x36a   :  { %v2249_v43 = vadd.f32 %v2247_v31, %v2229_v28  ;;  %v2250_v7 = vadd.f32 %v2248_v41, %v2230_v44 }
 0x36c   :  { %v2261_v45 = vadd.f32 %v2259_v5, %v2249_v43  ;;  %v2262_v33 = vadd.f32 %v2260_v39, %v2250_v7 }
 0x36e   :  { %v2274_v18 = vadd.f32 %v2272_v37, %v2262_v33  ;;  %v2273_v8 = vadd.f32 %v2271_v35, %v2261_v45 }
 0x36f   :  { %v2279_v10 = vpop.permute.xlu1 %2278 }
 0x370   :  { %v2283_v23 = vmul.f32 %v2281_v63, %v2279_v10  ;;  %v2284_v19 = vmul.f32 %v2282_v17, %v2279_v10 }
 0x372   :  { %v2285_v15 = vadd.f32 %v2283_v23, %v2273_v8  ;;  %v2286_v0 = vadd.f32 %v2284_v19, %v2274_v18 }
 0x374   :  { %v2294_v38 = vadd.f32 %v2291_v54, %v2286_v0  ;;  %v2293_v12 = vadd.f32 %v2291_v54, %v2285_v15 }
 0x376   :  { %v2297_v50 = vrot.slane %v2294_v38, 4 }
 0x378   :  { %v2298_v26 = vsel %vm3974_vm10, %v2293_v12, %v2297_v50 }
 0x379   :  { %v2300_v58 = vadd.f32 %v3056_v22, %v2298_v26 }
 0x37b   :  { %2302 = vst [vmem:[#allocation2 + $0x8] sm:$0xff] %v2300_v58 }
 0x37c   :  { %2315 = dma.vmem_to_hbm [thread:$0]  %s2308_s4, 256, %s2310_s28, [#allocation3], %s2513_s7, %s2513_s7, %s2514_s8  }
 0x37d   :  { %2501 = dma.done.wait [#allocation3], 256  }
 0x37e   :  { %2502 = vsyncadd [#allocation3], 4294967040 }
 0x37f   :  { %2320 = vsyncpa [#allocation3], 1 }

</bundles_post_ra>
